<compile_context>
chip_gen: v5e
topology: v5e:2x2
jax: 0.10.0
libtpu: 0.0.40
codegen_flags: <defaults>
</compile_context>

<pallas_src>
import numpy as np
import jax
import jax.numpy as jnp
from jax.experimental import pallas as pl
from jax.experimental.pallas import tpu as pltpu


# ----------------------------------------------------------------------------
# Fused BasicBlock kernel: (conv3x3 + BN + ReLU) * L  + maxpool 2x2
# ----------------------------------------------------------------------------
def _make_block_kernel(num_layers, H, W, cins, couts):
    Hh, Wh = H // 2, W // 2

    def kernel(*refs):
        # refs = [x, (wb, bias) * L, out, pad_scratch]
        x_ref = refs[0]
        layer_refs = refs[1:1 + 2 * num_layers]
        o_ref = refs[1 + 2 * num_layers]
        pad_ref = refs[2 + 2 * num_layers]            # (H+2, W*max_c) bf16

        act = x_ref[...]                              # (H, W*Cin0) bf16
        for l in range(num_layers):
            wb_ref = layer_refs[2 * l]                # (3, W*Cin, W*Cout) bf16
            b_ref = layer_refs[2 * l + 1]             # (1, W*Cout) f32
            cin, cout = cins[l], couts[l]
            wcin, wcout = W * cin, W * cout

            # Row-halo padded activation in the shared scratch.
            # Border-only zeroing: just the two halo rows (the W-direction
            # padding is encoded in the banded weights).
            zrow = jnp.zeros((1, wcin), jnp.bfloat16)
            pad_ref[pl.ds(0, 1), pl.ds(0, wcin)] = zrow
            pad_ref[pl.ds(H + 1, 1), pl.ds(0, wcin)] = zrow
            pad_ref[pl.ds(1, H), pl.ds(0, wcin)] = act

            # 3x3 conv = 3 MXU matmuls (one per ky), f32 accumulation.
            # LHS per tap is a contiguous sublane-shifted view; no relayouts.
            acc = jnp.zeros((H, wcout), jnp.float32)
            for ky in range(3):
                lhs = pad_ref[pl.ds(ky, H), pl.ds(0, wcin)]   # (H, W*Cin) bf16
                acc = acc + jnp.dot(lhs, wb_ref[ky, :, :],
                                    preferred_element_type=jnp.float32)

            # Folded BN (scale is already inside wb) + bias + ReLU, f32.
            act_f32 = jnp.maximum(acc + b_ref[...], 0.0)      # (H, W*Cout)

            if l + 1 < num_layers:
                # Feed next conv layer (bf16 MXU input), still VMEM resident.
                act = act_f32.astype(jnp.bfloat16)
            else:
                # Fused MaxPool2d(kernel=2, stride=2); lanes are x*Cout + c.
                r = act_f32.reshape(Hh, 2, W * cout)
                hmax = jnp.maximum(r[:, 0, :], r[:, 1, :])    # (Hh, W*Cout)
                r2 = hmax.reshape(Hh, Wh, 2 * cout)
                pooled = jnp.maximum(r2[:, :, :cout], r2[:, :, cout:])
                o_ref[...] = pooled.reshape(Hh, Wh * cout).astype(o_ref.dtype)

    return kernel


# ----------------------------------------------------------------------------
# Wrapper: parameter packing (done once, host side) + pallas_call
# ----------------------------------------------------------------------------
def pack_params(params, W):
    """Fold BN scale into banded conv weights; tile BN bias along lanes.

    Returns list of (wb, bias_t):
      wb:     (3, W*Cin, W*Cout) bf16,
              wb[ky, xi*Cin+ci, xo*Cout+co] = scale[co] * w[ky, xi-xo+1, ci, co]
              (zero outside the 3-tap band -> implicit W-boundary zero pad).
      bias_t: (1, W*Cout) f32, lane layout x*Cout + c.
    """
    packed = []
    for (w9, scale, bias) in params:
        w = np.asarray(w9, np.float32)
        cin, cout = int(w.shape[1]), int(w.shape[2])
        w = w.reshape(3, 3, cin, cout) * np.asarray(scale, np.float32)[None, None, None, :]
        wb = np.zeros((3, W * cin, W * cout), np.float32)
        for ky in range(3):
            for kx in range(3):
                for xo in range(W):
                    xi = xo + kx - 1
                    if 0 <= xi < W:
                        wb[ky, xi * cin:(xi + 1) * cin,
                           xo * cout:(xo + 1) * cout] = w[ky, kx]
        bias_t = np.tile(np.asarray(bias, np.float32), W).reshape(1, W * cout)
        packed.append((jnp.asarray(wb, jnp.bfloat16), jnp.asarray(bias_t, jnp.float32)))
    return packed


@jax.jit
def basic_block_forward(x_nchw, packed):
    """x_nchw: (N, Cin, H, W) f32. packed: output of pack_params.
    Returns (N, Cout_last, H//2, W//2) f32."""
    N, Cin0, H, W = x_nchw.shape
    assert H % 2 == 0 and W % 2 == 0, "MaxPool2d(2,2) needs even spatial dims"
    num_layers = len(packed)
    cins = [int(wb.shape[1]) // W for (wb, _) in packed]
    couts = [int(wb.shape[2]) // W for (wb, _) in packed]
    assert cins[0] == Cin0
    cout_last = couts[-1]
    Hh, Wh = H // 2, W // 2
    max_c = max(cins)

    # NCHW -> lane-dense (N, H, W*Cin) bf16 slab (lane index = x*Cin + c).
    x = jnp.transpose(x_nchw, (0, 2, 3, 1)).reshape(N, H, W * Cin0).astype(jnp.bfloat16)

    args = [x]
    in_specs = [pl.BlockSpec((None, H, W * Cin0), lambda n: (n, 0, 0))]
    for (wb, bias_t) in packed:
        args += [wb, bias_t]
        in_specs += [
            pl.BlockSpec(wb.shape, lambda n: (0, 0, 0)),      # constant index -> stays resident
            pl.BlockSpec(bias_t.shape, lambda n: (0, 0)),
        ]

    # TODO(synk): for N == 1 on v7x add a parallel row-tile grid axis so both
    #             TensorCores have work; for large N / tiny H*W on v6e, block
    #             several batch elements per step to raise the matmul M dim.
    out_lane = pl.pallas_call(
        _make_block_kernel(num_layers, H, W, cins, couts),
        out_shape=jax.ShapeDtypeStruct((N, Hh, Wh * cout_last), jnp.float32),
        grid=(N,),
        in_specs=in_specs,
        out_specs=pl.BlockSpec((None, Hh, Wh * cout_last), lambda n: (n, 0, 0)),
        scratch_shapes=[pltpu.VMEM((H + 2, W * max_c), jnp.bfloat16)],
        compiler_params=pltpu.CompilerParams(dimension_semantics=("parallel",)),
    )(*args)

    # (N, Hh, Wh*Cout) lane layout x'*Cout + c  ->  NCHW
    return jnp.transpose(out_lane.reshape(N, Hh, Wh, cout_last), (0, 3, 1, 2))


# ----------------------------------------------------------------------------
# Deterministic synthetic parameters (BN folded to scale/bias) and reference
# ----------------------------------------------------------------------------
def init_params(key, cfg):
    eps = 1e-5
    params = []
    for c0, c1 in zip(cfg[:-1], cfg[1:]):
        key, k1, k2, k3, k4, k5 = jax.random.split(key, 6)
        w = jax.random.normal(k1, (9, c0, c1), jnp.float32) / jnp.sqrt(9.0 * c0)
        gamma = jax.random.uniform(k2, (c1,), jnp.float32, minval=0.8, maxval=1.2)
        beta = 0.1 * jax.random.normal(k3, (c1,), jnp.float32)
        mean = 0.1 * jax.random.normal(k4, (c1,), jnp.float32)
        var = jax.random.uniform(k5, (c1,), jnp.float32, minval=0.8, maxval=1.2)
        scale = gamma / jnp.sqrt(var + eps)                # fold BN into affine
        bias = beta - mean * scale
        params.append((w, scale, bias))
    return params


def ref_forward(x_nchw, params):
    """Pure-JAX (XLA) reference; conv inputs/weights rounded to bf16 (with BN
    scale folded into the weights) to mirror the kernel's MXU precision; all
    accumulation and elementwise math in f32."""
    x = x_nchw
    for (w9, scale, bias) in params:
        cin, cout = w9.shape[1], w9.shape[2]
        wf = (w9.reshape(3, 3, cin, cout) * scale[None, None, None, :])
        wf = wf.astype(jnp.bfloat16).astype(jnp.float32)
        xc = x.astype(jnp.bfloat16).astype(jnp.float32)
        x = jax.lax.conv_general_dilated(
            xc, wf, window_strides=(1, 1), padding=((1, 1), (1, 1)),
            dimension_numbers=('NCHW', 'HWIO', 'NCHW'),
            precision=jax.lax.Precision.HIGHEST)
        x = x + bias[None, :, None, None]
        x = jnp.maximum(x, 0.0)                            # ReLU (as in BasicBlock)
    x = jax.lax.reduce_window(
        x, -jnp.inf, jax.lax.max,
        window_dimensions=(1, 1, 2, 2), window_strides=(1, 1, 2, 2),
        padding='VALID')
    return x


if __name__ == "__main__":
    key = jax.random.PRNGKey(0)
    kp, kx = jax.random.split(key)
    N, H, W = 2, 16, 16
    cfg = [4, 32, 32]                      # BasicBlock cfg: two conv+bn+relu layers
    params = init_params(kp, cfg)
    packed = pack_params(params, W)
    img = jax.random.normal(kx, (N, cfg[0], H, W), jnp.float32)

    out = jax.block_until_ready(basic_block_forward(img, packed))
    assert out.shape == (N, cfg[-1], H // 2, W // 2), out.shape
    assert bool(jnp.all(jnp.isfinite(out)))

    ref = jax.block_until_ready(ref_forward(img, params))
    rel_err = float(jnp.max(jnp.abs(out - ref)) / (jnp.max(jnp.abs(ref)) + 1e-6))
    assert rel_err < 1e-2, f"mismatch vs reference: rel_err={rel_err}"

    print("KERNEL_OK")
</pallas_src>

<mosaic_0001>
module attributes {stable_mosaic.version = 11 : i64} {
  func.func @kernel(%arg0: i32, %arg1: memref<1x16x64xbf16, #tpu.memory_space<vmem>>, %arg2: memref<3x64x512xbf16, #tpu.memory_space<vmem>>, %arg3: memref<1x512xf32, #tpu.memory_space<vmem>>, %arg4: memref<3x512x512xbf16, #tpu.memory_space<vmem>>, %arg5: memref<1x512xf32, #tpu.memory_space<vmem>>, %arg6: memref<1x8x256xf32, #tpu.memory_space<vmem>>, %arg7: memref<18x512xbf16, #tpu.memory_space<vmem>>) attributes {dimension_semantics = [#tpu.dimension_semantics<parallel>], iteration_bounds = array<i64: 2>, scalar_prefetch = 0 : i64, scratch_operands = 1 : i64, tpu.core_type = #tpu.core_type<tc>, window_params = [{transform_indices = @transform_0, window_bounds = array<i64: 1, 16, 64>}, {pipeline_mode = #tpu.pipeline_mode<synchronous>, transform_indices = @transform_1, window_bounds = array<i64: 3, 64, 512>}, {pipeline_mode = #tpu.pipeline_mode<synchronous>, transform_indices = @transform_2, window_bounds = array<i64: 1, 512>}, {pipeline_mode = #tpu.pipeline_mode<synchronous>, transform_indices = @transform_3, window_bounds = array<i64: 3, 512, 512>}, {pipeline_mode = #tpu.pipeline_mode<synchronous>, transform_indices = @transform_4, window_bounds = array<i64: 1, 512>}, {transform_indices = @transform_5, window_bounds = array<i64: 1, 8, 256>}]} {
    %c0 = arith.constant 0 : index
    %c0_0 = arith.constant 0 : index
    %c0_1 = arith.constant 0 : index
    %0 = vector.load %arg1[%c0, %c0_0, %c0_1] : memref<1x16x64xbf16, #tpu.memory_space<vmem>>, vector<1x16x64xbf16>
    %1 = vector.shape_cast %0 : vector<1x16x64xbf16> to vector<16x64xbf16>
    %cst = arith.constant 0.000000e+00 : bf16
    %2 = vector.broadcast %cst : bf16 to vector<1x64xbf16>
    %c0_2 = arith.constant 0 : index
    %c0_3 = arith.constant 0 : index
    %3 = vector.load %arg7[%c0_2, %c0_3] : memref<18x512xbf16, #tpu.memory_space<vmem>>, vector<1x64xbf16>
    tpu.vector_store %arg7[%c0_2, %c0_3], %2 {strides = array<i32>} : memref<18x512xbf16, #tpu.memory_space<vmem>>, vector<1x64xbf16>,
    %c17 = arith.constant 17 : index
    %c0_4 = arith.constant 0 : index
    %4 = vector.load %arg7[%c17, %c0_4] : memref<18x512xbf16, #tpu.memory_space<vmem>>, vector<1x64xbf16>
    tpu.vector_store %arg7[%c17, %c0_4], %2 {strides = array<i32>} : memref<18x512xbf16, #tpu.memory_space<vmem>>, vector<1x64xbf16>,
    %c1 = arith.constant 1 : index
    %c0_5 = arith.constant 0 : index
    %5 = vector.load %arg7[%c1, %c0_5] : memref<18x512xbf16, #tpu.memory_space<vmem>>, vector<16x64xbf16>
    tpu.vector_store %arg7[%c1, %c0_5], %1 {strides = array<i32>} : memref<18x512xbf16, #tpu.memory_space<vmem>>, vector<16x64xbf16>,
    %cst_6 = arith.constant 0.000000e+00 : f32
    %6 = vector.broadcast %cst_6 : f32 to vector<16x512xf32>
    %c0_7 = arith.constant 0 : index
    %c0_8 = arith.constant 0 : index
    %7 = vector.load %arg7[%c0_7, %c0_8] : memref<18x512xbf16, #tpu.memory_space<vmem>>, vector<16x64xbf16>
    %c0_9 = arith.constant 0 : index
    %c0_10 = arith.constant 0 : index
    %c0_11 = arith.constant 0 : index
    %8 = vector.load %arg2[%c0_9, %c0_10, %c0_11] : memref<3x64x512xbf16, #tpu.memory_space<vmem>>, vector<1x64x512xbf16>
    %9 = vector.shape_cast %8 : vector<1x64x512xbf16> to vector<64x512xbf16>
    %cst_12 = arith.constant dense<0.000000e+00> : vector<16x512xf32>
    %10 = tpu.matmul %7, %9, %cst_12 {dimension_numbers = #tpu.dot_dimension_numbers<[1], [0], [0], [1], [0, 0, 1, 1], [], []>} : vector<16x64xbf16>, vector<64x512xbf16>, vector<16x512xf32> -> vector<16x512xf32>
    %11 = arith.addf %6, %10 : vector<16x512xf32>
    %c1_13 = arith.constant 1 : index
    %c0_14 = arith.constant 0 : index
    %12 = vector.load %arg7[%c1_13, %c0_14] : memref<18x512xbf16, #tpu.memory_space<vmem>>, vector<16x64xbf16>
    %c1_15 = arith.constant 1 : index
    %c0_16 = arith.constant 0 : index
    %c0_17 = arith.constant 0 : index
    %13 = vector.load %arg2[%c1_15, %c0_16, %c0_17] : memref<3x64x512xbf16, #tpu.memory_space<vmem>>, vector<1x64x512xbf16>
    %14 = vector.shape_cast %13 : vector<1x64x512xbf16> to vector<64x512xbf16>
    %cst_18 = arith.constant dense<0.000000e+00> : vector<16x512xf32>
    %15 = tpu.matmul %12, %14, %cst_18 {dimension_numbers = #tpu.dot_dimension_numbers<[1], [0], [0], [1], [0, 0, 1, 1], [], []>} : vector<16x64xbf16>, vector<64x512xbf16>, vector<16x512xf32> -> vector<16x512xf32>
    %16 = arith.addf %11, %15 : vector<16x512xf32>
    %c2 = arith.constant 2 : index
    %c0_19 = arith.constant 0 : index
    %17 = vector.load %arg7[%c2, %c0_19] : memref<18x512xbf16, #tpu.memory_space<vmem>>, vector<16x64xbf16>
    %c2_20 = arith.constant 2 : index
    %c0_21 = arith.constant 0 : index
    %c0_22 = arith.constant 0 : index
    %18 = vector.load %arg2[%c2_20, %c0_21, %c0_22] : memref<3x64x512xbf16, #tpu.memory_space<vmem>>, vector<1x64x512xbf16>
    %19 = vector.shape_cast %18 : vector<1x64x512xbf16> to vector<64x512xbf16>
    %cst_23 = arith.constant dense<0.000000e+00> : vector<16x512xf32>
    %20 = tpu.matmul %17, %19, %cst_23 {dimension_numbers = #tpu.dot_dimension_numbers<[1], [0], [0], [1], [0, 0, 1, 1], [], []>} : vector<16x64xbf16>, vector<64x512xbf16>, vector<16x512xf32> -> vector<16x512xf32>
    %21 = arith.addf %16, %20 : vector<16x512xf32>
    %c0_24 = arith.constant 0 : index
    %c0_25 = arith.constant 0 : index
    %22 = vector.load %arg3[%c0_24, %c0_25] : memref<1x512xf32, #tpu.memory_space<vmem>>, vector<1x512xf32>
    %23 = vector.broadcast %22 : vector<1x512xf32> to vector<16x512xf32>
    %24 = arith.addf %21, %23 : vector<16x512xf32>
    %cst_26 = arith.constant 0.000000e+00 : f32
    %25 = vector.broadcast %cst_26 : f32 to vector<16x512xf32>
    %26 = arith.maximumf %24, %25 : vector<16x512xf32>
    %27 = arith.truncf %26 : vector<16x512xf32> to vector<16x512xbf16>
    %cst_27 = arith.constant 0.000000e+00 : bf16
    %28 = vector.broadcast %cst_27 : bf16 to vector<1x512xbf16>
    %c0_28 = arith.constant 0 : index
    %c0_29 = arith.constant 0 : index
    %29 = vector.load %arg7[%c0_28, %c0_29] : memref<18x512xbf16, #tpu.memory_space<vmem>>, vector<1x512xbf16>
    tpu.vector_store %arg7[%c0_28, %c0_29], %28 {strides = array<i32>} : memref<18x512xbf16, #tpu.memory_space<vmem>>, vector<1x512xbf16>,
    %c17_30 = arith.constant 17 : index
    %c0_31 = arith.constant 0 : index
    %30 = vector.load %arg7[%c17_30, %c0_31] : memref<18x512xbf16, #tpu.memory_space<vmem>>, vector<1x512xbf16>
    tpu.vector_store %arg7[%c17_30, %c0_31], %28 {strides = array<i32>} : memref<18x512xbf16, #tpu.memory_space<vmem>>, vector<1x512xbf16>,
    %c1_32 = arith.constant 1 : index
    %c0_33 = arith.constant 0 : index
    %31 = vector.load %arg7[%c1_32, %c0_33] : memref<18x512xbf16, #tpu.memory_space<vmem>>, vector<16x512xbf16>
    tpu.vector_store %arg7[%c1_32, %c0_33], %27 {strides = array<i32>} : memref<18x512xbf16, #tpu.memory_space<vmem>>, vector<16x512xbf16>,
    %cst_34 = arith.constant 0.000000e+00 : f32
    %32 = vector.broadcast %cst_34 : f32 to vector<16x512xf32>
    %c0_35 = arith.constant 0 : index
    %c0_36 = arith.constant 0 : index
    %33 = vector.load %arg7[%c0_35, %c0_36] : memref<18x512xbf16, #tpu.memory_space<vmem>>, vector<16x512xbf16>
    %c0_37 = arith.constant 0 : index
    %c0_38 = arith.constant 0 : index
    %c0_39 = arith.constant 0 : index
    %34 = vector.load %arg4[%c0_37, %c0_38, %c0_39] : memref<3x512x512xbf16, #tpu.memory_space<vmem>>, vector<1x512x512xbf16>
    %35 = vector.shape_cast %34 : vector<1x512x512xbf16> to vector<512x512xbf16>
    %cst_40 = arith.constant dense<0.000000e+00> : vector<16x512xf32>
    %36 = tpu.matmul %33, %35, %cst_40 {dimension_numbers = #tpu.dot_dimension_numbers<[1], [0], [0], [1], [0, 0, 1, 1], [], []>} : vector<16x512xbf16>, vector<512x512xbf16>, vector<16x512xf32> -> vector<16x512xf32>
    %37 = arith.addf %32, %36 : vector<16x512xf32>
    %c1_41 = arith.constant 1 : index
    %c0_42 = arith.constant 0 : index
    %38 = vector.load %arg7[%c1_41, %c0_42] : memref<18x512xbf16, #tpu.memory_space<vmem>>, vector<16x512xbf16>
    %c1_43 = arith.constant 1 : index
    %c0_44 = arith.constant 0 : index
    %c0_45 = arith.constant 0 : index
    %39 = vector.load %arg4[%c1_43, %c0_44, %c0_45] : memref<3x512x512xbf16, #tpu.memory_space<vmem>>, vector<1x512x512xbf16>
    %40 = vector.shape_cast %39 : vector<1x512x512xbf16> to vector<512x512xbf16>
    %cst_46 = arith.constant dense<0.000000e+00> : vector<16x512xf32>
    %41 = tpu.matmul %38, %40, %cst_46 {dimension_numbers = #tpu.dot_dimension_numbers<[1], [0], [0], [1], [0, 0, 1, 1], [], []>} : vector<16x512xbf16>, vector<512x512xbf16>, vector<16x512xf32> -> vector<16x512xf32>
    %42 = arith.addf %37, %41 : vector<16x512xf32>
    %c2_47 = arith.constant 2 : index
    %c0_48 = arith.constant 0 : index
    %43 = vector.load %arg7[%c2_47, %c0_48] : memref<18x512xbf16, #tpu.memory_space<vmem>>, vector<16x512xbf16>
    %c2_49 = arith.constant 2 : index
    %c0_50 = arith.constant 0 : index
    %c0_51 = arith.constant 0 : index
    %44 = vector.load %arg4[%c2_49, %c0_50, %c0_51] : memref<3x512x512xbf16, #tpu.memory_space<vmem>>, vector<1x512x512xbf16>
    %45 = vector.shape_cast %44 : vector<1x512x512xbf16> to vector<512x512xbf16>
    %cst_52 = arith.constant dense<0.000000e+00> : vector<16x512xf32>
    %46 = tpu.matmul %43, %45, %cst_52 {dimension_numbers = #tpu.dot_dimension_numbers<[1], [0], [0], [1], [0, 0, 1, 1], [], []>} : vector<16x512xbf16>, vector<512x512xbf16>, vector<16x512xf32> -> vector<16x512xf32>
    %47 = arith.addf %42, %46 : vector<16x512xf32>
    %c0_53 = arith.constant 0 : index
    %c0_54 = arith.constant 0 : index
    %48 = vector.load %arg5[%c0_53, %c0_54] : memref<1x512xf32, #tpu.memory_space<vmem>>, vector<1x512xf32>
    %49 = vector.broadcast %48 : vector<1x512xf32> to vector<16x512xf32>
    %50 = arith.addf %47, %49 : vector<16x512xf32>
    %cst_55 = arith.constant 0.000000e+00 : f32
    %51 = vector.broadcast %cst_55 : f32 to vector<16x512xf32>
    %52 = arith.maximumf %50, %51 : vector<16x512xf32>
    %53 = vector.shape_cast %52 : vector<16x512xf32> to vector<8x2x512xf32>
    %54 = vector.extract_strided_slice %53 {offsets = [0, 0, 0], sizes = [8, 1, 512], strides = [1, 1, 1]} : vector<8x2x512xf32> to vector<8x1x512xf32>
    %55 = vector.shape_cast %54 : vector<8x1x512xf32> to vector<8x512xf32>
    %56 = vector.extract_strided_slice %53 {offsets = [0, 1, 0], sizes = [8, 1, 512], strides = [1, 1, 1]} : vector<8x2x512xf32> to vector<8x1x512xf32>
    %57 = vector.shape_cast %56 : vector<8x1x512xf32> to vector<8x512xf32>
    %58 = arith.maximumf %55, %57 : vector<8x512xf32>
    %59 = vector.shape_cast %58 : vector<8x512xf32> to vector<8x8x64xf32>
    %60 = vector.extract_strided_slice %59 {offsets = [0, 0, 0], sizes = [8, 8, 32], strides = [1, 1, 1]} : vector<8x8x64xf32> to vector<8x8x32xf32>
    %61 = vector.extract_strided_slice %59 {offsets = [0, 0, 32], sizes = [8, 8, 32], strides = [1, 1, 1]} : vector<8x8x64xf32> to vector<8x8x32xf32>
    %62 = arith.maximumf %60, %61 : vector<8x8x32xf32>
    %63 = vector.shape_cast %62 : vector<8x8x32xf32> to vector<8x256xf32>
    %c0_56 = arith.constant 0 : index
    %c0_57 = arith.constant 0 : index
    %c0_58 = arith.constant 0 : index
    %64 = vector.load %arg6[%c0_56, %c0_57, %c0_58] : memref<1x8x256xf32, #tpu.memory_space<vmem>>, vector<1x8x256xf32>
    %65 = vector.shape_cast %64 : vector<1x8x256xf32> to vector<8x256xf32>
    %66 = vector.shape_cast %63 : vector<8x256xf32> to vector<1x8x256xf32>
    tpu.vector_store %arg6[%c0_56, %c0_57, %c0_58], %66 {strides = array<i32>} : memref<1x8x256xf32, #tpu.memory_space<vmem>>, vector<1x8x256xf32>,
    return
  }
  func.func @transform_0(%arg0: i32) -> (i32, i32, i32) {
    %c0_i32 = arith.constant 0 : i32
    %c0_i32_0 = arith.constant 0 : i32
    %c0_i32_1 = arith.constant 0 : i32
    return %arg0, %c0_i32, %c0_i32_0 : i32, i32, i32
  }
  func.func @transform_1(%arg0: i32) -> (i32, i32, i32) {
    %c0_i32 = arith.constant 0 : i32
    %c0_i32_0 = arith.constant 0 : i32
    %c0_i32_1 = arith.constant 0 : i32
    %c0_i32_2 = arith.constant 0 : i32
    return %c0_i32, %c0_i32_0, %c0_i32_1 : i32, i32, i32
  }
  func.func @transform_2(%arg0: i32) -> (i32, i32) {
    %c0_i32 = arith.constant 0 : i32
    %c0_i32_0 = arith.constant 0 : i32
    %c0_i32_1 = arith.constant 0 : i32
    return %c0_i32, %c0_i32_0 : i32, i32
  }
  func.func @transform_3(%arg0: i32) -> (i32, i32, i32) {
    %c0_i32 = arith.constant 0 : i32
    %c0_i32_0 = arith.constant 0 : i32
    %c0_i32_1 = arith.constant 0 : i32
    %c0_i32_2 = arith.constant 0 : i32
    return %c0_i32, %c0_i32_0, %c0_i32_1 : i32, i32, i32
  }
  func.func @transform_4(%arg0: i32) -> (i32, i32) {
    %c0_i32 = arith.constant 0 : i32
    %c0_i32_0 = arith.constant 0 : i32
    %c0_i32_1 = arith.constant 0 : i32
    return %c0_i32, %c0_i32_0 : i32, i32
  }
  func.func @transform_5(%arg0: i32) -> (i32, i32, i32) {
    %c0_i32 = arith.constant 0 : i32
    %c0_i32_0 = arith.constant 0 : i32
    %c0_i32_1 = arith.constant 0 : i32
    return %arg0, %c0_i32, %c0_i32_0 : i32, i32, i32
  }
}

</mosaic_0001>

<bundles_post_ra>
// kernel: basic_block_forward.1
= control target key start
LH: loop header
LB: loop body
LE: loop exit
PB: predicated region body
PF: predicated region fallthrough
CT: control target
= control target key end

     0   :  { %10 = vsyncpa [#allocation4], 0  ;;  %s8653_s0 = inlined_call_operand.vmem [shape: bf16[2,16,64], index: 0, kind: input, shape index: {}]   ;;  %s8654_s1 = inlined_call_operand.hbm [shape: bf16[3,64,512], index: 1, kind: input, shape index: {}]   ;;  %s8655_s2 = inlined_call_operand.hbm [shape: f32[1,512], index: 2, kind: input, shape index: {}]   ;;  %s8656_s3 = inlined_call_operand.hbm [shape: bf16[3,512,512], index: 3, kind: input, shape index: {}]   ;;  %s8657_s4 = inlined_call_operand.hbm [shape: f32[1,512], index: 4, kind: input, shape index: {}]   ;;  %s8658_s5 = inlined_call_operand.vmem [shape: f32[2,8,256], index: 5, kind: output, shape index: {}]  }
   0x1   :  { %11 = vsyncpa [#allocation6], 0 }
   0x2   :  { %12 = vsyncpa [#allocation9], 0  ;;  %s7579_s18 = smov 0  }
   0x3 LB: > { %s185_s21 = sshll.u32 %s8655_s2, 4  ;;  %s7588_s22 = sadd.s32 4294967295, %s7537_s18   ;;  %s7537_s18 = sphi %s7579_s18, %s18_s18   ;;  %s186_s21 = int_to_ptr.hbm [resolvable:$true] %s185_s21 }
   0x4   : > { %p5145_p0 = scmp.ge.s32.totalorder %s7537_s18, 1  ;;  %p159_p1 = scmp.lt.s32.totalorder %s7537_s18, 3 }
   0x5   : > { %p7373_p2 = scmp.eq.s32.totalorder %s7588_s22, 0  ;;  %s7539_s24 = smov [#allocation5]  }
   0x6   : > { %p7593_p3 = pnand %p5145_p0, %p159_p1  ;;  %s187_s25 = sshll.u32 %s7539_s24, 4  ;;  %s188_s25 = int_to_ptr.vmem [resolvable:$true] %s187_s25 }
   0x7   : > { %s170_s28 = sshll.u32 %s8654_s1, 4  ;;  %s7540_s30 = smov [#allocation3]   ;;  %s171_s28 = int_to_ptr.hbm [resolvable:$true] %s170_s28 }
   0x8   : > { %p7360_p4 = pneg %p7593_p3  ;;  %s172_s6 = sshll.u32 %s7540_s30, 4  ;;  %s173_s6 = int_to_ptr.vmem [resolvable:$true] %s172_s6 }
   0x9   : > { %s196_s9 = sshll.u32 %s8656_s3, 4  ;;  %s7541_s10 = smov 256   ;;  %s197_s9 = int_to_ptr.hbm [resolvable:$true] %s196_s9 }
   0xa   : > { %p7604_p5 = pnand %p7373_p2, %p7360_p4  ;;  %s7542_s11 = smov 16  }
   0xb   : > { %s7543_s12 = smov [#allocation7]   ;;  %s211_s16 = sshll.u32 %s8657_s4, 4  ;;  %s212_s16 = int_to_ptr.hbm [resolvable:$true] %s211_s16 }
   0xc   : > { %7366 = dma.hbm_to_vmem [thread:$0]  (!%p7604_p5), %s186_s21, 64, %s188_s25, [#allocation6]  }
   0xd   : > { %7363 = dma.hbm_to_vmem [thread:$0]  (!%p7604_p5), %s171_s28, 6144, %s173_s6, [#allocation4], %s7541_s10, %s7541_s10, %s7542_s11  }
   0xe   : > { %s198_s13 = sshll.u32 %s7543_s12, 4  ;;  %s7544_s17 = smov [#allocation8]   ;;  %s199_s13 = int_to_ptr.vmem [resolvable:$true] %s198_s13 }
   0xf   : > { %7369 = dma.hbm_to_vmem [thread:$0]  (!%p7604_p5), %s197_s9, 49152, %s199_s13, [#allocation6], %s7541_s10, %s7541_s10, %s7542_s11  }
  0x10   : > { %s213_s19 = sshll.u32 %s7544_s17, 4  ;;  %234 = sbr.rel (%p7593_p3) target bundleno = 1221 (0x4c5), region = 40  ;;  %s214_s19 = int_to_ptr.vmem [resolvable:$true] %s213_s19 }
  0x11   : > { %7372 = dma.hbm_to_vmem [thread:$0]  (!%p7604_p5), %s212_s16, 64, %s214_s19, [#allocation9]  }
  0x15   : > { %7524 = dma.done.wait (%p7373_p2), [#allocation4], 6144  }
  0x16   : > { %7526 = vsyncadd (%p7373_p2), [#allocation4], 4294961152 }
  0x17   : > { %7528 = dma.done.wait (%p7373_p2), [#allocation6], 49216  }
  0x18   : > { %7530 = vsyncadd (%p7373_p2), [#allocation6], 4294918080 }
  0x19   : > { %7532 = dma.done.wait (%p7373_p2), [#allocation9], 64  }
  0x1a   : > { %7534 = vsyncadd (%p7373_p2), [#allocation9], 4294967232  ;;  %p278_p6 = scmp.lt.s32.totalorder %s7588_s22, 1  ;;  %vm291_vm0 = vcmask 516096   ;;  %vm292_vm1 = vsmask.f32 256 }
  0x1b   : > { %vm297_vm2 = vsmask.f32 7938  ;;  %v5210_v0 = vld [vmem:[#allocation3 + $0xe0] sm:$0xf]  ;;  %v6942_v1 = vld [vmem:[#allocation3 + $0xec] sm:$0xf0]  ;;  %vm7642_vm3 = vmand %vm291_vm0, %vm292_vm1 }
  0x1c   : > { %s8676_s22 = smov (!%p278_p6, %s7588_s22), 1  ;;  %v6940_v2 = vld [vmem:[#allocation3 + $0xe4] sm:$0xf]  ;;  %v5211_v3 = vor.u32 %v6942_v1, %v5210_v0  ;;  %v5212_v4 = vld [vmem:[#allocation3 + $0xf0] sm:$0xf0]  ;;  %vm7647_vm4 = vmand %vm291_vm0, %vm297_vm2  ;;  %vm324_vm6 = vcmask 519168  }
  0x1d   : > { %s6910_s20 = sshll.u32 %s8676_s22, 3  ;;  %v5218_v5 = vld [vmem:[#allocation3 + $0xe8] sm:$0xf]  ;;  %v6943_v6 = vld [vmem:[#allocation3 + $0xf4] sm:$0xf0]  ;;  %v5215_v9 = vor.u32 %v6940_v2, %v5212_v4  ;;  %vm7668_vm8 = vmand %vm324_vm6, %vm297_vm2  ;;  %vm471_vm10 = vcmask 523264  }
  0x1e   : > { %v5219_v10 = vor.u32 %v6943_v6, %v5218_v5  ;;  %v6941_v11 = vld [vmem:[#allocation3 + $0xec] sm:$0xf]  ;;  %v5220_v12 = vld [vmem:[#allocation3 + $0xf8] sm:$0xf0]  ;;  %v5194_v13 = vld [vmem:[#allocation3 + $0xc0] sm:$0xf]  ;;  %479 = vmatpush.bf16.msra.mxu0 %v5211_v3  ;;  %s282_s24 = scalar_lea.vmem %s8653_s0, %s6910_s20 }
  0x1f   : > { %v5223_v14 = vor.u32 %v6941_v11, %v5220_v12  ;;  %v6938_v15 = vld [vmem:[#allocation3 + $0xcc] sm:$0xf0]  ;;  %v6936_v16 = vld [vmem:[#allocation3 + $0xc4] sm:$0xf]  ;;  %v5196_v17 = vld [vmem:[#allocation3 + $0xd0] sm:$0xf0]  ;;  %493 = vmatpush.bf16.msra.mxu1 %v5215_v9 }
  0x20   : > { %507 = vmatpush.bf16.msra.mxu2 %v5219_v10  ;;  %v5195_v18 = vor.u32 %v6938_v15, %v5194_v13  ;;  %v5199_v19 = vor.u32 %v6936_v16, %v5196_v17  ;;  %v5202_v20 = vld [vmem:[#allocation3 + $0xc8] sm:$0xf]  ;;  %v6939_v21 = vld [vmem:[#allocation3 + $0xd4] sm:$0xf0]  ;;  %v6937_v22 = vld [vmem:[#allocation3 + $0xcc] sm:$0xf] }
  0x21   : > { %521 = vmatpush.bf16.msra.mxu3 %v5223_v14  ;;  %v5203_v23 = vor.u32 %v6939_v21, %v5202_v20  ;;  %v5204_v24 = vld [vmem:[#allocation3 + $0xd8] sm:$0xf0]  ;;  %v5178_v25 = vld [vmem:[#allocation3 + $0xa0] sm:$0xf]  ;;  %v6934_v26 = vld [vmem:[#allocation3 + $0xac] sm:$0xf0] }
  0x22   : > { %vm302_vm5 = vsmask.f32 4368  ;;  %v5207_v27 = vor.u32 %v6937_v22, %v5204_v24  ;;  %v6932_v28 = vld [vmem:[#allocation3 + $0xa4] sm:$0xf]  ;;  %v5180_v29 = vld [vmem:[#allocation3 + $0xb0] sm:$0xf0]  ;;  %480 = vmatpush.bf16.msra.mxu0 %v5195_v18  ;;  %v5179_v31 = vor.u32 %v6934_v26, %v5178_v25 }
  0x23   : > { %v5186_v30 = vld [vmem:[#allocation3 + $0xa8] sm:$0xf]  ;;  %v6935_v32 = vld [vmem:[#allocation3 + $0xb4] sm:$0xf0]  ;;  %v6933_v33 = vld [vmem:[#allocation3 + $0xac] sm:$0xf]  ;;  %494 = vmatpush.bf16.msra.mxu1 %v5199_v19  ;;  %v5183_v35 = vor.u32 %v6932_v28, %v5180_v29 }
  0x24   : > { %v5188_v34 = vld [vmem:[#allocation3 + $0xb8] sm:$0xf0]  ;;  %508 = vmatpush.bf16.msra.mxu2 %v5203_v23  ;;  %v5187_v36 = vor.u32 %v6935_v32, %v5186_v30  ;;  %v5162_v37 = vld [vmem:[#allocation3 + $0x80] sm:$0xf]  ;;  %v6930_v38 = vld [vmem:[#allocation3 + $0x8c] sm:$0xf0] }
  0x25   : > { %v6928_v39 = vld [vmem:[#allocation3 + $0x84] sm:$0xf]  ;;  %522 = vmatpush.bf16.msra.mxu3 %v5207_v27  ;;  %v5191_v40 = vor.u32 %v6933_v33, %v5188_v34  ;;  %v5164_v41 = vld [vmem:[#allocation3 + $0x90] sm:$0xf0]  ;;  %v5170_v42 = vld [vmem:[#allocation3 + $0x88] sm:$0xf]  ;;  %v5163_v47 = vor.u32 %v6930_v38, %v5162_v37 }
  0x26   : > { %v6931_v43 = vld [vmem:[#allocation3 + $0x94] sm:$0xf0]  ;;  %v6929_v44 = vld [vmem:[#allocation3 + $0x8c] sm:$0xf]  ;;  %v5172_v45 = vld [vmem:[#allocation3 + $0x98] sm:$0xf0]  ;;  %481 = vmatpush.bf16.msra.mxu0 %v5179_v31  ;;  %v5167_v48 = vor.u32 %v6928_v39, %v5164_v41 }
  0x27   : > { %v289_v46 = vld [vmem:[%s282_s24] sm:$0xf]  ;;  %v290_v49 = vld [vmem:[%s282_s24 + $0x4] sm:$0xf]  ;;  %v294_v50 = vld [vmem:[#allocation2] sm:$0x1]  ;;  %495 = vmatpush.bf16.msra.mxu1 %v5183_v35  ;;  %v5171_v52 = vor.u32 %v6931_v43, %v5170_v42  ;;  %v5175_v57 = vor.u32 %v6929_v44, %v5172_v45 }
  0x28   : > { %v299_v51 = vld [vmem:[#allocation2 + $0x20] sm:$0x1]  ;;  %509 = vmatpush.bf16.msra.mxu2 %v5187_v36  ;;  %v295_v53 = vsel %vm7642_vm3, 0, %v294_v50  ;;  %v305_v55 = vshrl.u32 %v289_v46, 16  ;;  %v5278_v56 = vld [vmem:[#allocation3 + $0x60] sm:$0xf]  ;;  %vm7662_vm7 = vmor %vm292_vm1, %vm302_vm5 }
  0x29   : > { %v300_v54 = vsel %vm7647_vm4, 0, %v299_v51  ;;  %523 = vmatpush.bf16.msra.mxu3 %v5191_v40  ;;  %296 = vst [vmem:[#allocation2] sm:$0x1] %v295_v53  ;;  %v308_v58 = vshll.u32 %v289_v46, 16  ;;  %v313_v59 = vshrl.u32 %v290_v49, 16  ;;  %v316_v60 = vshll.u32 %v290_v49, 16 }
  0x2a   : > { %301 = vst [vmem:[#allocation2 + $0x20] sm:$0x1] %v300_v54  ;;  %v307_v61 = vrot.slane %v305_v55, 7  ;;  %v6926_v62 = vld [vmem:[#allocation3 + $0x6c] sm:$0xf0]  ;;  %482 = vmatpush.bf16.msra.mxu0 %v5163_v47  ;;  %vm690_vm11 = vcmask 1046528  }
  0x2b   : > { %v315_v63 = vrot.slane %v313_v59, 7  ;;  %v5279_v0 = vor.u32 %v6926_v62, %v5278_v56  ;;  %v6924_v1 = vld [vmem:[#allocation3 + $0x64] sm:$0xf]  ;;  %v5280_v2 = vld [vmem:[#allocation3 + $0x70] sm:$0xf0]  ;;  %496 = vmatpush.bf16.msra.mxu1 %v5167_v48  ;;  %vm871_vm12 = vcmask 1040384  }
  0x2c   : > { %510 = vmatpush.bf16.msra.mxu2 %v5171_v52  ;;  %v311_v4 = vrot.slane %v307_v61, 4  ;;  %v5283_v5 = vor.u32 %v6924_v1, %v5280_v2  ;;  %v5286_v6 = vld [vmem:[#allocation3 + $0x68] sm:$0xf]  ;;  %v6927_v8 = vld [vmem:[#allocation3 + $0x74] sm:$0xf0]  ;;  %v310_v9 = vor.u32 %v308_v58, %v307_v61  ;;  %vm873_vm13 = vcmask 1044484   ;;  %vm872_vm15 = vmand %vm871_vm12, %vm292_vm1 }
  0x2d   : > { %524 = vmatpush.bf16.msra.mxu3 %v5175_v57  ;;  %v318_v10 = vor.u32 %v316_v60, %v315_v63  ;;  %v320_v11 = vrot.slane %v315_v63, 4  ;;  %v5287_v13 = vor.u32 %v6927_v8, %v5286_v6  ;;  %v6925_v14 = vld [vmem:[#allocation3 + $0x6c] sm:$0xf]  ;;  %v5288_v15 = vld [vmem:[#allocation3 + $0x78] sm:$0xf0]  ;;  %vm883_vm1 = vmand %vm871_vm12, %vm297_vm2  ;;  %vm935_vm12 = vcmask 1047556  }
  0x2e   : > { %617 = vmatpush.bf16.msrb.mxu0 %v5279_v0  ;;  %v5291_v16 = vor.u32 %v6925_v14, %v5288_v15  ;;  %v5262_v17 = vld [vmem:[#allocation3 + $0x40] sm:$0xf]  ;;  %v6922_v18 = vld [vmem:[#allocation3 + $0x4c] sm:$0xf0]  ;;  %v6920_v19 = vld [vmem:[#allocation3 + $0x44] sm:$0xf] }
  0x2f   : > { %631 = vmatpush.bf16.msrb.mxu1 %v5283_v5  ;;  %v319_v20 = vsel %vm7662_vm7, %v311_v4, %v318_v10  ;;  %v5263_v21 = vor.u32 %v6922_v18, %v5262_v17  ;;  %v5264_v22 = vld [vmem:[#allocation3 + $0x50] sm:$0xf0]  ;;  %v5270_v23 = vld [vmem:[#allocation3 + $0x48] sm:$0xf]  ;;  %v6923_v24 = vld [vmem:[#allocation3 + $0x54] sm:$0xf0] }
  0x30   : > { %645 = vmatpush.bf16.msrb.mxu2 %v5287_v13  ;;  %v326_v25 = vld [vmem:[#allocation2] sm:$0xf]  ;;  %330 = vst.msk [vmem:[#allocation2 + $0x10] sm:$0xf] %vm324_vm6, %v319_v20  ;;  %v5267_v26 = vor.u32 %v6920_v19, %v5264_v22  ;;  %v5271_v27 = vor.u32 %v6923_v24, %v5270_v23  ;;  %v6921_v28 = vld [vmem:[#allocation3 + $0x4c] sm:$0xf] }
  0x31   : > { %659 = vmatpush.bf16.msrb.mxu3 %v5291_v16  ;;  %v327_v29 = vsel %vm7668_vm8, %v310_v9, %v326_v25  ;;  %v331_v30 = vld [vmem:[#allocation2 + $0x20] sm:$0x1]  ;;  %v5272_v31 = vld [vmem:[#allocation3 + $0x58] sm:$0xf0]  ;;  %v5246_v32 = vld [vmem:[#allocation3 + $0x20] sm:$0xf] }
  0x32   : > { %618 = vmatpush.bf16.msrb.mxu0 %v5263_v21  ;;  %328 = vst [vmem:[#allocation2] sm:$0xf] %v327_v29  ;;  %v332_v33 = vsel %vm7642_vm3, %v320_v11, %v331_v30  ;;  %v5275_v34 = vor.u32 %v6921_v28, %v5272_v31  ;;  %v6918_v35 = vld [vmem:[#allocation3 + $0x2c] sm:$0xf0]  ;;  %v6916_v36 = vld [vmem:[#allocation3 + $0x24] sm:$0xf] }
  0x33   : > { %632 = vmatpush.bf16.msrb.mxu1 %v5267_v26  ;;  %333 = vst [vmem:[#allocation2 + $0x20] sm:$0x1] %v332_v33  ;;  %v5247_v37 = vor.u32 %v6918_v35, %v5246_v32  ;;  %v5248_v38 = vld [vmem:[#allocation3 + $0x30] sm:$0xf0]  ;;  %v5254_v39 = vld [vmem:[#allocation3 + $0x28] sm:$0xf] }
  0x34   : > { %646 = vmatpush.bf16.msrb.mxu2 %v5271_v27  ;;  %v5251_v40 = vor.u32 %v6916_v36, %v5248_v38  ;;  %v6919_v41 = vld [vmem:[#allocation3 + $0x34] sm:$0xf0]  ;;  %v6917_v42 = vld [vmem:[#allocation3 + $0x2c] sm:$0xf]  ;;  %v5256_v43 = vld [vmem:[#allocation3 + $0x38] sm:$0xf0] }
  0x35   : > { %660 = vmatpush.bf16.msrb.mxu3 %v5275_v34  ;;  %v5255_v44 = vor.u32 %v6919_v41, %v5254_v39  ;;  %v5259_v45 = vor.u32 %v6917_v42, %v5256_v43  ;;  %v5230_v46 = vld [vmem:[#allocation3] sm:$0xf]  ;;  %v6914_v7 = vld [vmem:[#allocation3 + $0xc] sm:$0xf0]  ;;  %v6912_v47 = vld [vmem:[#allocation3 + $0x4] sm:$0xf] }
  0x36   : > { %619 = vmatpush.bf16.msrb.mxu0 %v5247_v37  ;;  %v5231_v48 = vor.u32 %v6914_v7, %v5230_v46  ;;  %v5232_v49 = vld [vmem:[#allocation3 + $0x10] sm:$0xf0]  ;;  %v5238_v50 = vld [vmem:[#allocation3 + $0x8] sm:$0xf]  ;;  %v6915_v51 = vld [vmem:[#allocation3 + $0x14] sm:$0xf0] }
  0x37   : > { %633 = vmatpush.bf16.msrb.mxu1 %v5251_v40  ;;  %v7679_v52 = vld [vmem:[#allocation2 + $0x10] sm:$0xf]  ;;  %v5235_v53 = vor.u32 %v6912_v47, %v5232_v49  ;;  %v5239_v54 = vor.u32 %v6915_v51, %v5238_v50  ;;  %v6913_v55 = vld [vmem:[#allocation3 + $0xc] sm:$0xf]  ;;  %v5240_v56 = vld [vmem:[#allocation3 + $0x18] sm:$0xf0] }
  0x38   : > { %647 = vmatpush.bf16.msrb.mxu2 %v5255_v44  ;;  %v374_v57 = vunpack.c.l.b16 %v7679_v52  ;;  %v5243_v58 = vor.u32 %v6913_v55, %v5240_v56  ;;  %vm378_vm9 = vsmask.f32 7424  ;;  %v5346_v4 = vld [vmem:[#allocation3 + $0x160] sm:$0xf]  ;;  %v6958_v5 = vld [vmem:[#allocation3 + $0x16c] sm:$0xf0] }
  0x39   : > { %661 = vmatpush.bf16.msrb.mxu3 %v5259_v45  ;;  %v334_v59 = vld [vmem:[#allocation2] sm:$0xf]  ;;  %v6956_v8 = vld [vmem:[#allocation3 + $0x164] sm:$0xf]  ;;  %v5348_v9 = vld [vmem:[#allocation3 + $0x170] sm:$0xf0]  ;;  %v5347_v17 = vor.u32 %v6958_v5, %v5346_v4 }
  0x3a   : > { %620 = vmatpush.bf16.msrb.mxu0 %v5231_v48  ;;  %v352_v60 = vld [vmem:[#allocation2 + $0x20] sm:$0x1]  ;;  %v373_v61 = vunpack.c.l.b16 %v334_v59  ;;  %v5354_v11 = vld [vmem:[#allocation3 + $0x168] sm:$0xf]  ;;  %v6959_v12 = vld [vmem:[#allocation3 + $0x174] sm:$0xf0]  ;;  %v5351_v18 = vor.u32 %v6956_v8, %v5348_v9 }
  0x3b   : > { %634 = vmatpush.bf16.msrb.mxu1 %v5235_v53  ;;  %v375_v62 = vunpack.c.l.b16 %v352_v60  ;;  %v6957_v14 = vld [vmem:[#allocation3 + $0x16c] sm:$0xf]  ;;  %v5356_v15 = vld [vmem:[#allocation3 + $0x178] sm:$0xf0]  ;;  %v5330_v19 = vld [vmem:[#allocation3 + $0x140] sm:$0xf]  ;;  %v5355_v22 = vor.u32 %v6959_v12, %v5354_v11 }
  0x3c   : > { %648 = vmatpush.bf16.msrb.mxu2 %v5239_v54  ;;  %v7684_v63 = vpack.c.b16 %v374_v57, %v373_v61  ;;  %v6954_v20 = vld [vmem:[#allocation3 + $0x14c] sm:$0xf0]  ;;  %v5359_v23 = vor.u32 %v6957_v14, %v5356_v15  ;;  %v6952_v24 = vld [vmem:[#allocation3 + $0x144] sm:$0xf]  ;;  %v5332_v25 = vld [vmem:[#allocation3 + $0x150] sm:$0xf0] }
  0x3d   : > { %662 = vmatpush.bf16.msrb.mxu3 %v5243_v58  ;;  %v7686_v0 = vpack.c.b16 %v375_v62, %v375_v62  ;;  %v5338_v26 = vld [vmem:[#allocation3 + $0x148] sm:$0xf]  ;;  %v6955_v27 = vld [vmem:[#allocation3 + $0x154] sm:$0xf0]  ;;  %v6953_v28 = vld [vmem:[#allocation3 + $0x14c] sm:$0xf]  ;;  %v5331_v30 = vor.u32 %v6954_v20, %v5330_v19  ;;  %v5335_v31 = vor.u32 %v6952_v24, %v5332_v25 }
  0x3e   : > { %v380_v1 = vshrl.u32 %v7684_v63, 16  ;;  %v382_v2 = vshll.u32 %v7684_v63, 16  ;;  %v5340_v29 = vld [vmem:[#allocation3 + $0x158] sm:$0xf0]  ;;  %v5314_v32 = vld [vmem:[#allocation3 + $0x120] sm:$0xf]  ;;  %v5339_v34 = vor.u32 %v6955_v27, %v5338_v26 }
  0x3f   : > { %v387_v6 = vshll.u32 %v7686_v0, 16  ;;  %v6950_v33 = vld [vmem:[#allocation3 + $0x12c] sm:$0xf0]  ;;  %v5343_v35 = vor.u32 %v6953_v28, %v5340_v29  ;;  %v6948_v36 = vld [vmem:[#allocation3 + $0x124] sm:$0xf]  ;;  %vm933_vm8 = vcmask 1043456  }
  0x40   : > { %v384_v10 = vrot.slane %v382_v2, 1  ;;  %v5316_v37 = vld [vmem:[#allocation3 + $0x130] sm:$0xf0]  ;;  %v5322_v38 = vld [vmem:[#allocation3 + $0x128] sm:$0xf]  ;;  %v5315_v42 = vor.u32 %v6950_v33, %v5314_v32  ;;  %s7545_s25 = smov 64  }
  0x41   : > { %v389_v13 = vrot.slane %v387_v6, 1  ;;  %v6951_v39 = vld [vmem:[#allocation3 + $0x134] sm:$0xf0]  ;;  %v6949_v40 = vld [vmem:[#allocation3 + $0x12c] sm:$0xf]  ;;  %v5319_v43 = vor.u32 %v6948_v36, %v5316_v37  ;;  %s7547_s26 = smov 96  }
  0x42   : > { %v385_v16 = vor.u32 %v384_v10, %v380_v1  ;;  %v5324_v41 = vld [vmem:[#allocation3 + $0x138] sm:$0xf0]  ;;  %v5298_v44 = vld [vmem:[#allocation3 + $0x100] sm:$0xf]  ;;  %v6946_v45 = vld [vmem:[#allocation3 + $0x10c] sm:$0xf0]  ;;  %v5323_v46 = vor.u32 %v6951_v39, %v5322_v38 }
  0x43   : > { %v5327_v7 = vor.u32 %v6949_v40, %v5324_v41  ;;  %v6944_v47 = vld [vmem:[#allocation3 + $0x104] sm:$0xf]  ;;  %v5300_v48 = vld [vmem:[#allocation3 + $0x110] sm:$0xf0]  ;;  %v5306_v49 = vld [vmem:[#allocation3 + $0x108] sm:$0xf]  ;;  %v5299_v54 = vor.u32 %v6946_v45, %v5298_v44 }
  0x44   : > { %v390_v21 = vsel %vm378_vm9, %v385_v16, %v389_v13  ;;  %v6947_v50 = vld [vmem:[#allocation3 + $0x114] sm:$0xf0]  ;;  %v6945_v51 = vld [vmem:[#allocation3 + $0x10c] sm:$0xf]  ;;  %v5308_v53 = vld [vmem:[#allocation3 + $0x118] sm:$0xf0]  ;;  %v5303_v55 = vor.u32 %v6944_v47, %v5300_v48 }
  0x45   : > { %5224 = vmatmul.msk.bf16.vlgmr.msra.gmra.mxu0 %vm471_vm10, %v390_v21  ;;  %5225 = vmatmul.msk.bf16.vlgmr.msra.gmra.mxu1 %vm471_vm10, %v390_v21  ;;  %v5307_v56 = vor.u32 %v6947_v50, %v5306_v49  ;;  %v5311_v58 = vor.u32 %v6945_v51, %v5308_v53  ;;  %v669_v59 = vld [vmem:[#allocation2] sm:$0xe]  ;;  %v692_v1 = vrot.slane %v7686_v0, 1  ;;  %v5478_v4 = vld [vmem:[#allocation7 + $0x4e0] sm:$0xf]  ;;  %s7548_s27 = smov 32  }
  0x46   : > { %5226 = vmatmul.msk.bf16.vlgmr.msra.gmra.mxu2 %vm471_vm10, %v390_v21  ;;  %5227 = vmatmul.msk.bf16.vlgmr.msra.gmra.mxu3 %vm471_vm10, %v390_v21  ;;  %v688_v60 = vunpack.c.l.b16 %v669_v59  ;;  %v5606_v5 = vld [vmem:[#allocation7 + $0x5e0] sm:$0xf]  ;;  %v7150_v52 = vld [vmem:[#allocation7 + $0x5ec] sm:$0xf0]  ;;  %vm874_vm14 = vsmask.f32 4352 }
  0x47   : > { %781 = vmatpush.bf16.msra.mxu0 %v5347_v17  ;;  %795 = vmatpush.bf16.msra.mxu1 %v5351_v18  ;;  %v5462_v0 = vld [vmem:[#allocation7 + $0x4c0] sm:$0xf]  ;;  %v7114_v8 = vld [vmem:[#allocation7 + $0x4cc] sm:$0xf0]  ;;  %vm875_vm0 = vmand %vm873_vm13, %vm874_vm14  ;;  %vm884_vm4 = vsmask.f32 7954 }
  0x48   : > { %809 = vmatpush.bf16.msra.mxu2 %v5355_v22  ;;  %823 = vmatpush.bf16.msra.mxu3 %v5359_v23  ;;  %v689_v61 = vpack.c.b16 %v374_v57, %v688_v60  ;;  %v5607_v57 = vor.u32 %v7150_v52, %v5606_v5  ;;  %v5590_v9 = vld [vmem:[#allocation7 + $0x5c0] sm:$0xf]  ;;  %v5463_v10 = vor.u32 %v7114_v8, %v5462_v0  ;;  %v7146_v11 = vld [vmem:[#allocation7 + $0x5cc] sm:$0xf0]  ;;  %vm7723_vm3 = vmor %vm875_vm0, %vm872_vm15  ;;  %vm4102_vm15 = vcmask 1045504   ;;  %s6911_s28 = sshll.u32 %s8676_s22, 4 }
  0x49   : > { %v5591_v12 = vor.u32 %v7146_v11, %v5590_v9  ;;  %v5734_v13 = vld [vmem:[#allocation7 + $0x6e0] sm:$0xf]  ;;  %v7182_v14 = vld [vmem:[#allocation7 + $0x6ec] sm:$0xf0]  ;;  %vm885_vm5 = vmand %vm873_vm13, %vm884_vm4  ;;  %vm4104_vm0 = vcmask 1045506   ;;  %s287_s6 = scalar_lea.vmem %s8658_s5, %s6911_s28 }
  0x4a   : > { %v691_v62 = vrot.slane %v689_v61, 1  ;;  %v5862_v15 = vld [vmem:[#allocation7 + $0x7e0] sm:$0xf]  ;;  %v5735_v16 = vor.u32 %v7182_v14, %v5734_v13  ;;  %v7214_v17 = vld [vmem:[#allocation7 + $0x7ec] sm:$0xf0]  ;;  %vm886_vm6 = vmor %vm885_vm5, %vm883_vm1  ;;  %vm4251_vm1 = vcmask 1045509  }
  0x4b   : > { %782 = vmatpush.bf16.msra.mxu0 %v5331_v30  ;;  %796 = vmatpush.bf16.msra.mxu1 %v5335_v31  ;;  %v5863_v18 = vor.u32 %v7214_v17, %v5862_v15  ;;  %v5446_v19 = vld [vmem:[#allocation7 + $0x4a0] sm:$0xf]  ;;  %v7110_v20 = vld [vmem:[#allocation7 + $0x4ac] sm:$0xf0]  ;;  %v880_v13 = vld [vmem:[#allocation2 + $0x8] sm:$0x11] }
  0x4c   : > { %810 = vmatpush.bf16.msra.mxu2 %v5339_v34  ;;  %824 = vmatpush.bf16.msra.mxu3 %v5343_v35  ;;  %v693_v2 = vsel %vm690_vm11, %v691_v62, %v692_v1  ;;  %v5574_v21 = vld [vmem:[#allocation7 + $0x5a0] sm:$0xf]  ;;  %v5447_v22 = vor.u32 %v7110_v20, %v5446_v19  ;;  %v7142_v23 = vld [vmem:[#allocation7 + $0x5ac] sm:$0xf0]  ;;  %v890_v20 = vld [vmem:[#allocation2 + $0x28] sm:$0x11] }
  0x4d   : > { %v5575_v24 = vor.u32 %v7142_v23, %v5574_v21  ;;  %v5718_v25 = vld [vmem:[#allocation7 + $0x6c0] sm:$0xf]  ;;  %v7178_v26 = vld [vmem:[#allocation7 + $0x6cc] sm:$0xf0]  ;;  %vm7783_vm13 = vmand %vm933_vm8, %vm297_vm2  ;;  %vm4253_vm5 = vcmask 1047559  }
  0x4e   : > { %v5846_v27 = vld [vmem:[#allocation7 + $0x7c0] sm:$0xf]  ;;  %v5719_v28 = vor.u32 %v7178_v26, %v5718_v25  ;;  %v7210_v29 = vld [vmem:[#allocation7 + $0x7cc] sm:$0xf0]  ;;  %vm7789_vm14 = vmand %vm935_vm12, %vm884_vm4  ;;  %vm4249_vm4 = vcmask 1043459  }
  0x4f   : > { %783 = vmatpush.bf16.msra.mxu0 %v5315_v42  ;;  %797 = vmatpush.bf16.msra.mxu1 %v5319_v43  ;;  %v5847_v30 = vor.u32 %v7210_v29, %v5846_v27  ;;  %v5430_v31 = vld [vmem:[#allocation7 + $0x480] sm:$0xf]  ;;  %v7106_v32 = vld [vmem:[#allocation7 + $0x48c] sm:$0xf0]  ;;  %v891_v27 = vsel %vm886_vm6, 0, %v890_v20  ;;  %vm937_vm2 = vmor %vm7789_vm14, %vm7783_vm13 }
  0x50   : > { %811 = vmatpush.bf16.msra.mxu2 %v5323_v46  ;;  %825 = vmatpush.bf16.msra.mxu3 %v5327_v7  ;;  %v5558_v33 = vld [vmem:[#allocation7 + $0x580] sm:$0xf]  ;;  %v5431_v34 = vor.u32 %v7106_v32, %v5430_v31  ;;  %v7138_v35 = vld [vmem:[#allocation7 + $0x58c] sm:$0xf0]  ;;  %892 = vst [vmem:[#allocation2 + $0x28] sm:$0x11] %v891_v27 }
  0x51   : > { %v5559_v36 = vor.u32 %v7138_v35, %v5558_v33  ;;  %v5702_v37 = vld [vmem:[#allocation7 + $0x6a0] sm:$0xf]  ;;  %v7174_v38 = vld [vmem:[#allocation7 + $0x6ac] sm:$0xf0]  ;;  %v7140_v20 = vld [vmem:[#allocation7 + $0x5a4] sm:$0xf] }
  0x52   : > { %v5830_v39 = vld [vmem:[#allocation7 + $0x7a0] sm:$0xf]  ;;  %v5703_v40 = vor.u32 %v7174_v38, %v5702_v37  ;;  %v7206_v41 = vld [vmem:[#allocation7 + $0x7ac] sm:$0xf0]  ;;  %v7116_v37 = vld [vmem:[#allocation7 + $0x4e4] sm:$0xf] }
  0x53   : > { %784 = vmatpush.bf16.msra.mxu0 %v5299_v54  ;;  %798 = vmatpush.bf16.msra.mxu1 %v5303_v55  ;;  %v5831_v42 = vor.u32 %v7206_v41, %v5830_v39  ;;  %v5414_v43 = vld [vmem:[#allocation7 + $0x460] sm:$0xf]  ;;  %v7102_v44 = vld [vmem:[#allocation7 + $0x46c] sm:$0xf0]  ;;  %v5480_v38 = vld [vmem:[#allocation7 + $0x4f0] sm:$0xf0] }
  0x54   : > { %812 = vmatpush.bf16.msra.mxu2 %v5307_v56  ;;  %826 = vmatpush.bf16.msra.mxu3 %v5311_v58  ;;  %v5542_v45 = vld [vmem:[#allocation7 + $0x560] sm:$0xf]  ;;  %v5415_v46 = vor.u32 %v7102_v44, %v5414_v43  ;;  %v7134_v7 = vld [vmem:[#allocation7 + $0x56c] sm:$0xf0]  ;;  %v5483_v41 = vor.u32 %v7116_v37, %v5480_v38  ;;  %v5608_v43 = vld [vmem:[#allocation7 + $0x5f0] sm:$0xf0] }
  0x55   : > { %5292 = vmatmul.msk.bf16.vlgmr.msrb.gmra.mxu0 %vm471_vm10, %v7684_v63  ;;  %5293 = vmatmul.msk.bf16.vlgmr.msrb.gmra.mxu1 %vm471_vm10, %v7684_v63  ;;  %v5543_v47 = vor.u32 %v7134_v7, %v5542_v45  ;;  %v5686_v48 = vld [vmem:[#allocation7 + $0x680] sm:$0xf]  ;;  %v7170_v49 = vld [vmem:[#allocation7 + $0x68c] sm:$0xf0]  ;;  %v5720_v27 = vld [vmem:[#allocation7 + $0x6d0] sm:$0xf0] }
  0x56   : > { %5294 = vmatmul.msk.bf16.vlgmr.msrb.gmra.mxu2 %vm471_vm10, %v7684_v63  ;;  %5295 = vmatmul.msk.bf16.vlgmr.msrb.gmra.mxu3 %vm471_vm10, %v7684_v63  ;;  %v7118_v63 = vld [vmem:[#allocation7 + $0x4ec] sm:$0xf0]  ;;  %v5814_v50 = vld [vmem:[#allocation7 + $0x780] sm:$0xf]  ;;  %v5687_v54 = vor.u32 %v7170_v49, %v5686_v48  ;;  %v7172_v37 = vld [vmem:[#allocation7 + $0x6a4] sm:$0xf] }
  0x57   : > { %v5479_v6 = vor.u32 %v7118_v63, %v5478_v4  ;;  %1947 = vmatpush.bf16.msrb.mxu1 %v5607_v57  ;;  %v7202_v55 = vld [vmem:[#allocation7 + $0x78c] sm:$0xf0]  ;;  %v5398_v58 = vld [vmem:[#allocation7 + $0x440] sm:$0xf]  ;;  %v5486_v3 = vld [vmem:[#allocation7 + $0x4e8] sm:$0xf] }
  0x58   : > { %1961 = vmatpush.bf16.msrb.mxu2 %v5735_v16  ;;  %1975 = vmatpush.bf16.msrb.mxu3 %v5863_v18  ;;  %v5815_v56 = vor.u32 %v7202_v55, %v5814_v50  ;;  %v7098_v59 = vld [vmem:[#allocation7 + $0x44c] sm:$0xf0]  ;;  %v5526_v61 = vld [vmem:[#allocation7 + $0x540] sm:$0xf]  ;;  %v881_v18 = vsel %vm7723_vm3, 0, %v880_v13 }
  0x59   : > { %1933 = vmatpush.bf16.msrb.mxu0 %v5479_v6  ;;  %v5399_v60 = vor.u32 %v7098_v59, %v5398_v58  ;;  %v7130_v62 = vld [vmem:[#allocation7 + $0x54c] sm:$0xf0]  ;;  %v5798_v63 = vld [vmem:[#allocation7 + $0x760] sm:$0xf]  ;;  %882 = vst [vmem:[#allocation2 + $0x8] sm:$0x11] %v881_v18 }
  0x5a   : > { %v5527_v1 = vor.u32 %v7130_v62, %v5526_v61  ;;  %v7166_v4 = vld [vmem:[#allocation7 + $0x66c] sm:$0xf0]  ;;  %v5382_v57 = vld [vmem:[#allocation7 + $0x420] sm:$0xf]  ;;  %v7112_v55 = vld [vmem:[#allocation7 + $0x4c4] sm:$0xf] }
  0x5b   : > { %1948 = vmatpush.bf16.msrb.mxu1 %v5591_v12  ;;  %v7198_v6 = vld [vmem:[#allocation7 + $0x76c] sm:$0xf0]  ;;  %v5510_v14 = vld [vmem:[#allocation7 + $0x520] sm:$0xf]  ;;  %v7144_v58 = vld [vmem:[#allocation7 + $0x5c4] sm:$0xf] }
  0x5c   : > { %1962 = vmatpush.bf16.msrb.mxu2 %v5719_v28  ;;  %1976 = vmatpush.bf16.msrb.mxu3 %v5847_v30  ;;  %v5799_v52 = vor.u32 %v7198_v6, %v5798_v63  ;;  %v7094_v0 = vld [vmem:[#allocation7 + $0x42c] sm:$0xf0]  ;;  %v5782_v25 = vld [vmem:[#allocation7 + $0x740] sm:$0xf]  ;;  %v7180_v6 = vld [vmem:[#allocation7 + $0x6e4] sm:$0xf] }
  0x5d   : > { %1934 = vmatpush.bf16.msrb.mxu0 %v5463_v10  ;;  %v877_v8 = vld [vmem:[#allocation2] sm:$0x11]  ;;  %v5383_v9 = vor.u32 %v7094_v0, %v5382_v57  ;;  %v5366_v30 = vld [vmem:[#allocation7 + $0x400] sm:$0xf]  ;;  %v7212_v57 = vld [vmem:[#allocation7 + $0x7e4] sm:$0xf] }
  0x5e   : > { %v878_v17 = vsel %vm7723_vm3, 0, %v877_v8  ;;  %v887_v19 = vld [vmem:[#allocation2 + $0x20] sm:$0x11]  ;;  %v5494_v33 = vld [vmem:[#allocation7 + $0x500] sm:$0xf] }
  0x5f   : > { %1949 = vmatpush.bf16.msrb.mxu1 %v5575_v24  ;;  %879 = vst [vmem:[#allocation2] sm:$0x11] %v878_v17  ;;  %v7126_v21 = vld [vmem:[#allocation7 + $0x52c] sm:$0xf0]  ;;  %v888_v26 = vsel %vm886_vm6, 0, %v887_v19  ;;  %vm5037_vm6 = vcmask 261120  }
  0x60   : > { %1963 = vmatpush.bf16.msrb.mxu2 %v5703_v40  ;;  %1977 = vmatpush.bf16.msrb.mxu3 %v5831_v42  ;;  %v5511_v23 = vor.u32 %v7126_v21, %v5510_v14  ;;  %v7162_v24 = vld [vmem:[#allocation7 + $0x64c] sm:$0xf0]  ;;  %889 = vst [vmem:[#allocation2 + $0x20] sm:$0x11] %v888_v26  ;;  %v7148_v42 = vld [vmem:[#allocation7 + $0x5e4] sm:$0xf] }
  0x61   : > { %1935 = vmatpush.bf16.msrb.mxu0 %v5447_v22  ;;  %v5654_v22 = vld [vmem:[#allocation7 + $0x640] sm:$0xf]  ;;  %v7194_v29 = vld [vmem:[#allocation7 + $0x74c] sm:$0xf0]  ;;  %v5864_v8 = vld [vmem:[#allocation7 + $0x7f0] sm:$0xf0] }
  0x62   : > { %v5655_v28 = vor.u32 %v7162_v24, %v5654_v22  ;;  %v5783_v31 = vor.u32 %v7194_v29, %v5782_v25  ;;  %v7090_v32 = vld [vmem:[#allocation7 + $0x40c] sm:$0xf0]  ;;  %v5638_v7 = vld [vmem:[#allocation7 + $0x620] sm:$0xf]  ;;  %v5448_v13 = vld [vmem:[#allocation7 + $0x4b0] sm:$0xf0]  ;;  %v5867_v18 = vor.u32 %v7212_v57, %v5864_v8 }
  0x63   : > { %1950 = vmatpush.bf16.msrb.mxu1 %v5559_v36  ;;  %v7122_v35 = vld [vmem:[#allocation7 + $0x50c] sm:$0xf0]  ;;  %v5766_v48 = vld [vmem:[#allocation7 + $0x720] sm:$0xf]  ;;  %v5576_v21 = vld [vmem:[#allocation7 + $0x5b0] sm:$0xf0] }
  0x64   : > { %1964 = vmatpush.bf16.msrb.mxu2 %v5687_v54  ;;  %1978 = vmatpush.bf16.msrb.mxu3 %v5815_v56  ;;  %v5495_v36 = vor.u32 %v7122_v35, %v5494_v33  ;;  %v7190_v49 = vld [vmem:[#allocation7 + $0x72c] sm:$0xf0]  ;;  %v5464_v56 = vld [vmem:[#allocation7 + $0x4d0] sm:$0xf0]  ;;  %v5622_v61 = vld [vmem:[#allocation7 + $0x600] sm:$0xf]  ;;  %v5579_v25 = vor.u32 %v7140_v20, %v5576_v21 }
  0x65   : > { %5360 = vmatmul.msk.bf16.vlgmr.msra.gmra.mxu0 %vm471_vm10, %v693_v2  ;;  %5361 = vmatmul.msk.bf16.vlgmr.msra.gmra.mxu1 %vm471_vm10, %v693_v2  ;;  %v5767_v54 = vor.u32 %v7190_v49, %v5766_v48  ;;  %v5467_v59 = vor.u32 %v7112_v55, %v5464_v56  ;;  %v7154_v62 = vld [vmem:[#allocation7 + $0x60c] sm:$0xf0]  ;;  %v7755_v24 = vld [vmem:[#allocation5] sm:$0xf]  ;;  %v7176_v26 = vld [vmem:[#allocation7 + $0x6c4] sm:$0xf] }
  0x66   : > { %5362 = vmatmul.msk.bf16.vlgmr.msra.gmra.mxu2 %vm471_vm10, %v693_v2  ;;  %5363 = vmatmul.msk.bf16.vlgmr.msra.gmra.mxu3 %vm471_vm10, %v693_v2  ;;  %v5670_v2 = vld [vmem:[#allocation7 + $0x660] sm:$0xf]  ;;  %v7186_v63 = vld [vmem:[#allocation7 + $0x70c] sm:$0xf0]  ;;  %v5723_v29 = vor.u32 %v7176_v26, %v5720_v27  ;;  %v7136_v35 = vld [vmem:[#allocation7 + $0x584] sm:$0xf] }
  0x67   : > { %1936 = vmatpush.bf16.msrb.mxu0 %v5431_v34  ;;  %1951 = vmatpush.bf16.msrb.mxu1 %v5543_v47  ;;  %v5671_v5 = vor.u32 %v7166_v4, %v5670_v2  ;;  %v5367_v34 = vor.u32 %v7090_v32, %v5366_v30  ;;  %v7158_v47 = vld [vmem:[#allocation7 + $0x62c] sm:$0xf0]  ;;  %v5623_v2 = vor.u32 %v7154_v62, %v5622_v61  ;;  %v5750_v4 = vld [vmem:[#allocation7 + $0x700] sm:$0xf]  ;;  %v5848_v30 = vld [vmem:[#allocation7 + $0x7d0] sm:$0xf0] }
  0x68   : > { %1979 = vmatpush.bf16.msrb.mxu3 %v5799_v52  ;;  %v5639_v50 = vor.u32 %v7158_v47, %v5638_v7  ;;  %v5736_v52 = vld [vmem:[#allocation7 + $0x6f0] sm:$0xf0]  ;;  %v7132_v47 = vld [vmem:[#allocation7 + $0x564] sm:$0xf]  ;;  %v843_v48 = vperm.slane %v7755_v24, 0  ;;  %v844_v49 = vperm.slane %v7755_v24, 1 }
  0x69   : > { %1965 = vmatpush.bf16.msrb.mxu2 %v5671_v5  ;;  %v5751_v5 = vor.u32 %v7186_v63, %v5750_v4  ;;  %v5739_v0 = vor.u32 %v7180_v6, %v5736_v52  ;;  %v5432_v32 = vld [vmem:[#allocation7 + $0x490] sm:$0xf0]  ;;  %v7168_v56 = vld [vmem:[#allocation7 + $0x684] sm:$0xf] }
  0x6a   : > { %v5416_v7 = vld [vmem:[#allocation7 + $0x470] sm:$0xf0]  ;;  %v7200_v61 = vld [vmem:[#allocation7 + $0x784] sm:$0xf] }
  0x6b   : > { %1937 = vmatpush.bf16.msrb.mxu0 %v5415_v46  ;;  %1952 = vmatpush.bf16.msrb.mxu1 %v5527_v1  ;;  %v5611_v46 = vor.u32 %v7148_v42, %v5608_v43  ;;  %v7204_v42 = vld [vmem:[#allocation7 + $0x7a4] sm:$0xf]  ;;  %v5832_v43 = vld [vmem:[#allocation7 + $0x7b0] sm:$0xf0] }
  0x6c   : > { %1980 = vmatpush.bf16.msrb.mxu3 %v5783_v31  ;;  %v7104_v31 = vld [vmem:[#allocation7 + $0x484] sm:$0xf]  ;;  %v5544_v55 = vld [vmem:[#allocation7 + $0x570] sm:$0xf0] }
  0x6d   : > { %1966 = vmatpush.bf16.msrb.mxu2 %v5655_v28  ;;  %v7208_v28 = vld [vmem:[#allocation7 + $0x7c4] sm:$0xf]  ;;  %v5816_v62 = vld [vmem:[#allocation7 + $0x790] sm:$0xf0] }
  0x6e   : > { %v5851_v33 = vor.u32 %v7208_v28, %v5848_v30  ;;  %v5400_v6 = vld [vmem:[#allocation7 + $0x450] sm:$0xf0]  ;;  %v7128_v52 = vld [vmem:[#allocation7 + $0x544] sm:$0xf] }
  0x6f   : > { %1938 = vmatpush.bf16.msrb.mxu0 %v5399_v60  ;;  %1953 = vmatpush.bf16.msrb.mxu1 %v5511_v23  ;;  %v5592_v60 = vld [vmem:[#allocation7 + $0x5d0] sm:$0xf0]  ;;  %v7196_v21 = vld [vmem:[#allocation7 + $0x764] sm:$0xf] }
  0x70   : > { %1981 = vmatpush.bf16.msrb.mxu3 %v5767_v54  ;;  %v5595_v1 = vor.u32 %v7144_v58, %v5592_v60  ;;  %v5835_v54 = vor.u32 %v7204_v42, %v5832_v43  ;;  %v5688_v60 = vld [vmem:[#allocation7 + $0x690] sm:$0xf0]  ;;  %v7092_v26 = vld [vmem:[#allocation7 + $0x424] sm:$0xf] }
  0x71   : > { %1967 = vmatpush.bf16.msrb.mxu2 %v5639_v50  ;;  %v5691_v8 = vor.u32 %v7168_v56, %v5688_v60  ;;  %v7124_v30 = vld [vmem:[#allocation7 + $0x524] sm:$0xf]  ;;  %v5784_v43 = vld [vmem:[#allocation7 + $0x750] sm:$0xf0] }
  0x72   : > { %v7192_v42 = vld [vmem:[#allocation7 + $0x744] sm:$0xf]  ;;  %v5496_v60 = vld [vmem:[#allocation7 + $0x510] sm:$0xf0] }
  0x73   : > { %1939 = vmatpush.bf16.msrb.mxu0 %v5383_v9  ;;  %1954 = vmatpush.bf16.msrb.mxu1 %v5495_v36  ;;  %v7108_v9 = vld [vmem:[#allocation7 + $0x4a4] sm:$0xf]  ;;  %v5560_v36 = vld [vmem:[#allocation7 + $0x590] sm:$0xf0] }
  0x74   : > { %v5451_v19 = vor.u32 %v7108_v9, %v5448_v13  ;;  %1982 = vmatpush.bf16.msrb.mxu3 %v5751_v5  ;;  %v5563_v38 = vor.u32 %v7136_v35, %v5560_v36  ;;  %v7096_v5 = vld [vmem:[#allocation7 + $0x444] sm:$0xf]  ;;  %v5528_v9 = vld [vmem:[#allocation7 + $0x550] sm:$0xf0] }
  0x75   : > { %1968 = vmatpush.bf16.msrb.mxu2 %v5623_v2  ;;  %v5531_v20 = vor.u32 %v7128_v52, %v5528_v9  ;;  %v5656_v35 = vld [vmem:[#allocation7 + $0x650] sm:$0xf0]  ;;  %v7156_v52 = vld [vmem:[#allocation7 + $0x624] sm:$0xf] }
  0x76   : > { %v5640_v9 = vld [vmem:[#allocation7 + $0x630] sm:$0xf0] }
  0x77   : > { %1940 = vmatpush.bf16.msrb.mxu0 %v5367_v34  ;;  %2003 = vmatpush.bf16.msra.mxu1 %v5611_v46  ;;  %v5435_v34 = vor.u32 %v7104_v31, %v5432_v32  ;;  %v7100_v46 = vld [vmem:[#allocation7 + $0x464] sm:$0xf]  ;;  %v5512_v31 = vld [vmem:[#allocation7 + $0x530] sm:$0xf0] }
  0x78   : > { %2031 = vmatpush.bf16.msra.mxu3 %v5867_v18  ;;  %v5419_v58 = vor.u32 %v7100_v46, %v5416_v7  ;;  %v7088_v7 = vld [vmem:[#allocation7 + $0x404] sm:$0xf] }
  0x79   : > { %2017 = vmatpush.bf16.msra.mxu2 %v5739_v0 }
  0x7b   : > { %1989 = vmatpush.bf16.msra.mxu0 %v5483_v41  ;;  %2004 = vmatpush.bf16.msra.mxu1 %v5595_v1  ;;  %v5704_v41 = vld [vmem:[#allocation7 + $0x6b0] sm:$0xf0] }
  0x7c   : > { %2032 = vmatpush.bf16.msra.mxu3 %v5851_v33  ;;  %v5707_v50 = vor.u32 %v7172_v37, %v5704_v41  ;;  %v846_v33 = vperm.slane %v7755_v24, 3 }
  0x7d   : > { %2018 = vmatpush.bf16.msra.mxu2 %v5723_v29  ;;  %v5384_v29 = vld [vmem:[#allocation7 + $0x430] sm:$0xf0] }
  0x7f   : > { %1990 = vmatpush.bf16.msra.mxu0 %v5467_v59  ;;  %2005 = vmatpush.bf16.msra.mxu1 %v5579_v25  ;;  %v5547_v59 = vor.u32 %v7132_v47, %v5544_v55  ;;  %v5800_v25 = vld [vmem:[#allocation7 + $0x770] sm:$0xf0] }
  0x80   : > { %2033 = vmatpush.bf16.msra.mxu3 %v5835_v54  ;;  %v5803_v41 = vor.u32 %v7196_v21, %v5800_v25  ;;  %v5368_v47 = vld [vmem:[#allocation7 + $0x410] sm:$0xf0] }
  0x81   : > { %2019 = vmatpush.bf16.msra.mxu2 %v5707_v50 }
  0x83   : > { %1991 = vmatpush.bf16.msra.mxu0 %v5451_v19  ;;  %2006 = vmatpush.bf16.msra.mxu1 %v5563_v38  ;;  %v845_v19 = vperm.slane %v7755_v24, 2 }
  0x85   : > { %2020 = vmatpush.bf16.msra.mxu2 %v5691_v8 }
  0x87   : > { %1992 = vmatpush.bf16.msra.mxu0 %v5435_v34  ;;  %2007 = vmatpush.bf16.msra.mxu1 %v5547_v59  ;;  %v7160_v34 = vld [vmem:[#allocation7 + $0x644] sm:$0xf] }
  0x88   : > { %v7120_v59 = vld [vmem:[#allocation7 + $0x504] sm:$0xf] }
  0x89   : > { %v5499_v8 = vor.u32 %v7120_v59, %v5496_v60 }
  0x8b   : > { %1993 = vmatpush.bf16.msra.mxu0 %v5419_v58  ;;  %2008 = vmatpush.bf16.msra.mxu1 %v5531_v20  ;;  %v938_v20 = vld [vmem:[#allocation2] sm:$0xff] }
  0xc2   : > { %v7712_v51 = vpop.f32.mrf.mxu0  ;;  %v7714_v53 = vpop.f32.mrf.mxu1 }
  0xc9   : > { %v7719_v10 = vpop.f32.mrf.mxu2  ;;  %v7721_v11 = vpop.f32.mrf.mxu3 }
  0xca   : > { %v7727_v15 = vpop.f32.mrf.mxu0  ;;  %v7729_v16 = vpop.f32.mrf.mxu1 }
  0xd1   : > { %v7739_v39 = vpop.f32.mrf.mxu2  ;;  %v7741_v40 = vpop.f32.mrf.mxu3 }
  0xd2   : > { %v7743_v44 = vpop.f32.mrf.mxu0  ;;  %v7745_v45 = vpop.f32.mrf.mxu1 }
  0xd3   : > { %v623_v1 = vadd.f32 %v7743_v44, %v7712_v51  ;;  %v637_v2 = vadd.f32 %v7745_v45, %v7714_v53  ;;  %v5819_v51 = vor.u32 %v7200_v61, %v5816_v62  ;;  %v7164_v44 = vld [vmem:[#allocation7 + $0x664] sm:$0xf]  ;;  %v5672_v53 = vld [vmem:[#allocation7 + $0x670] sm:$0xf0]  ;;  %v5403_v45 = vor.u32 %v7096_v5, %v5400_v6 }
  0xd4   : > { %v5675_v38 = vor.u32 %v7164_v44, %v5672_v53  ;;  %v5371_v6 = vor.u32 %v7088_v7, %v5368_v47 }
  0xd5   : > { %2034 = vmatpush.bf16.msra.mxu3 %v5819_v51  ;;  %1994 = vmatpush.bf16.msra.mxu0 %v5403_v45 }
  0xd6   : > { %2021 = vmatpush.bf16.msra.mxu2 %v5675_v38 }
  0xd9   : > { %v7747_v14 = vpop.f32.mrf.mxu2  ;;  %v7749_v17 = vpop.f32.mrf.mxu3  ;;  %2035 = vmatpush.bf16.msra.mxu3 %v5803_v41 }
  0xda   : > { %v7751_v22 = vpop.f32.mrf.mxu0  ;;  %v7753_v23 = vpop.f32.mrf.mxu1  ;;  %v651_v32 = vadd.f32 %v7747_v14, %v7719_v10  ;;  %v665_v46 = vadd.f32 %v7749_v17, %v7721_v11  ;;  %v5387_v10 = vor.u32 %v7092_v26, %v5384_v29  ;;  %v5515_v14 = vor.u32 %v7124_v30, %v5512_v31  ;;  %v7152_v31 = vld [vmem:[#allocation7 + $0x604] sm:$0xf] }
  0xdb   : > { %v625_v50 = vadd.f32 %v7751_v22, %v7727_v15  ;;  %v639_v54 = vadd.f32 %v7753_v23, %v7729_v16  ;;  %v5787_v15 = vor.u32 %v7192_v42, %v5784_v43  ;;  %v5643_v26 = vor.u32 %v7156_v52, %v5640_v9 }
  0xdc   : > { %1995 = vmatpush.bf16.msra.mxu0 %v5387_v10  ;;  %2009 = vmatpush.bf16.msra.mxu1 %v5515_v14 }
  0xdd   : > { %2036 = vmatpush.bf16.msra.mxu3 %v5787_v15 }
  0xe0   : > { %1996 = vmatpush.bf16.msra.mxu0 %v5371_v6  ;;  %2010 = vmatpush.bf16.msra.mxu1 %v5499_v8  ;;  %v949_v6 = vld [vmem:[#allocation2 + $0x28] sm:$0x11] }
  0xe1   : > { %v7763_v4 = vpop.f32.mrf.mxu2  ;;  %v7765_v63 = vpop.f32.mrf.mxu3 }
  0xe2   : > { %v786_v57 = vpop.f32.mrf.mxu0  ;;  %v800_v0 = vpop.f32.mrf.mxu1 }
  0xe3   : > { %v833_v13 = vadd.f32 %v786_v57, %v623_v1  ;;  %v834_v18 = vadd.f32 %v800_v0, %v637_v2  ;;  %v5659_v2 = vor.u32 %v7160_v34, %v5656_v35  ;;  %v5624_v34 = vld [vmem:[#allocation7 + $0x610] sm:$0xf0]  ;;  %v7184_v35 = vld [vmem:[#allocation7 + $0x704] sm:$0xf] }
  0xe5   : > { %v851_v27 = vadd.f32 %v843_v48, %v833_v13  ;;  %v852_v28 = vadd.f32 %v844_v49, %v834_v18  ;;  %v7188_v13 = vld [vmem:[#allocation7 + $0x724] sm:$0xf]  ;;  %v5768_v18 = vld [vmem:[#allocation7 + $0x730] sm:$0xf0]  ;;  %2022 = vmatpush.bf16.msra.mxu2 %v5659_v2 }
  0xe6   : > { %v5771_v30 = vor.u32 %v7188_v13, %v5768_v18 }
  0xe7   : > { %v859_v36 = vmax.f32 %v851_v27, 0.0  ;;  %v860_v37 = vmax.f32 %v852_v28, 0.0 }
  0xe8   : > { %2037 = vmatpush.bf16.msra.mxu3 %v5771_v30 }
  0xe9   : > { %v867_v55 = vpack.c.bf16 %v860_v37, %v859_v36  ;;  %v814_v56 = vpop.f32.mrf.mxu2  ;;  %v828_v58 = vpop.f32.mrf.mxu3  ;;  %v5752_v36 = vld [vmem:[#allocation7 + $0x710] sm:$0xf0]  ;;  %2023 = vmatpush.bf16.msra.mxu2 %v5643_v26 }
  0xea   : > { %v835_v17 = vadd.f32 %v814_v56, %v651_v32  ;;  %v836_v61 = vadd.f32 %v828_v58, %v665_v46  ;;  %v788_v62 = vpop.f32.mrf.mxu0  ;;  %v802_v1 = vpop.f32.mrf.mxu1  ;;  %v5755_v46 = vor.u32 %v7184_v35, %v5752_v36  ;;  %v946_v58 = vld [vmem:[#allocation2 + $0x20] sm:$0x11] }
  0xeb   : > { %v894_v22 = vshrl.u32 %v867_v55, 16  ;;  %v837_v23 = vadd.f32 %v788_v62, %v625_v50  ;;  %v838_v5 = vadd.f32 %v802_v1, %v639_v54  ;;  %v897_v44 = vshll.u32 %v867_v55, 16  ;;  %v941_v50 = vld [vmem:[#allocation2 + $0x8] sm:$0xff] }
  0xec   : > { %v853_v57 = vadd.f32 %v845_v19, %v835_v17  ;;  %v854_v0 = vadd.f32 %v846_v33, %v836_v61  ;;  %2038 = vmatpush.bf16.msra.mxu3 %v5755_v46 }
  0xed   : > { %v896_v51 = vrot.slane %v894_v22, 7  ;;  %v855_v53 = vadd.f32 %v843_v48, %v837_v23  ;;  %v856_v45 = vadd.f32 %v844_v49, %v838_v5  ;;  %v653_v48 = vadd.f32 %v7763_v4, %v7739_v39 }
  0xee   : > { %v861_v21 = vmax.f32 %v853_v57, 0.0  ;;  %v862_v25 = vmax.f32 %v854_v0, 0.0  ;;  %v667_v49 = vadd.f32 %v7765_v63, %v7741_v40  ;;  %v5627_v63 = vor.u32 %v7152_v31, %v5624_v34  ;;  %v7151_v34 = vld [vmem:[#allocation7 + $0x5f4] sm:$0xf0] }
  0xef   : > { %v899_v27 = vor.u32 %v897_v44, %v896_v51  ;;  %v863_v28 = vmax.f32 %v855_v53, 0.0  ;;  %v864_v29 = vmax.f32 %v856_v45, 0.0  ;;  %v907_v17 = vrot.slane %v896_v51, 4 }
  0xf0   : > { %v868_v32 = vpack.c.bf16 %v862_v25, %v861_v21  ;;  %2024 = vmatpush.bf16.msra.mxu2 %v5627_v63 }
  0xf1   : > { %v939_v37 = vsel %vm937_vm2, %v899_v27, %v938_v20  ;;  %v869_v38 = vpack.c.bf16 %v864_v29, %v863_v28  ;;  %v816_v41 = vpop.f32.mrf.mxu2  ;;  %v830_v42 = vpop.f32.mrf.mxu3  ;;  %v7119_v28 = vld [vmem:[#allocation7 + $0x4f4] sm:$0xf0] }
  0xf2   : > { %940 = vst [vmem:[#allocation2] sm:$0xff] %v939_v37  ;;  %v901_v39 = vshrl.u32 %v868_v32, 16  ;;  %v839_v4 = vadd.f32 %v816_v41, %v653_v48  ;;  %v840_v43 = vadd.f32 %v830_v42, %v667_v49  ;;  %v904_v14 = vshll.u32 %v868_v32, 16  ;;  %v5614_v32 = vld [vmem:[#allocation7 + $0x5e8] sm:$0xf] }
  0xf3   : > { %v909_v40 = vshrl.u32 %v869_v38, 16  ;;  %v912_v55 = vshll.u32 %v869_v38, 16  ;;  %v1221_v11 = vunpack.c.l.b16 %v939_v37  ;;  %v1222_v16 = vunpack.c.h.b16 %v939_v37 }
  0xf4   : > { %v903_v10 = vrot.slane %v901_v39, 7  ;;  %v857_v7 = vadd.f32 %v845_v19, %v839_v4  ;;  %v858_v47 = vadd.f32 %v846_v33, %v840_v43  ;;  %v5487_v41 = vor.u32 %v7119_v28, %v5486_v3  ;;  %v7179_v3 = vld [vmem:[#allocation7 + $0x6d4] sm:$0xf0] }
  0xf5   : > { %v911_v54 = vrot.slane %v909_v40, 7  ;;  %v5615_v42 = vor.u32 %v7151_v34, %v5614_v32  ;;  %v7211_v32 = vld [vmem:[#allocation7 + $0x7d4] sm:$0xf0]  ;;  %v5438_v34 = vld [vmem:[#allocation7 + $0x488] sm:$0xf] }
  0xf6   : > { %v906_v56 = vor.u32 %v904_v14, %v903_v10  ;;  %v865_v59 = vmax.f32 %v857_v7, 0.0  ;;  %v866_v60 = vmax.f32 %v858_v47, 0.0  ;;  %v916_v0 = vrot.slane %v903_v10, 4  ;;  %v5470_v10 = vld [vmem:[#allocation7 + $0x4c8] sm:$0xf] }
  0xf7   : > { %v914_v61 = vor.u32 %v912_v55, %v911_v54  ;;  %v925_v62 = vrot.slane %v911_v54, 4  ;;  %v7115_v7 = vld [vmem:[#allocation7 + $0x4d4] sm:$0xf0]  ;;  %v5598_v47 = vld [vmem:[#allocation7 + $0x5c8] sm:$0xf] }
  0xf8   : > { %v942_v19 = vsel %vm937_vm2, %v906_v56, %v941_v50  ;;  %v870_v24 = vpack.c.bf16 %v866_v60, %v865_v59  ;;  %v7147_v50 = vld [vmem:[#allocation7 + $0x5d4] sm:$0xf0]  ;;  %v5742_v59 = vld [vmem:[#allocation7 + $0x6e8] sm:$0xf] }
  0xf9   : > { %943 = vst [vmem:[#allocation2 + $0x8] sm:$0xff] %v942_v19  ;;  %v7825_v33 = vsel %vm7662_vm7, %v907_v17, %v914_v61  ;;  %v947_v1 = vsel %vm7723_vm3, %v925_v62, %v946_v58  ;;  %v1223_v21 = vunpack.c.l.b16 %v942_v19  ;;  %v1224_v25 = vunpack.c.h.b16 %v942_v19  ;;  %v7183_v60 = vld [vmem:[#allocation7 + $0x6f4] sm:$0xf0] }
  0xfa   : > { %944 = vst [vmem:[#allocation2 + $0x10] sm:$0xff] %v7825_v33  ;;  %v918_v2 = vshrl.u32 %v870_v24, 16  ;;  %v1225_v15 = vunpack.c.l.b16 %v7825_v33  ;;  %v1226_v22 = vunpack.c.h.b16 %v7825_v33  ;;  %v921_v5 = vshll.u32 %v870_v24, 16  ;;  %v5870_v24 = vld [vmem:[#allocation7 + $0x7e8] sm:$0xf] }
  0xfb   : > { %948 = vst [vmem:[#allocation2 + $0x20] sm:$0x11] %v947_v1  ;;  %v7215_v1 = vld [vmem:[#allocation7 + $0x7f4] sm:$0xf0] }
  0xfc   : > { %v920_v23 = vrot.slane %v918_v2, 7  ;;  %v7834_v52 = vpack.c.b16 %v1225_v15, %v1221_v11  ;;  %v7838_v57 = vpack.c.b16 %v1226_v22, %v1222_v16  ;;  %v5471_v2 = vor.u32 %v7115_v7, %v5470_v10  ;;  %v5454_v16 = vld [vmem:[#allocation7 + $0x4a8] sm:$0xf]  ;;  %v7207_v10 = vld [vmem:[#allocation7 + $0x7b4] sm:$0xf0] }
  0xfd   : > { %v5599_v11 = vor.u32 %v7147_v50, %v5598_v47  ;;  %v5422_v7 = vld [vmem:[#allocation7 + $0x468] sm:$0xf]  ;;  %v7103_v47 = vld [vmem:[#allocation7 + $0x474] sm:$0xf0] }
  0xfe   : > { %v923_v8 = vor.u32 %v921_v5, %v920_v23  ;;  %v926_v9 = vrot.slane %v920_v23, 4  ;;  %v1244_v51 = vshll.u32 %v7834_v52, 16  ;;  %v1256_v44 = vshll.u32 %v7838_v57, 16  ;;  %v7111_v23 = vld [vmem:[#allocation7 + $0x4b4] sm:$0xf0] }
  0xff   : > { %v1242_v35 = vshrl.u32 %v7834_v52, 16  ;;  %v1254_v37 = vshrl.u32 %v7838_v57, 16  ;;  %v5582_v5 = vld [vmem:[#allocation7 + $0x5a8] sm:$0xf]  ;;  %v5455_v28 = vor.u32 %v7111_v23, %v5454_v16  ;;  %v7131_v33 = vld [vmem:[#allocation7 + $0x554] sm:$0xf0] }
 0x100   : > { %v7842_v13 = vsel %vm7662_vm7, %v916_v0, %v923_v8  ;;  %v950_v18 = vsel %vm7723_vm3, %v926_v9, %v949_v6  ;;  %v1246_v31 = vrot.slane %v1244_v51, 1  ;;  %v1258_v49 = vrot.slane %v1256_v44, 1  ;;  %v5822_v23 = vld [vmem:[#allocation7 + $0x788] sm:$0xf] }
 0x101   : > { %v1227_v53 = vunpack.c.l.b16 %v7842_v13  ;;  %v1228_v45 = vunpack.c.h.b16 %v7842_v13  ;;  %951 = vst [vmem:[#allocation2 + $0x28] sm:$0x11] %v950_v18  ;;  %v7143_v18 = vld [vmem:[#allocation7 + $0x5b4] sm:$0xf0]  ;;  %v5743_v51 = vor.u32 %v7183_v60, %v5742_v59  ;;  %v5871_v44 = vor.u32 %v7215_v1, %v5870_v24  ;;  %v5550_v59 = vld [vmem:[#allocation7 + $0x568] sm:$0xf] }
 0x102   : > { %v1084_v20 = vld [vmem:[#allocation2 + $0x20] sm:$0x11]  ;;  %v1247_v43 = vor.u32 %v1246_v31, %v1242_v35  ;;  %v1259_v63 = vor.u32 %v1258_v49, %v1254_v37  ;;  %v5583_v31 = vor.u32 %v7143_v18, %v5582_v5  ;;  %v5854_v49 = vld [vmem:[#allocation7 + $0x7c8] sm:$0xf]  ;;  %v7107_v37 = vld [vmem:[#allocation7 + $0x494] sm:$0xf0] }
 0x103   : > { %v1229_v26 = vunpack.c.l.b16 %v1084_v20  ;;  %v1230_v27 = vunpack.c.h.b16 %v1084_v20  ;;  %v7852_v12 = vpack.c.b16 %v1227_v53, %v1223_v21  ;;  %v7856_v29 = vpack.c.b16 %v1228_v45, %v1224_v25  ;;  %v7135_v60 = vld [vmem:[#allocation7 + $0x574] sm:$0xf0]  ;;  %v5694_v24 = vld [vmem:[#allocation7 + $0x688] sm:$0xf] }
 0x104   : > { %v7171_v1 = vld [vmem:[#allocation7 + $0x694] sm:$0xf0]  ;;  %v5551_v18 = vor.u32 %v7135_v60, %v5550_v59  ;;  %v7117_v59 = vld [vmem:[#allocation7 + $0x4ec] sm:$0xf]  ;;  %v5488_v60 = vld [vmem:[#allocation7 + $0x4f8] sm:$0xf0] }
 0x105   : > { %v7858_v30 = vpack.c.b16 %v1229_v26, %v1229_v26  ;;  %v7860_v48 = vpack.c.b16 %v1230_v27, %v1230_v27  ;;  %v1268_v39 = vshll.u32 %v7852_v12, 16  ;;  %v1280_v4 = vshll.u32 %v7856_v29, 16  ;;  %v5726_v27 = vld [vmem:[#allocation7 + $0x6c8] sm:$0xf]  ;;  %v7203_v5 = vld [vmem:[#allocation7 + $0x794] sm:$0xf0] }
 0x106   : > { %v1266_v6 = vshrl.u32 %v7852_v12, 16  ;;  %v1278_v8 = vshrl.u32 %v7856_v29, 16  ;;  %vm4094_vm7 = vcmask 1041408   ;;  %vm4247_vm3 = vcmask 1041409  }
 0x107   : > { %v1249_v36 = vshll.u32 %v7858_v30, 16  ;;  %v1261_v38 = vshll.u32 %v7860_v48, 16  ;;  %v1270_v61 = vrot.slane %v1268_v39, 1  ;;  %v1282_v19 = vrot.slane %v1280_v4, 1  ;;  %v5710_v4 = vld [vmem:[#allocation7 + $0x6a8] sm:$0xf] }
 0x108   : > { %v1085_v14 = vld [vmem:[#allocation2 + $0x28] sm:$0x11]  ;;  %v5855_v39 = vor.u32 %v7211_v32, %v5854_v49 }
 0x109   : > { %v1251_v40 = vrot.slane %v1249_v36, 1  ;;  %v1263_v46 = vrot.slane %v1261_v38, 1  ;;  %v1231_v54 = vunpack.c.l.b16 %v1085_v14  ;;  %v1232_v55 = vunpack.c.h.b16 %v1085_v14  ;;  %v5566_v38 = vld [vmem:[#allocation7 + $0x588] sm:$0xf]  ;;  %v3025_v14 = vld [vmem:[#allocation2] sm:$0xee] }
 0x10a   : > { %v1271_v20 = vor.u32 %v1270_v61, %v1266_v6  ;;  %v1283_v25 = vor.u32 %v1282_v19, %v1278_v8  ;;  %v3158_v50 = vunpack.c.l.b16 %v3025_v14  ;;  %v3026_v61 = vld [vmem:[#allocation2 + $0x8] sm:$0xee]  ;;  %v3167_v6 = vrot.slane %v7858_v30, 1 }
 0x10b   : > { %v7869_v56 = vsel %vm378_vm9, %v1247_v43, %v1251_v40  ;;  %v7872_v58 = vsel %vm378_vm9, %v1259_v63, %v1263_v46  ;;  %v7876_v17 = vpack.c.b16 %v1231_v54, %v1231_v54  ;;  %v7878_v62 = vpack.c.b16 %v1232_v55, %v1232_v55  ;;  %v7175_v43 = vld [vmem:[#allocation7 + $0x6b4] sm:$0xf0]  ;;  %v5838_v46 = vld [vmem:[#allocation7 + $0x7a8] sm:$0xf] }
 0x10c   : > { %1941 = vmatmul.bf16.vlgmr.msrb.gmra.mxu0 %v7869_v56  ;;  %1955 = vmatmul.bf16.vlgmr.msrb.gmra.mxu1 %v7872_v58  ;;  %v5439_v40 = vor.u32 %v7107_v37, %v5438_v34  ;;  %v3159_v54 = vunpack.c.h.b16 %v3025_v14  ;;  %v5711_v55 = vor.u32 %v7175_v43, %v5710_v4  ;;  %v5839_v19 = vor.u32 %v7207_v10, %v5838_v46  ;;  %v5390_v34 = vld [vmem:[#allocation7 + $0x428] sm:$0xf]  ;;  %v7095_v37 = vld [vmem:[#allocation7 + $0x434] sm:$0xf0] }
 0x10d   : > { %2045 = vmatpush.bf16.msrb.mxu0 %v5487_v41  ;;  %2059 = vmatpush.bf16.msrb.mxu1 %v5615_v42  ;;  %v1273_v0 = vshll.u32 %v7876_v17, 16  ;;  %v1285_v9 = vshll.u32 %v7878_v62, 16  ;;  %v7139_v41 = vld [vmem:[#allocation7 + $0x594] sm:$0xf0]  ;;  %v5727_v42 = vor.u32 %v7179_v3, %v5726_v27  ;;  %v3160_v16 = vunpack.c.l.b16 %v3026_v61  ;;  %v5678_v27 = vld [vmem:[#allocation7 + $0x668] sm:$0xf] }
 0x10e   : > { %v5567_v63 = vor.u32 %v7139_v41, %v5566_v38  ;;  %v3161_v8 = vunpack.c.h.b16 %v3026_v61  ;;  %v5695_v30 = vor.u32 %v7171_v1, %v5694_v24  ;;  %v7167_v3 = vld [vmem:[#allocation7 + $0x674] sm:$0xf0]  ;;  %v5518_v38 = vld [vmem:[#allocation7 + $0x528] sm:$0xf]  ;;  %v5391_v14 = vor.u32 %v7095_v37, %v5390_v34  ;;  %v7149_v24 = vld [vmem:[#allocation7 + $0x5ec] sm:$0xf] }
 0x10f   : > { %v1275_v21 = vrot.slane %v1273_v0, 1  ;;  %v1287_v26 = vrot.slane %v1285_v9, 1  ;;  %v3170_v0 = vrot.slane %v7860_v48, 1  ;;  %v5423_v9 = vor.u32 %v7103_v47, %v5422_v7  ;;  %v7127_v41 = vld [vmem:[#allocation7 + $0x534] sm:$0xf0] }
 0x110   : > { %v5823_v48 = vor.u32 %v7203_v5, %v5822_v23  ;;  %v5679_v4 = vor.u32 %v7167_v3, %v5678_v27  ;;  %v5790_v46 = vld [vmem:[#allocation7 + $0x748] sm:$0xf]  ;;  %v5519_v7 = vor.u32 %v7127_v41, %v5518_v38  ;;  %v5616_v1 = vld [vmem:[#allocation7 + $0x5f8] sm:$0xf0]  ;;  %v7191_v23 = vld [vmem:[#allocation7 + $0x734] sm:$0xf0] }
 0x111   : > { %2046 = vmatpush.bf16.msrb.mxu0 %v5471_v2  ;;  %2060 = vmatpush.bf16.msrb.mxu1 %v5599_v11  ;;  %v7885_v35 = vsel %vm378_vm9, %v1271_v20, %v1275_v21  ;;  %v7888_v36 = vsel %vm378_vm9, %v1283_v25, %v1287_v26  ;;  %v3162_v2 = vpack.c.b16 %v1225_v15, %v3158_v50  ;;  %v5534_v20 = vld [vmem:[#allocation7 + $0x548] sm:$0xf]  ;;  %v3173_v25 = vrot.slane %v7876_v17, 1  ;;  %v7091_v50 = vld [vmem:[#allocation7 + $0x414] sm:$0xf0] }
 0x112   : > { %1969 = vmatmul.bf16.vlgmr.msrb.gmra.mxu2 %v7885_v35  ;;  %1983 = vmatmul.bf16.vlgmr.msrb.gmra.mxu3 %v7888_v36  ;;  %v3163_v11 = vpack.c.b16 %v1226_v22, %v3159_v54  ;;  %v3164_v15 = vpack.c.b16 %v1227_v53, %v3160_v16  ;;  %v3165_v26 = vpack.c.b16 %v1228_v45, %v3161_v8  ;;  %v7199_v53 = vld [vmem:[#allocation7 + $0x774] sm:$0xf0]  ;;  %v3176_v45 = vrot.slane %v7878_v62, 1  ;;  %v5374_v47 = vld [vmem:[#allocation7 + $0x408] sm:$0xf] }
 0x113   : > { %2073 = vmatpush.bf16.msrb.mxu2 %v5743_v51  ;;  %2087 = vmatpush.bf16.msrb.mxu3 %v5871_v44  ;;  %v5406_v51 = vld [vmem:[#allocation7 + $0x448] sm:$0xf]  ;;  %v7099_v44 = vld [vmem:[#allocation7 + $0x454] sm:$0xf0]  ;;  %v3166_v22 = vrot.slane %v3162_v2, 1  ;;  %v5535_v32 = vor.u32 %v7131_v33, %v5534_v20  ;;  %v5375_v5 = vor.u32 %v7091_v50, %v5374_v47  ;;  %v5619_v8 = vor.u32 %v7149_v24, %v5616_v1 }
 0x114   : > { %v3169_v21 = vrot.slane %v3163_v11, 1  ;;  %v3172_v13 = vrot.slane %v3164_v15, 1  ;;  %v5407_v49 = vor.u32 %v7099_v44, %v5406_v51  ;;  %v7195_v62 = vld [vmem:[#allocation7 + $0x754] sm:$0xf0]  ;;  %v5502_v54 = vld [vmem:[#allocation7 + $0x508] sm:$0xf] }
 0x115   : > { %2047 = vmatpush.bf16.msrb.mxu0 %v5455_v28  ;;  %2061 = vmatpush.bf16.msrb.mxu1 %v5583_v31  ;;  %v5806_v28 = vld [vmem:[#allocation7 + $0x768] sm:$0xf]  ;;  %v7906_v31 = vsel %vm690_vm11, %v3166_v22, %v3167_v6  ;;  %v7159_v11 = vld [vmem:[#allocation7 + $0x634] sm:$0xf0]  ;;  %v7145_v51 = vld [vmem:[#allocation7 + $0x5cc] sm:$0xf] }
 0x116   : > { %v7909_v17 = vsel %vm690_vm11, %v3169_v21, %v3170_v0  ;;  %v5807_v43 = vor.u32 %v7199_v53, %v5806_v28  ;;  %v5646_v2 = vld [vmem:[#allocation7 + $0x628] sm:$0xf]  ;;  %v5491_v0 = vor.u32 %v7117_v59, %v5488_v60  ;;  %v5600_v15 = vld [vmem:[#allocation7 + $0x5d8] sm:$0xf0]  ;;  %v7155_v22 = vld [vmem:[#allocation7 + $0x614] sm:$0xf0] }
 0x117   : > { %2074 = vmatpush.bf16.msrb.mxu2 %v5727_v42  ;;  %2088 = vmatpush.bf16.msrb.mxu3 %v5855_v39  ;;  %v7913_v42 = vsel %vm690_vm11, %v3172_v13, %v3173_v25  ;;  %v3175_v39 = vrot.slane %v3165_v26, 1  ;;  %v5774_v16 = vld [vmem:[#allocation7 + $0x728] sm:$0xf]  ;;  %v5647_v44 = vor.u32 %v7159_v11, %v5646_v2  ;;  %v7187_v25 = vld [vmem:[#allocation7 + $0x714] sm:$0xf0]  ;;  %v5603_v28 = vor.u32 %v7145_v51, %v5600_v15 }
 0x118   : > { %v5775_v20 = vor.u32 %v7191_v23, %v5774_v16  ;;  %v5630_v33 = vld [vmem:[#allocation7 + $0x608] sm:$0xf]  ;;  %v7181_v26 = vld [vmem:[#allocation7 + $0x6ec] sm:$0xf]  ;;  %v5872_v27 = vld [vmem:[#allocation7 + $0x7f8] sm:$0xf0] }
 0x119   : > { %2048 = vmatpush.bf16.msrb.mxu0 %v5439_v40  ;;  %2062 = vmatpush.bf16.msrb.mxu1 %v5567_v63  ;;  %v5662_v40 = vld [vmem:[#allocation7 + $0x648] sm:$0xf]  ;;  %v7163_v63 = vld [vmem:[#allocation7 + $0x654] sm:$0xf0]  ;;  %v7916_v10 = vsel %vm690_vm11, %v3175_v39, %v3176_v45  ;;  %v7109_v53 = vld [vmem:[#allocation7 + $0x4ac] sm:$0xf]  ;;  %v5631_v13 = vor.u32 %v7155_v22, %v5630_v33 }
 0x11a   : > { %v5663_v61 = vor.u32 %v7163_v63, %v5662_v40  ;;  %v5758_v21 = vld [vmem:[#allocation7 + $0x708] sm:$0xf]  ;;  %v5584_v34 = vld [vmem:[#allocation7 + $0x5b8] sm:$0xf0]  ;;  %v7177_v41 = vld [vmem:[#allocation7 + $0x6cc] sm:$0xf] }
 0x11b   : > { %2075 = vmatpush.bf16.msrb.mxu2 %v5711_v55  ;;  %2089 = vmatpush.bf16.msrb.mxu3 %v5839_v19  ;;  %v7123_v55 = vld [vmem:[#allocation7 + $0x514] sm:$0xf0]  ;;  %v5791_v19 = vor.u32 %v7195_v62, %v5790_v46  ;;  %v5759_v45 = vor.u32 %v7187_v25, %v5758_v21  ;;  %v5728_v39 = vld [vmem:[#allocation7 + $0x6d8] sm:$0xf0]  ;;  %v7105_v46 = vld [vmem:[#allocation7 + $0x48c] sm:$0xf] }
 0x11c   : > { %1997 = vmatmul.bf16.vlgmr.msra.gmra.mxu0 %v7869_v56  ;;  %2011 = vmatmul.bf16.vlgmr.msra.gmra.mxu1 %v7872_v58  ;;  %v5503_v6 = vor.u32 %v7123_v55, %v5502_v54  ;;  %v5440_v62 = vld [vmem:[#allocation7 + $0x498] sm:$0xf0]  ;;  %v5731_v47 = vor.u32 %v7177_v41, %v5728_v39  ;;  %v7173_v54 = vld [vmem:[#allocation7 + $0x6ac] sm:$0xf]  ;;  %vm4096_vm9 = vcmask 1045508   ;;  %vm4100_vm11 = vcmask 1043458  }
 0x11d   : > { %2049 = vmatpush.bf16.msrb.mxu0 %v5423_v9  ;;  %2063 = vmatpush.bf16.msrb.mxu1 %v5551_v18  ;;  %v7113_v9 = vld [vmem:[#allocation7 + $0x4cc] sm:$0xf]  ;;  %v5472_v18 = vld [vmem:[#allocation7 + $0x4d8] sm:$0xf0] }
 0x11e   : > { %v5475_v3 = vor.u32 %v7113_v9, %v5472_v18  ;;  %v5712_v55 = vld [vmem:[#allocation7 + $0x6b8] sm:$0xf0]  ;;  %v7205_v59 = vld [vmem:[#allocation7 + $0x7ac] sm:$0xf] }
 0x11f   : > { %2076 = vmatpush.bf16.msrb.mxu2 %v5695_v30  ;;  %2090 = vmatpush.bf16.msrb.mxu3 %v5823_v48  ;;  %v5744_v30 = vld [vmem:[#allocation7 + $0x6f8] sm:$0xf0]  ;;  %v7213_v48 = vld [vmem:[#allocation7 + $0x7ec] sm:$0xf]  ;;  %v5715_v16 = vor.u32 %v7173_v54, %v5712_v55 }
 0x120   : > { %v5747_v37 = vor.u32 %v7181_v26, %v5744_v30  ;;  %v5875_v38 = vor.u32 %v7213_v48, %v5872_v27  ;;  %v5840_v60 = vld [vmem:[#allocation7 + $0x7b8] sm:$0xf0]  ;;  %v7101_v24 = vld [vmem:[#allocation7 + $0x46c] sm:$0xf] }
 0x121   : > { %2050 = vmatpush.bf16.msrb.mxu0 %v5407_v49  ;;  %2064 = vmatpush.bf16.msrb.mxu1 %v5535_v32  ;;  %v5456_v49 = vld [vmem:[#allocation7 + $0x4b8] sm:$0xf0]  ;;  %v7141_v32 = vld [vmem:[#allocation7 + $0x5ac] sm:$0xf]  ;;  %v5843_v23 = vor.u32 %v7205_v59, %v5840_v60 }
 0x122   : > { %2025 = vmatmul.bf16.vlgmr.msra.gmra.mxu2 %v7885_v35  ;;  %2039 = vmatmul.bf16.vlgmr.msra.gmra.mxu3 %v7888_v36  ;;  %v5459_v40 = vor.u32 %v7109_v53, %v5456_v49  ;;  %v5587_v63 = vor.u32 %v7141_v32, %v5584_v34  ;;  %v5424_v1 = vld [vmem:[#allocation7 + $0x478] sm:$0xf0]  ;;  %v7133_v2 = vld [vmem:[#allocation7 + $0x56c] sm:$0xf] }
 0x123   : > { %2077 = vmatpush.bf16.msrb.mxu2 %v5679_v4  ;;  %2091 = vmatpush.bf16.msrb.mxu3 %v5807_v43  ;;  %v7209_v4 = vld [vmem:[#allocation7 + $0x7cc] sm:$0xf]  ;;  %v5856_v43 = vld [vmem:[#allocation7 + $0x7d8] sm:$0xf0]  ;;  %v5427_v9 = vor.u32 %v7101_v24, %v5424_v1 }
 0x124   : > { %v5859_v50 = vor.u32 %v7209_v4, %v5856_v43  ;;  %v5552_v11 = vld [vmem:[#allocation7 + $0x578] sm:$0xf0]  ;;  %v7097_v51 = vld [vmem:[#allocation7 + $0x44c] sm:$0xf] }
 0x125   : > { %2051 = vmatpush.bf16.msrb.mxu0 %v5391_v14  ;;  %2065 = vmatpush.bf16.msrb.mxu1 %v5519_v7  ;;  %v7137_v14 = vld [vmem:[#allocation7 + $0x58c] sm:$0xf]  ;;  %v5568_v7 = vld [vmem:[#allocation7 + $0x598] sm:$0xf0]  ;;  %v5555_v18 = vor.u32 %v7133_v2, %v5552_v11  ;;  %v5974_v2 = vld [vmem:[#allocation7 + $0xc0] sm:$0xf] }
 0x126   : > { %v5536_v15 = vld [vmem:[#allocation7 + $0x558] sm:$0xf0]  ;;  %v7165_v21 = vld [vmem:[#allocation7 + $0x66c] sm:$0xf]  ;;  %v6986_v11 = vld [vmem:[#allocation7 + $0xcc] sm:$0xf0] }
 0x127   : > { %2078 = vmatpush.bf16.msrb.mxu2 %v5663_v61  ;;  %2092 = vmatpush.bf16.msrb.mxu3 %v5791_v19  ;;  %v5443_v61 = vor.u32 %v7105_v46, %v5440_v62  ;;  %v5571_v19 = vor.u32 %v7137_v14, %v5568_v7  ;;  %v5680_v25 = vld [vmem:[#allocation7 + $0x678] sm:$0xf0]  ;;  %v7197_v26 = vld [vmem:[#allocation7 + $0x76c] sm:$0xf]  ;;  %v5990_v46 = vld [vmem:[#allocation7 + $0xe0] sm:$0xf] }
 0x128   : > { %v5808_v30 = vld [vmem:[#allocation7 + $0x778] sm:$0xf0]  ;;  %v7125_v53 = vld [vmem:[#allocation7 + $0x52c] sm:$0xf]  ;;  %v6990_v62 = vld [vmem:[#allocation7 + $0xec] sm:$0xf0] }
 0x129   : > { %2052 = vmatpush.bf16.msrb.mxu0 %v5375_v5  ;;  %2066 = vmatpush.bf16.msrb.mxu1 %v5503_v6  ;;  %v7169_v5 = vld [vmem:[#allocation7 + $0x68c] sm:$0xf]  ;;  %v5696_v6 = vld [vmem:[#allocation7 + $0x698] sm:$0xf0]  ;;  %v5811_v49 = vor.u32 %v7197_v26, %v5808_v30  ;;  %v5991_v24 = vor.u32 %v6990_v62, %v5990_v46  ;;  %v5958_v26 = vld [vmem:[#allocation7 + $0xa0] sm:$0xf] }
 0x12a   : > { %v5699_v33 = vor.u32 %v7169_v5, %v5696_v6  ;;  %v7161_v32 = vld [vmem:[#allocation7 + $0x64c] sm:$0xf]  ;;  %v5664_v34 = vld [vmem:[#allocation7 + $0x658] sm:$0xf0]  ;;  %v7018_v6 = vld [vmem:[#allocation7 + $0x1cc] sm:$0xf0] }
 0x12b   : > { %2079 = vmatpush.bf16.msrb.mxu2 %v5647_v44  ;;  %2093 = vmatpush.bf16.msrb.mxu3 %v5775_v20  ;;  %v5408_v44 = vld [vmem:[#allocation7 + $0x458] sm:$0xf0]  ;;  %v7129_v20 = vld [vmem:[#allocation7 + $0x54c] sm:$0xf]  ;;  %v5667_v14 = vor.u32 %v7161_v32, %v5664_v34  ;;  %v6982_v30 = vld [vmem:[#allocation7 + $0xac] sm:$0xf0] }
 0x12c   : > { %2053 = vmatmul.bf16.vlgmr.msrb.gmra.mxu0 %v7869_v56  ;;  %2067 = vmatmul.bf16.vlgmr.msrb.gmra.mxu1 %v7872_v58  ;;  %v5411_v48 = vor.u32 %v7097_v51, %v5408_v44  ;;  %v5539_v27 = vor.u32 %v7129_v20, %v5536_v15  ;;  %v7089_v4 = vld [vmem:[#allocation7 + $0x40c] sm:$0xf]  ;;  %v5376_v43 = vld [vmem:[#allocation7 + $0x418] sm:$0xf0]  ;;  %v6246_v51 = vld [vmem:[#allocation7 + $0x2e0] sm:$0xf]  ;;  %v5959_v32 = vor.u32 %v6982_v30, %v5958_v26 }
 0x12d   : > { %2101 = vmatpush.bf16.msra.mxu0 %v5491_v0  ;;  %2115 = vmatpush.bf16.msra.mxu1 %v5619_v8  ;;  %v7201_v0 = vld [vmem:[#allocation7 + $0x78c] sm:$0xf]  ;;  %v5824_v8 = vld [vmem:[#allocation7 + $0x798] sm:$0xf0]  ;;  %v7054_v44 = vld [vmem:[#allocation7 + $0x2ec] sm:$0xf0] }
 0x12e   : > { %v5827_v22 = vor.u32 %v7201_v0, %v5824_v8  ;;  %v7157_v54 = vld [vmem:[#allocation7 + $0x62c] sm:$0xf]  ;;  %v5648_v55 = vld [vmem:[#allocation7 + $0x638] sm:$0xf0]  ;;  %v6374_v20 = vld [vmem:[#allocation7 + $0x3e0] sm:$0xf] }
 0x12f   : > { %2080 = vmatpush.bf16.msrb.mxu2 %v5631_v13  ;;  %2094 = vmatpush.bf16.msrb.mxu3 %v5759_v45  ;;  %v5520_v13 = vld [vmem:[#allocation7 + $0x538] sm:$0xf0]  ;;  %v5683_v45 = vor.u32 %v7165_v21, %v5680_v25  ;;  %v7189_v59 = vld [vmem:[#allocation7 + $0x72c] sm:$0xf]  ;;  %v7086_v15 = vld [vmem:[#allocation7 + $0x3ec] sm:$0xf0] }
 0x130   : > { %v5523_v39 = vor.u32 %v7125_v53, %v5520_v13  ;;  %v5776_v60 = vld [vmem:[#allocation7 + $0x738] sm:$0xf0]  ;;  %v7153_v0 = vld [vmem:[#allocation7 + $0x60c] sm:$0xf]  ;;  %v6230_v53 = vld [vmem:[#allocation7 + $0x2c0] sm:$0xf] }
 0x131   : > { %2102 = vmatpush.bf16.msra.mxu0 %v5475_v3  ;;  %2116 = vmatpush.bf16.msra.mxu1 %v5603_v28  ;;  %v7093_v3 = vld [vmem:[#allocation7 + $0x42c] sm:$0xf]  ;;  %v5392_v28 = vld [vmem:[#allocation7 + $0x438] sm:$0xf0]  ;;  %v5779_v5 = vor.u32 %v7189_v59, %v5776_v60  ;;  %v7050_v13 = vld [vmem:[#allocation7 + $0x2cc] sm:$0xf0] }
 0x132   : > { %2081 = vmatmul.bf16.vlgmr.msrb.gmra.mxu2 %v7885_v35  ;;  %2095 = vmatmul.bf16.vlgmr.msrb.gmra.mxu3 %v7888_v36  ;;  %v5395_v41 = vor.u32 %v7093_v3, %v5392_v28  ;;  %v5632_v8 = vld [vmem:[#allocation7 + $0x618] sm:$0xf0]  ;;  %v6086_v3 = vld [vmem:[#allocation7 + $0x1a0] sm:$0xf]  ;;  %v7014_v28 = vld [vmem:[#allocation7 + $0x1ac] sm:$0xf0] }
 0x133   : > { %2129 = vmatpush.bf16.msra.mxu2 %v5747_v37  ;;  %2143 = vmatpush.bf16.msra.mxu3 %v5875_v38  ;;  %v7193_v37 = vld [vmem:[#allocation7 + $0x74c] sm:$0xf]  ;;  %v5792_v38 = vld [vmem:[#allocation7 + $0x758] sm:$0xf0]  ;;  %v5635_v21 = vor.u32 %v7153_v0, %v5632_v8  ;;  %v6087_v34 = vor.u32 %v7014_v28, %v6086_v3  ;;  %v6198_v59 = vld [vmem:[#allocation7 + $0x280] sm:$0xf] }
 0x134   : > { %v5795_v7 = vor.u32 %v7193_v37, %v5792_v38  ;;  %v5942_v37 = vld [vmem:[#allocation7 + $0x80] sm:$0xf]  ;;  %v6978_v38 = vld [vmem:[#allocation7 + $0x8c] sm:$0xf0] }
 0x135   : > { %2103 = vmatpush.bf16.msra.mxu0 %v5459_v40  ;;  %2117 = vmatpush.bf16.msra.mxu1 %v5587_v63  ;;  %v7121_v40 = vld [vmem:[#allocation7 + $0x50c] sm:$0xf]  ;;  %v5504_v63 = vld [vmem:[#allocation7 + $0x518] sm:$0xf0]  ;;  %v5943_v46 = vor.u32 %v6978_v38, %v5942_v37  ;;  %v7042_v60 = vld [vmem:[#allocation7 + $0x28c] sm:$0xf0] }
 0x136   : > { %v6310_v0 = vld [vmem:[#allocation7 + $0x360] sm:$0xf]  ;;  %v7070_v8 = vld [vmem:[#allocation7 + $0x36c] sm:$0xf0]  ;;  %v7020_v37 = vld [vmem:[#allocation7 + $0x1e4] sm:$0xf] }
 0x137   : > { %2130 = vmatpush.bf16.msra.mxu2 %v5731_v47  ;;  %2144 = vmatpush.bf16.msra.mxu3 %v5859_v50  ;;  %v6118_v47 = vld [vmem:[#allocation7 + $0x1e0] sm:$0xf]  ;;  %v7022_v50 = vld [vmem:[#allocation7 + $0x1ec] sm:$0xf0]  ;;  %v6120_v38 = vld [vmem:[#allocation7 + $0x1f0] sm:$0xf0] }
 0x138   : > { %v6119_v1 = vor.u32 %v7022_v50, %v6118_v47  ;;  %v6294_v26 = vld [vmem:[#allocation7 + $0x340] sm:$0xf]  ;;  %v7066_v30 = vld [vmem:[#allocation7 + $0x34c] sm:$0xf0] }
 0x139   : > { %2104 = vmatpush.bf16.msra.mxu0 %v5443_v61  ;;  %2118 = vmatpush.bf16.msra.mxu1 %v5571_v19  ;;  %v5379_v61 = vor.u32 %v7089_v4, %v5376_v43  ;;  %v5507_v19 = vor.u32 %v7121_v40, %v5504_v63  ;;  %v6214_v4 = vld [vmem:[#allocation7 + $0x2a0] sm:$0xf]  ;;  %v7046_v43 = vld [vmem:[#allocation7 + $0x2ac] sm:$0xf0] }
 0x13a   : > { %v6342_v40 = vld [vmem:[#allocation7 + $0x3a0] sm:$0xf]  ;;  %v7078_v63 = vld [vmem:[#allocation7 + $0x3ac] sm:$0xf0]  ;;  %v6215_v47 = vor.u32 %v7046_v43, %v6214_v4 }
 0x13b   : > { %2131 = vmatpush.bf16.msra.mxu2 %v5715_v16  ;;  %2145 = vmatpush.bf16.msra.mxu3 %v5843_v23  ;;  %v6102_v16 = vld [vmem:[#allocation7 + $0x1c0] sm:$0xf]  ;;  %v5651_v23 = vor.u32 %v7157_v54, %v5648_v55  ;;  %v6343_v50 = vor.u32 %v7078_v63, %v6342_v40  ;;  %v7006_v55 = vld [vmem:[#allocation7 + $0x16c] sm:$0xf0]  ;;  %v6123_v63 = vor.u32 %v7020_v37, %v6120_v38  ;;  %v7004_v37 = vld [vmem:[#allocation7 + $0x164] sm:$0xf] }
 0x13c   : > { %v6054_v54 = vld [vmem:[#allocation7 + $0x160] sm:$0xf]  ;;  %v6962_v28 = vld [vmem:[#allocation7 + $0xc] sm:$0xf0]  ;;  %v6056_v38 = vld [vmem:[#allocation7 + $0x170] sm:$0xf0] }
 0x13d   : > { %2105 = vmatpush.bf16.msra.mxu0 %v5427_v9  ;;  %2119 = vmatpush.bf16.msra.mxu1 %v5555_v18  ;;  %v7185_v9 = vld [vmem:[#allocation7 + $0x70c] sm:$0xf]  ;;  %v5760_v18 = vld [vmem:[#allocation7 + $0x718] sm:$0xf0]  ;;  %v5878_v3 = vld [vmem:[#allocation7] sm:$0xf] }
 0x13e   : > { %v5763_v25 = vor.u32 %v7185_v9, %v5760_v18  ;;  %v5879_v4 = vor.u32 %v6962_v28, %v5878_v3  ;;  %v7076_v3 = vld [vmem:[#allocation7 + $0x3a4] sm:$0xf]  ;;  %v6344_v28 = vld [vmem:[#allocation7 + $0x3b0] sm:$0xf0] }
 0x13f   : > { %2132 = vmatpush.bf16.msra.mxu2 %v5699_v33  ;;  %2146 = vmatpush.bf16.msra.mxu3 %v5827_v22  ;;  %v5975_v33 = vor.u32 %v6986_v11, %v5974_v2  ;;  %v6103_v22 = vor.u32 %v7018_v6, %v6102_v16  ;;  %v6199_v2 = vor.u32 %v7042_v60, %v6198_v59  ;;  %v6038_v16 = vld [vmem:[#allocation7 + $0x140] sm:$0xf]  ;;  %v7038_v6 = vld [vmem:[#allocation7 + $0x26c] sm:$0xf0] }
 0x140   : > { %v6262_v59 = vld [vmem:[#allocation7 + $0x300] sm:$0xf]  ;;  %v7058_v60 = vld [vmem:[#allocation7 + $0x30c] sm:$0xf0] }
 0x141   : > { %2106 = vmatpush.bf16.msra.mxu0 %v5411_v48  ;;  %2120 = vmatpush.bf16.msra.mxu1 %v5539_v27  ;;  %v6247_v48 = vor.u32 %v7054_v44, %v6246_v51  ;;  %v6375_v27 = vor.u32 %v7086_v15, %v6374_v20  ;;  %v5894_v51 = vld [vmem:[#allocation7 + $0x20] sm:$0xf]  ;;  %v6966_v44 = vld [vmem:[#allocation7 + $0x2c] sm:$0xf0]  ;;  %v6311_v15 = vor.u32 %v7070_v8, %v6310_v0  ;;  %v7012_v0 = vld [vmem:[#allocation7 + $0x1a4] sm:$0xf] }
 0x142   : > { %v6088_v8 = vld [vmem:[#allocation7 + $0x1b0] sm:$0xf0] }
 0x143   : > { %2133 = vmatpush.bf16.msra.mxu2 %v5683_v45  ;;  %2147 = vmatpush.bf16.msra.mxu3 %v5811_v49  ;;  %v6358_v45 = vld [vmem:[#allocation7 + $0x3c0] sm:$0xf]  ;;  %v7082_v49 = vld [vmem:[#allocation7 + $0x3cc] sm:$0xf0] }
 0x145   : > { %2107 = vmatpush.bf16.msra.mxu0 %v5395_v41  ;;  %2121 = vmatpush.bf16.msra.mxu1 %v5523_v39  ;;  %v6070_v41 = vld [vmem:[#allocation7 + $0x180] sm:$0xf]  ;;  %v7010_v39 = vld [vmem:[#allocation7 + $0x18c] sm:$0xf0] }
 0x146   : > { %v6071_v62 = vor.u32 %v7010_v39, %v6070_v41  ;;  %v6278_v41 = vld [vmem:[#allocation7 + $0x320] sm:$0xf]  ;;  %v7062_v39 = vld [vmem:[#allocation7 + $0x32c] sm:$0xf0] }
 0x147   : > { %2134 = vmatpush.bf16.msra.mxu2 %v5667_v14  ;;  %2148 = vmatpush.bf16.msra.mxu3 %v5795_v7  ;;  %v5926_v14 = vld [vmem:[#allocation7 + $0x60] sm:$0xf]  ;;  %v6974_v7 = vld [vmem:[#allocation7 + $0x6c] sm:$0xf0] }
 0x149   : > { %2108 = vmatpush.bf16.msra.mxu0 %v5379_v61  ;;  %2122 = vmatpush.bf16.msra.mxu1 %v5507_v19  ;;  %v6326_v61 = vld [vmem:[#allocation7 + $0x380] sm:$0xf]  ;;  %v7074_v19 = vld [vmem:[#allocation7 + $0x38c] sm:$0xf0] }
 0x14a   : > { %v6327_v11 = vor.u32 %v7074_v19, %v6326_v61  ;;  %v7052_v61 = vld [vmem:[#allocation7 + $0x2e4] sm:$0xf]  ;;  %v6248_v19 = vld [vmem:[#allocation7 + $0x2f0] sm:$0xf0] }
 0x14b   : > { %2135 = vmatpush.bf16.msra.mxu2 %v5651_v23  ;;  %2149 = vmatpush.bf16.msra.mxu3 %v5779_v5  ;;  %v7002_v23 = vld [vmem:[#allocation7 + $0x14c] sm:$0xf0]  ;;  %v6182_v5 = vld [vmem:[#allocation7 + $0x260] sm:$0xf] }
 0x14c   : > { %2109 = vmatmul.bf16.vlgmr.msra.gmra.mxu0 %v7869_v56  ;;  %2123 = vmatmul.bf16.vlgmr.msra.gmra.mxu1 %v7872_v58  ;;  %v6231_v56 = vor.u32 %v7050_v13, %v6230_v53  ;;  %v6359_v58 = vor.u32 %v7082_v49, %v6358_v45  ;;  %v6039_v18 = vor.u32 %v7002_v23, %v6038_v16  ;;  %v6006_v53 = vld [vmem:[#allocation7 + $0x100] sm:$0xf]  ;;  %v6994_v49 = vld [vmem:[#allocation7 + $0x10c] sm:$0xf0]  ;;  %v6980_v16 = vld [vmem:[#allocation7 + $0xa4] sm:$0xf] }
 0x14d   : > { %2801 = vmatpush.bf16.msrb.mxu0 %v5991_v24  ;;  %2815 = vmatpush.bf16.msrb.mxu1 %v6119_v1  ;;  %v5910_v24 = vld [vmem:[#allocation7 + $0x40] sm:$0xf]  ;;  %v6970_v1 = vld [vmem:[#allocation7 + $0x4c] sm:$0xf0]  ;;  %v6183_v20 = vor.u32 %v7038_v6, %v6182_v5  ;;  %v6295_v45 = vor.u32 %v7066_v30, %v6294_v26  ;;  %v6007_v43 = vor.u32 %v6994_v49, %v6006_v53  ;;  %v5960_v23 = vld [vmem:[#allocation7 + $0xb0] sm:$0xf0] }
 0x14e   : > { %v5911_v9 = vor.u32 %v6970_v1, %v5910_v24  ;;  %v6251_v5 = vor.u32 %v7052_v61, %v6248_v19  ;;  %v7008_v26 = vld [vmem:[#allocation7 + $0x184] sm:$0xf]  ;;  %v6072_v30 = vld [vmem:[#allocation7 + $0x190] sm:$0xf0] }
 0x14f   : > { %2136 = vmatpush.bf16.msra.mxu2 %v5635_v21  ;;  %2150 = vmatpush.bf16.msra.mxu3 %v5763_v25  ;;  %v6166_v21 = vld [vmem:[#allocation7 + $0x240] sm:$0xf]  ;;  %v7034_v25 = vld [vmem:[#allocation7 + $0x24c] sm:$0xf0]  ;;  %v5928_v49 = vld [vmem:[#allocation7 + $0x70] sm:$0xf0] }
 0x150   : > { %v6167_v13 = vor.u32 %v7034_v25, %v6166_v21  ;;  %v6964_v61 = vld [vmem:[#allocation7 + $0x24] sm:$0xf]  ;;  %v5896_v19 = vld [vmem:[#allocation7 + $0x30] sm:$0xf0] }
 0x151   : > { %2802 = vmatpush.bf16.msrb.mxu0 %v5975_v33  ;;  %2816 = vmatpush.bf16.msrb.mxu1 %v6103_v22  ;;  %v6022_v33 = vld [vmem:[#allocation7 + $0x120] sm:$0xf]  ;;  %v6998_v22 = vld [vmem:[#allocation7 + $0x12c] sm:$0xf0] }
 0x152   : > { %2137 = vmatmul.bf16.vlgmr.msra.gmra.mxu2 %v7885_v35  ;;  %2151 = vmatmul.bf16.vlgmr.msra.gmra.mxu3 %v7888_v36  ;;  %v5927_v35 = vor.u32 %v6974_v7, %v5926_v14  ;;  %v6055_v36 = vor.u32 %v7006_v55, %v6054_v54  ;;  %v7016_v14 = vld [vmem:[#allocation7 + $0x1c4] sm:$0xf]  ;;  %v6134_v54 = vld [vmem:[#allocation7 + $0x200] sm:$0xf]  ;;  %v7026_v55 = vld [vmem:[#allocation7 + $0x20c] sm:$0xf0] }
 0x153   : > { %2829 = vmatpush.bf16.msrb.mxu2 %v6247_v48  ;;  %2843 = vmatpush.bf16.msrb.mxu3 %v6375_v27  ;;  %v5895_v48 = vor.u32 %v6966_v44, %v5894_v51  ;;  %v6023_v27 = vor.u32 %v6998_v22, %v6022_v33  ;;  %v7080_v51 = vld [vmem:[#allocation7 + $0x3c4] sm:$0xf]  ;;  %v6360_v44 = vld [vmem:[#allocation7 + $0x3d0] sm:$0xf0] }
 0x154   : > { %v6976_v33 = vld [vmem:[#allocation7 + $0x84] sm:$0xf]  ;;  %v5944_v22 = vld [vmem:[#allocation7 + $0x90] sm:$0xf0]  ;;  %v6363_v25 = vor.u32 %v7080_v51, %v6360_v44 }
 0x155   : > { %2803 = vmatpush.bf16.msrb.mxu0 %v5959_v32  ;;  %2817 = vmatpush.bf16.msrb.mxu1 %v6087_v34  ;;  %v6988_v32 = vld [vmem:[#allocation7 + $0xe4] sm:$0xf]  ;;  %v5992_v34 = vld [vmem:[#allocation7 + $0xf0] sm:$0xf0]  ;;  %v5947_v53 = vor.u32 %v6976_v33, %v5944_v22  ;;  %v6126_v33 = vld [vmem:[#allocation7 + $0x1e8] sm:$0xf] }
 0x156   : > { %v5995_v40 = vor.u32 %v6988_v32, %v5992_v34  ;;  %v6347_v34 = vor.u32 %v7076_v3, %v6344_v28  ;;  %v6008_v44 = vld [vmem:[#allocation7 + $0x110] sm:$0xf0]  ;;  %v7023_v22 = vld [vmem:[#allocation7 + $0x1f4] sm:$0xf0] }
 0x157   : > { %2830 = vmatpush.bf16.msrb.mxu2 %v6231_v56  ;;  %2844 = vmatpush.bf16.msrb.mxu3 %v6359_v58  ;;  %v6150_v56 = vld [vmem:[#allocation7 + $0x220] sm:$0xf]  ;;  %v7030_v58 = vld [vmem:[#allocation7 + $0x22c] sm:$0xf0]  ;;  %v6127_v28 = vor.u32 %v7023_v22, %v6126_v33  ;;  %v6975_v33 = vld [vmem:[#allocation7 + $0x74] sm:$0xf0] }
 0x158   : > { %v6151_v7 = vor.u32 %v7030_v58, %v6150_v56  ;;  %v7040_v56 = vld [vmem:[#allocation7 + $0x284] sm:$0xf]  ;;  %v6200_v58 = vld [vmem:[#allocation7 + $0x290] sm:$0xf0] }
 0x159   : > { %2804 = vmatpush.bf16.msrb.mxu0 %v5943_v46  ;;  %2818 = vmatpush.bf16.msrb.mxu1 %v6071_v62  ;;  %v6984_v46 = vld [vmem:[#allocation7 + $0xc4] sm:$0xf]  ;;  %v5976_v62 = vld [vmem:[#allocation7 + $0xd0] sm:$0xf0] }
 0x15a   : > { %v5979_v24 = vor.u32 %v6984_v46, %v5976_v62  ;;  %v6203_v46 = vor.u32 %v7040_v56, %v6200_v58  ;;  %v7056_v56 = vld [vmem:[#allocation7 + $0x304] sm:$0xf]  ;;  %v6264_v58 = vld [vmem:[#allocation7 + $0x310] sm:$0xf0] }
 0x15b   : > { %2831 = vmatpush.bf16.msrb.mxu2 %v6215_v47  ;;  %2845 = vmatpush.bf16.msrb.mxu3 %v6343_v50  ;;  %v6279_v47 = vor.u32 %v7062_v39, %v6278_v41  ;;  %v6104_v50 = vld [vmem:[#allocation7 + $0x1d0] sm:$0xf0]  ;;  %v7072_v41 = vld [vmem:[#allocation7 + $0x384] sm:$0xf] }
 0x15c   : > { %v6107_v1 = vor.u32 %v7016_v14, %v6104_v50  ;;  %v6328_v39 = vld [vmem:[#allocation7 + $0x390] sm:$0xf0]  ;;  %v7000_v14 = vld [vmem:[#allocation7 + $0x144] sm:$0xf] }
 0x15d   : > { %2805 = vmatpush.bf16.msrb.mxu0 %v5927_v35  ;;  %2819 = vmatpush.bf16.msrb.mxu1 %v6055_v36  ;;  %v7084_v35 = vld [vmem:[#allocation7 + $0x3e4] sm:$0xf]  ;;  %v6376_v36 = vld [vmem:[#allocation7 + $0x3f0] sm:$0xf0]  ;;  %v6331_v62 = vor.u32 %v7072_v41, %v6328_v39  ;;  %v6254_v41 = vld [vmem:[#allocation7 + $0x2e8] sm:$0xf] }
 0x15e   : > { %v6379_v6 = vor.u32 %v7084_v35, %v6376_v36  ;;  %v6184_v50 = vld [vmem:[#allocation7 + $0x270] sm:$0xf0]  ;;  %v7055_v39 = vld [vmem:[#allocation7 + $0x2f4] sm:$0xf0] }
 0x15f   : > { %2832 = vmatpush.bf16.msrb.mxu2 %v6199_v2  ;;  %2846 = vmatpush.bf16.msrb.mxu3 %v6327_v11  ;;  %v6135_v2 = vor.u32 %v7026_v55, %v6134_v54  ;;  %v6263_v11 = vor.u32 %v7058_v60, %v6262_v59  ;;  %v7068_v54 = vld [vmem:[#allocation7 + $0x364] sm:$0xf]  ;;  %v6312_v55 = vld [vmem:[#allocation7 + $0x370] sm:$0xf0] }
 0x160   : > { %v6315_v36 = vor.u32 %v7068_v54, %v6312_v55  ;;  %v6094_v54 = vld [vmem:[#allocation7 + $0x1a8] sm:$0xf]  ;;  %v7015_v55 = vld [vmem:[#allocation7 + $0x1b4] sm:$0xf0] }
 0x161   : > { %2806 = vmatpush.bf16.msrb.mxu0 %v5911_v9  ;;  %2820 = vmatpush.bf16.msrb.mxu1 %v6039_v18  ;;  %v7048_v9 = vld [vmem:[#allocation7 + $0x2c4] sm:$0xf]  ;;  %v6232_v18 = vld [vmem:[#allocation7 + $0x2d0] sm:$0xf0] }
 0x162   : > { %v6235_v21 = vor.u32 %v7048_v9, %v6232_v18  ;;  %v6992_v9 = vld [vmem:[#allocation7 + $0x104] sm:$0xf] }
 0x163   : > { %2833 = vmatpush.bf16.msrb.mxu2 %v6183_v20  ;;  %2847 = vmatpush.bf16.msrb.mxu3 %v6311_v15  ;;  %v5963_v20 = vor.u32 %v6980_v16, %v5960_v23  ;;  %v6091_v15 = vor.u32 %v7012_v0, %v6088_v8  ;;  %v7064_v16 = vld [vmem:[#allocation7 + $0x344] sm:$0xf]  ;;  %v6296_v23 = vld [vmem:[#allocation7 + $0x350] sm:$0xf0] }
 0x164   : > { %v6960_v0 = vld [vmem:[#allocation7 + $0x4] sm:$0xf]  ;;  %v5880_v8 = vld [vmem:[#allocation7 + $0x10] sm:$0xf0]  ;;  %v6299_v51 = vor.u32 %v7064_v16, %v6296_v23 }
 0x165   : > { %2807 = vmatpush.bf16.msrb.mxu0 %v5895_v48  ;;  %2821 = vmatpush.bf16.msrb.mxu1 %v6023_v27  ;;  %v7044_v48 = vld [vmem:[#allocation7 + $0x2a4] sm:$0xf]  ;;  %v6216_v27 = vld [vmem:[#allocation7 + $0x2b0] sm:$0xf0] }
 0x166   : > { %v6219_v32 = vor.u32 %v7044_v48, %v6216_v27  ;;  %v5883_v48 = vor.u32 %v6960_v0, %v5880_v8  ;;  %v6011_v27 = vor.u32 %v6992_v9, %v6008_v44  ;;  %v7011_v0 = vld [vmem:[#allocation7 + $0x194] sm:$0xf0]  ;;  %v6222_v8 = vld [vmem:[#allocation7 + $0x2a8] sm:$0xf] }
 0x167   : > { %2834 = vmatpush.bf16.msrb.mxu2 %v6167_v13  ;;  %2848 = vmatpush.bf16.msrb.mxu3 %v6295_v45  ;;  %v6075_v13 = vor.u32 %v7008_v26, %v6072_v30  ;;  %v6972_v45 = vld [vmem:[#allocation7 + $0x64] sm:$0xf]  ;;  %v6280_v30 = vld [vmem:[#allocation7 + $0x330] sm:$0xf0]  ;;  %v7047_v9 = vld [vmem:[#allocation7 + $0x2b4] sm:$0xf0] }
 0x168   : > { %v7060_v26 = vld [vmem:[#allocation7 + $0x324] sm:$0xf]  ;;  %v6223_v22 = vor.u32 %v7047_v9, %v6222_v8  ;;  %v6995_v9 = vld [vmem:[#allocation7 + $0x114] sm:$0xf0] }
 0x169   : > { %2808 = vmatpush.bf16.msrb.mxu0 %v5879_v4  ;;  %2822 = vmatpush.bf16.msrb.mxu1 %v6007_v43  ;;  %v5931_v4 = vor.u32 %v6972_v45, %v5928_v49  ;;  %v6059_v43 = vor.u32 %v7004_v37, %v6056_v38  ;;  %v6110_v45 = vld [vmem:[#allocation7 + $0x1c8] sm:$0xf]  ;;  %v7024_v37 = vld [vmem:[#allocation7 + $0x204] sm:$0xf]  ;;  %v6136_v38 = vld [vmem:[#allocation7 + $0x210] sm:$0xf0] }
 0x16b   : > { %2835 = vmatpush.bf16.msrb.mxu2 %v6151_v7  ;;  %2849 = vmatpush.bf16.msrb.mxu3 %v6279_v47  ;;  %v6040_v7 = vld [vmem:[#allocation7 + $0x150] sm:$0xf0]  ;;  %v7036_v47 = vld [vmem:[#allocation7 + $0x264] sm:$0xf] }
 0x16c   : > { %2809 = vmatmul.bf16.vlgmr.msrb.gmra.mxu0 %v7834_v52  ;;  %2823 = vmatmul.bf16.vlgmr.msrb.gmra.mxu1 %v7838_v57  ;;  %v6043_v60 = vor.u32 %v7000_v14, %v6040_v7  ;;  %v6187_v35 = vor.u32 %v7036_v47, %v6184_v50  ;;  %v5966_v14 = vld [vmem:[#allocation7 + $0xa8] sm:$0xf]  ;;  %v6983_v7 = vld [vmem:[#allocation7 + $0xb4] sm:$0xf0]  ;;  %v6255_v47 = vor.u32 %v7055_v39, %v6254_v41 }
 0x16d   : > { %2857 = vmatpush.bf16.msra.mxu0 %v5995_v40  ;;  %2871 = vmatpush.bf16.msra.mxu1 %v6123_v63  ;;  %v6968_v40 = vld [vmem:[#allocation7 + $0x44] sm:$0xf]  ;;  %v5912_v63 = vld [vmem:[#allocation7 + $0x50] sm:$0xf0]  ;;  %v6190_v41 = vld [vmem:[#allocation7 + $0x268] sm:$0xf] }
 0x16e   : > { %v5915_v59 = vor.u32 %v6968_v40, %v5912_v63  ;;  %v7039_v39 = vld [vmem:[#allocation7 + $0x274] sm:$0xf0] }
 0x16f   : > { %2836 = vmatpush.bf16.msrb.mxu2 %v6135_v2  ;;  %2850 = vmatpush.bf16.msrb.mxu3 %v6263_v11  ;;  %v7032_v2 = vld [vmem:[#allocation7 + $0x244] sm:$0xf]  ;;  %v6168_v11 = vld [vmem:[#allocation7 + $0x250] sm:$0xf0] }
 0x170   : > { %v6171_v18 = vor.u32 %v7032_v2, %v6168_v11  ;;  %v5950_v2 = vld [vmem:[#allocation7 + $0x88] sm:$0xf]  ;;  %v6979_v11 = vld [vmem:[#allocation7 + $0x94] sm:$0xf0] }
 0x171   : > { %2858 = vmatpush.bf16.msra.mxu0 %v5979_v24  ;;  %2872 = vmatpush.bf16.msra.mxu1 %v6107_v1  ;;  %v6996_v24 = vld [vmem:[#allocation7 + $0x124] sm:$0xf]  ;;  %v6024_v1 = vld [vmem:[#allocation7 + $0x130] sm:$0xf0]  ;;  %v5951_v44 = vor.u32 %v6979_v11, %v5950_v2  ;;  %v5886_v2 = vld [vmem:[#allocation7 + $0x8] sm:$0xf] }
 0x172   : > { %2837 = vmatmul.bf16.vlgmr.msrb.gmra.mxu2 %v7852_v12  ;;  %2851 = vmatmul.bf16.vlgmr.msrb.gmra.mxu3 %v7856_v29  ;;  %v6963_v11 = vld [vmem:[#allocation7 + $0x14] sm:$0xf0] }
 0x173   : > { %2885 = vmatpush.bf16.msra.mxu2 %v6251_v5  ;;  %2899 = vmatpush.bf16.msra.mxu3 %v6379_v6  ;;  %v5899_v5 = vor.u32 %v6964_v61, %v5896_v19  ;;  %v6027_v6 = vor.u32 %v6996_v24, %v6024_v1  ;;  %v6366_v61 = vld [vmem:[#allocation7 + $0x3c8] sm:$0xf]  ;;  %v7083_v19 = vld [vmem:[#allocation7 + $0x3d4] sm:$0xf0] }
 0x175   : > { %2859 = vmatpush.bf16.msra.mxu0 %v5963_v20  ;;  %2873 = vmatpush.bf16.msra.mxu1 %v6091_v15  ;;  %v5998_v20 = vld [vmem:[#allocation7 + $0xe8] sm:$0xf]  ;;  %v6991_v15 = vld [vmem:[#allocation7 + $0xf4] sm:$0xf0] }
 0x176   : > { %v5999_v3 = vor.u32 %v6991_v15, %v5998_v20  ;;  %v5934_v15 = vld [vmem:[#allocation7 + $0x68] sm:$0xf] }
 0x177   : > { %2886 = vmatpush.bf16.msra.mxu2 %v6235_v21  ;;  %2900 = vmatpush.bf16.msra.mxu3 %v6363_v25  ;;  %v7028_v21 = vld [vmem:[#allocation7 + $0x224] sm:$0xf]  ;;  %v6152_v25 = vld [vmem:[#allocation7 + $0x230] sm:$0xf0] }
 0x178   : > { %v6155_v49 = vor.u32 %v7028_v21, %v6152_v25  ;;  %v6062_v25 = vld [vmem:[#allocation7 + $0x168] sm:$0xf] }
 0x179   : > { %2860 = vmatpush.bf16.msra.mxu0 %v5947_v53  ;;  %2874 = vmatpush.bf16.msra.mxu1 %v6075_v13  ;;  %v5982_v53 = vld [vmem:[#allocation7 + $0xc8] sm:$0xf]  ;;  %v6987_v13 = vld [vmem:[#allocation7 + $0xd4] sm:$0xf0] }
 0x17a   : > { %v5983_v40 = vor.u32 %v6987_v13, %v5982_v53 }
 0x17b   : > { %2887 = vmatpush.bf16.msra.mxu2 %v6219_v32  ;;  %2901 = vmatpush.bf16.msra.mxu3 %v6347_v34  ;;  %v6283_v32 = vor.u32 %v7060_v26, %v6280_v30  ;;  %v7019_v34 = vld [vmem:[#allocation7 + $0x1d4] sm:$0xf0]  ;;  %v6206_v30 = vld [vmem:[#allocation7 + $0x288] sm:$0xf] }
 0x17c   : > { %v6111_v63 = vor.u32 %v7019_v34, %v6110_v45  ;;  %v7007_v26 = vld [vmem:[#allocation7 + $0x174] sm:$0xf0] }
 0x17d   : > { %2861 = vmatpush.bf16.msra.mxu0 %v5931_v4  ;;  %2875 = vmatpush.bf16.msra.mxu1 %v6059_v43  ;;  %v6382_v4 = vld [vmem:[#allocation7 + $0x3e8] sm:$0xf]  ;;  %v7087_v43 = vld [vmem:[#allocation7 + $0x3f4] sm:$0xf0]  ;;  %v6063_v53 = vor.u32 %v7007_v26, %v6062_v25  ;;  %v5887_v25 = vor.u32 %v6963_v11, %v5886_v2  ;;  %v6368_v2 = vld [vmem:[#allocation7 + $0x3d8] sm:$0xf0] }
 0x17e   : > { %v6383_v50 = vor.u32 %v7087_v43, %v6382_v4  ;;  %v6318_v4 = vld [vmem:[#allocation7 + $0x368] sm:$0xf]  ;;  %v7071_v43 = vld [vmem:[#allocation7 + $0x374] sm:$0xf0] }
 0x17f   : > { %2888 = vmatpush.bf16.msra.mxu2 %v6203_v46  ;;  %2902 = vmatpush.bf16.msra.mxu3 %v6331_v62  ;;  %v6139_v46 = vor.u32 %v7024_v37, %v6136_v38  ;;  %v6267_v62 = vor.u32 %v7056_v56, %v6264_v58  ;;  %v6046_v56 = vld [vmem:[#allocation7 + $0x148] sm:$0xf]  ;;  %v7003_v58 = vld [vmem:[#allocation7 + $0x154] sm:$0xf0] }
 0x181   : > { %2862 = vmatpush.bf16.msra.mxu0 %v5915_v59  ;;  %2876 = vmatpush.bf16.msra.mxu1 %v6043_v60  ;;  %v6238_v59 = vld [vmem:[#allocation7 + $0x2c8] sm:$0xf]  ;;  %v7051_v60 = vld [vmem:[#allocation7 + $0x2d4] sm:$0xf0] }
 0x182   : > { %v6239_v23 = vor.u32 %v7051_v60, %v6238_v59  ;;  %v6174_v59 = vld [vmem:[#allocation7 + $0x248] sm:$0xf] }
 0x183   : > { %2889 = vmatpush.bf16.msra.mxu2 %v6187_v35  ;;  %2903 = vmatpush.bf16.msra.mxu3 %v6315_v36  ;;  %v5967_v35 = vor.u32 %v6983_v7, %v5966_v14  ;;  %v6095_v36 = vor.u32 %v7015_v55, %v6094_v54  ;;  %v6030_v54 = vld [vmem:[#allocation7 + $0x128] sm:$0xf]  ;;  %v6999_v55 = vld [vmem:[#allocation7 + $0x134] sm:$0xf0] }
 0x185   : > { %2863 = vmatpush.bf16.msra.mxu0 %v5899_v5  ;;  %2877 = vmatpush.bf16.msra.mxu1 %v6027_v6  ;;  %v6367_v5 = vor.u32 %v7083_v19, %v6366_v61  ;;  %v6078_v6 = vld [vmem:[#allocation7 + $0x188] sm:$0xf]  ;;  %v7035_v61 = vld [vmem:[#allocation7 + $0x254] sm:$0xf0] }
 0x186   : > { %v6079_v20 = vor.u32 %v7011_v0, %v6078_v6  ;;  %v6302_v19 = vld [vmem:[#allocation7 + $0x348] sm:$0xf]  ;;  %v6175_v0 = vor.u32 %v7035_v61, %v6174_v59  ;;  %v7013_v61 = vld [vmem:[#allocation7 + $0x1ac] sm:$0xf] }
 0x187   : > { %2890 = vmatpush.bf16.msra.mxu2 %v6171_v18  ;;  %2904 = vmatpush.bf16.msra.mxu3 %v6299_v51  ;;  %v6350_v18 = vld [vmem:[#allocation7 + $0x3a8] sm:$0xf]  ;;  %v7079_v51 = vld [vmem:[#allocation7 + $0x3b4] sm:$0xf0] }
 0x188   : > { %v6351_v21 = vor.u32 %v7079_v51, %v6350_v18  ;;  %v6000_v18 = vld [vmem:[#allocation7 + $0xf8] sm:$0xf0] }
 0x189   : > { %2864 = vmatpush.bf16.msra.mxu0 %v5883_v48  ;;  %2878 = vmatpush.bf16.msra.mxu1 %v6011_v27  ;;  %v1942_v24 = vpop.f32.mrf.mxu0  ;;  %v1956_v1 = vpop.f32.mrf.mxu1  ;;  %v7043_v48 = vld [vmem:[#allocation7 + $0x294] sm:$0xf0]  ;;  %v6334_v27 = vld [vmem:[#allocation7 + $0x388] sm:$0xf] }
 0x18a   : > { %v1957_v16 = vadd.f32 %v1956_v1, %v1942_v24  ;;  %v6207_v37 = vor.u32 %v7043_v48, %v6206_v30  ;;  %v6031_v1 = vor.u32 %v6999_v55, %v6030_v54  ;;  %v6981_v54 = vld [vmem:[#allocation7 + $0xac] sm:$0xf]  ;;  %v5968_v55 = vld [vmem:[#allocation7 + $0xb8] sm:$0xf0] }
 0x18b   : > { %2891 = vmatpush.bf16.msra.mxu2 %v6155_v49  ;;  %2905 = vmatpush.bf16.msra.mxu3 %v6283_v32  ;;  %v5918_v49 = vld [vmem:[#allocation7 + $0x48] sm:$0xf]  ;;  %v6971_v32 = vld [vmem:[#allocation7 + $0x54] sm:$0xf0] }
 0x18c   : > { %2865 = vmatmul.bf16.vlgmr.msra.gmra.mxu0 %v7834_v52  ;;  %2879 = vmatmul.bf16.vlgmr.msra.gmra.mxu1 %v7838_v57 }
 0x18d   : > { %2913 = vmatpush.bf16.msrb.mxu0 %v5999_v3  ;;  %2927 = vmatpush.bf16.msrb.mxu1 %v6127_v28  ;;  %v7075_v3 = vld [vmem:[#allocation7 + $0x394] sm:$0xf0]  ;;  %v5935_v28 = vor.u32 %v6975_v33, %v5934_v15  ;;  %v6158_v15 = vld [vmem:[#allocation7 + $0x228] sm:$0xf] }
 0x18e   : > { %v6335_v38 = vor.u32 %v7075_v3, %v6334_v27  ;;  %v7031_v33 = vld [vmem:[#allocation7 + $0x234] sm:$0xf0] }
 0x18f   : > { %2892 = vmatpush.bf16.msra.mxu2 %v6139_v46  ;;  %2906 = vmatpush.bf16.msra.mxu3 %v6267_v62  ;;  %v5902_v46 = vld [vmem:[#allocation7 + $0x28] sm:$0xf]  ;;  %v6967_v62 = vld [vmem:[#allocation7 + $0x34] sm:$0xf0] }
 0x190   : > { %v5903_v24 = vor.u32 %v6967_v62, %v5902_v46 }
 0x191   : > { %2914 = vmatpush.bf16.msrb.mxu0 %v5983_v40  ;;  %2928 = vmatpush.bf16.msrb.mxu1 %v6111_v63  ;;  %v1944_v13 = vpop.f32.mrf.mxu0  ;;  %v1958_v45 = vpop.f32.mrf.mxu1  ;;  %v5919_v40 = vor.u32 %v6971_v32, %v5918_v49  ;;  %v6047_v63 = vor.u32 %v7003_v58, %v6046_v56  ;;  %v6159_v49 = vor.u32 %v7031_v33, %v6158_v15  ;;  %v7027_v56 = vld [vmem:[#allocation7 + $0x214] sm:$0xf0]  ;;  %v6270_v58 = vld [vmem:[#allocation7 + $0x308] sm:$0xf]  ;;  %v7045_v15 = vld [vmem:[#allocation7 + $0x2ac] sm:$0xf] }
 0x192   : > { %2893 = vmatmul.bf16.vlgmr.msra.gmra.mxu2 %v7852_v12  ;;  %2907 = vmatmul.bf16.vlgmr.msra.gmra.mxu3 %v7856_v29  ;;  %v7936_v34 = vadd.f32 %v1958_v45, %v1944_v13  ;;  %v7017_v13 = vld [vmem:[#allocation7 + $0x1cc] sm:$0xf] }
 0x193   : > { %2941 = vmatpush.bf16.msrb.mxu2 %v6255_v47  ;;  %2955 = vmatpush.bf16.msrb.mxu3 %v6383_v50  ;;  %v6191_v47 = vor.u32 %v7039_v39, %v6190_v41  ;;  %v6319_v50 = vor.u32 %v7071_v43, %v6318_v4  ;;  %v7059_v41 = vld [vmem:[#allocation7 + $0x314] sm:$0xf0]  ;;  %v7053_v39 = vld [vmem:[#allocation7 + $0x2ec] sm:$0xf]  ;;  %v6256_v43 = vld [vmem:[#allocation7 + $0x2f8] sm:$0xf0] }
 0x194   : > { %v6259_v59 = vor.u32 %v7053_v39, %v6256_v43 }
 0x195   : > { %2915 = vmatpush.bf16.msrb.mxu0 %v5967_v35  ;;  %2929 = vmatpush.bf16.msrb.mxu1 %v6095_v36  ;;  %v1970_v14 = vpop.f32.mrf.mxu2  ;;  %v1984_v7 = vpop.f32.mrf.mxu3  ;;  %v7067_v35 = vld [vmem:[#allocation7 + $0x354] sm:$0xf0] }
 0x196   : > { %v1971_v60 = vadd.f32 %v1970_v14, %v1957_v16  ;;  %v6303_v8 = vor.u32 %v7067_v35, %v6302_v19  ;;  %v6989_v16 = vld [vmem:[#allocation7 + $0xec] sm:$0xf]  ;;  %v6096_v19 = vld [vmem:[#allocation7 + $0x1b8] sm:$0xf0] }
 0x197   : > { %2942 = vmatpush.bf16.msrb.mxu2 %v6239_v23  ;;  %2956 = vmatpush.bf16.msrb.mxu3 %v6367_v5  ;;  %v6014_v23 = vld [vmem:[#allocation7 + $0x108] sm:$0xf]  ;;  %v6003_v27 = vor.u32 %v6989_v16, %v6000_v18  ;;  %v7049_v35 = vld [vmem:[#allocation7 + $0x2cc] sm:$0xf] }
 0x198   : > { %v7938_v36 = vadd.f32 %v1984_v7, %v1971_v60  ;;  %v6015_v26 = vor.u32 %v6995_v9, %v6014_v23  ;;  %v5952_v9 = vld [vmem:[#allocation7 + $0x98] sm:$0xf0] }
 0x199   : > { %2916 = vmatpush.bf16.msrb.mxu0 %v5951_v44  ;;  %2930 = vmatpush.bf16.msrb.mxu1 %v6079_v20  ;;  %v1998_v5 = vpop.f32.mrf.mxu0  ;;  %v2012_v6 = vpop.f32.mrf.mxu1  ;;  %v7021_v44 = vld [vmem:[#allocation7 + $0x1ec] sm:$0xf]  ;;  %v6128_v20 = vld [vmem:[#allocation7 + $0x1f8] sm:$0xf0] }
 0x19a   : > { %v7940_v51 = vadd.f32 %v2012_v6, %v1998_v5  ;;  %v6131_v3 = vor.u32 %v7021_v44, %v6128_v20  ;;  %v5971_v6 = vor.u32 %v6981_v54, %v5968_v55  ;;  %v7009_v44 = vld [vmem:[#allocation7 + $0x18c] sm:$0xf]  ;;  %v6080_v20 = vld [vmem:[#allocation7 + $0x198] sm:$0xf0] }
 0x19b   : > { %2943 = vmatpush.bf16.msrb.mxu2 %v6223_v22  ;;  %2957 = vmatpush.bf16.msrb.mxu3 %v6351_v21  ;;  %v6286_v22 = vld [vmem:[#allocation7 + $0x328] sm:$0xf]  ;;  %v7063_v21 = vld [vmem:[#allocation7 + $0x334] sm:$0xf0]  ;;  %v6192_v55 = vld [vmem:[#allocation7 + $0x278] sm:$0xf0] }
 0x19c   : > { %v6287_v32 = vor.u32 %v7063_v21, %v6286_v22  ;;  %v6224_v22 = vld [vmem:[#allocation7 + $0x2b8] sm:$0xf0]  ;;  %v7077_v21 = vld [vmem:[#allocation7 + $0x3ac] sm:$0xf] }
 0x19d   : > { %2917 = vmatpush.bf16.msrb.mxu0 %v5935_v28  ;;  %2931 = vmatpush.bf16.msrb.mxu1 %v6063_v53  ;;  %v1972_v30 = vpop.f32.mrf.mxu2  ;;  %v1986_v48 = vpop.f32.mrf.mxu3  ;;  %v6985_v28 = vld [vmem:[#allocation7 + $0xcc] sm:$0xf]  ;;  %v5984_v53 = vld [vmem:[#allocation7 + $0xd8] sm:$0xf0] }
 0x19e   : > { %v1973_v45 = vadd.f32 %v1972_v30, %v7936_v34  ;;  %v5987_v34 = vor.u32 %v6985_v28, %v5984_v53  ;;  %v5936_v28 = vld [vmem:[#allocation7 + $0x78] sm:$0xf0]  ;;  %v6227_v53 = vor.u32 %v7045_v15, %v6224_v22  ;;  %v6961_v22 = vld [vmem:[#allocation7 + $0xc] sm:$0xf] }
 0x19f   : > { %2944 = vmatpush.bf16.msrb.mxu2 %v6207_v37  ;;  %2958 = vmatpush.bf16.msrb.mxu3 %v6335_v38  ;;  %v6112_v37 = vld [vmem:[#allocation7 + $0x1d8] sm:$0xf0]  ;;  %v6142_v38 = vld [vmem:[#allocation7 + $0x208] sm:$0xf] }
 0x1a0   : > { %v7943_v4 = vadd.f32 %v1986_v48, %v1973_v45  ;;  %v6115_v14 = vor.u32 %v7017_v13, %v6112_v37  ;;  %v7005_v45 = vld [vmem:[#allocation7 + $0x16c] sm:$0xf]  ;;  %v6208_v37 = vld [vmem:[#allocation7 + $0x298] sm:$0xf0] }
 0x1a1   : > { %2918 = vmatpush.bf16.msrb.mxu0 %v5919_v40  ;;  %2932 = vmatpush.bf16.msrb.mxu1 %v6047_v63  ;;  %v7085_v40 = vld [vmem:[#allocation7 + $0x3ec] sm:$0xf]  ;;  %v6384_v63 = vld [vmem:[#allocation7 + $0x3f8] sm:$0xf0]  ;;  %v2000_v46 = vpop.f32.mrf.mxu0  ;;  %v2014_v62 = vpop.f32.mrf.mxu1 }
 0x1a2   : > { %v2015_v7 = vadd.f32 %v2014_v62, %v2000_v46  ;;  %v6387_v60 = vor.u32 %v7085_v40, %v6384_v63  ;;  %v6969_v63 = vld [vmem:[#allocation7 + $0x4c] sm:$0xf]  ;;  %v5920_v46 = vld [vmem:[#allocation7 + $0x58] sm:$0xf0] }
 0x1a3   : > { %2945 = vmatpush.bf16.msrb.mxu2 %v6191_v47  ;;  %2959 = vmatpush.bf16.msrb.mxu3 %v6319_v50  ;;  %v6143_v47 = vor.u32 %v7027_v56, %v6142_v38  ;;  %v6271_v50 = vor.u32 %v7059_v41, %v6270_v58  ;;  %v7073_v38 = vld [vmem:[#allocation7 + $0x38c] sm:$0xf]  ;;  %v6336_v56 = vld [vmem:[#allocation7 + $0x398] sm:$0xf0] }
 0x1a5   : > { %2919 = vmatpush.bf16.msrb.mxu0 %v5903_v24  ;;  %2933 = vmatpush.bf16.msrb.mxu1 %v6031_v1  ;;  %v6240_v24 = vld [vmem:[#allocation7 + $0x2d8] sm:$0xf0]  ;;  %v7081_v1 = vld [vmem:[#allocation7 + $0x3cc] sm:$0xf]  ;;  %v2026_v11 = vpop.f32.mrf.mxu2  ;;  %v2040_v23 = vpop.f32.mrf.mxu3 }
 0x1a6   : > { %v2027_v5 = vadd.f32 %v2026_v11, %v7940_v51  ;;  %v6243_v16 = vor.u32 %v7049_v35, %v6240_v24  ;;  %v6371_v18 = vor.u32 %v7081_v1, %v6368_v2  ;;  %v5923_v35 = vor.u32 %v6969_v63, %v5920_v46  ;;  %v6965_v1 = vld [vmem:[#allocation7 + $0x2c] sm:$0xf]  ;;  %v5904_v2 = vld [vmem:[#allocation7 + $0x38] sm:$0xf0] }
 0x1a7   : > { %2946 = vmatpush.bf16.msrb.mxu2 %v6175_v0  ;;  %2960 = vmatpush.bf16.msrb.mxu3 %v6303_v8  ;;  %v6099_v0 = vor.u32 %v7013_v61, %v6096_v19  ;;  %v6977_v8 = vld [vmem:[#allocation7 + $0x8c] sm:$0xf] }
 0x1a8   : > { %v7948_v33 = vadd.f32 %v2040_v23, %v2027_v5  ;;  %v5955_v48 = vor.u32 %v6977_v8, %v5952_v9  ;;  %v6997_v5 = vld [vmem:[#allocation7 + $0x12c] sm:$0xf]  ;;  %v6176_v8 = vld [vmem:[#allocation7 + $0x258] sm:$0xf0] }
 0x1a9   : > { %2920 = vmatpush.bf16.msrb.mxu0 %v5887_v25  ;;  %2934 = vmatpush.bf16.msrb.mxu1 %v6015_v26  ;;  %v6352_v25 = vld [vmem:[#allocation7 + $0x3b8] sm:$0xf0]  ;;  %v2054_v51 = vpop.f32.mrf.mxu0  ;;  %v2068_v26 = vpop.f32.mrf.mxu1  ;;  %v7065_v9 = vld [vmem:[#allocation7 + $0x34c] sm:$0xf] }
 0x1aa   : > { %v7952_v30 = vadd.f32 %v2068_v26, %v2054_v51  ;;  %v6355_v13 = vor.u32 %v7077_v21, %v6352_v25  ;;  %v5888_v21 = vld [vmem:[#allocation7 + $0x18] sm:$0xf0]  ;;  %v6993_v25 = vld [vmem:[#allocation7 + $0x10c] sm:$0xf] }
 0x1ab   : > { %2947 = vmatpush.bf16.msrb.mxu2 %v6159_v49  ;;  %2961 = vmatpush.bf16.msrb.mxu3 %v6287_v32  ;;  %v6064_v49 = vld [vmem:[#allocation7 + $0x178] sm:$0xf0]  ;;  %v7041_v32 = vld [vmem:[#allocation7 + $0x28c] sm:$0xf] }
 0x1ac   : > { %2921 = vmatmul.bf16.vlgmr.msrb.gmra.mxu0 %v7834_v52  ;;  %2935 = vmatmul.bf16.vlgmr.msrb.gmra.mxu1 %v7838_v57  ;;  %v6067_v40 = vor.u32 %v7005_v45, %v6064_v49  ;;  %v6211_v62 = vor.u32 %v7041_v32, %v6208_v37  ;;  %v7029_v45 = vld [vmem:[#allocation7 + $0x22c] sm:$0xf]  ;;  %v6160_v32 = vld [vmem:[#allocation7 + $0x238] sm:$0xf0] }
 0x1ad   : > { %2969 = vmatpush.bf16.msra.mxu0 %v6003_v27  ;;  %2983 = vmatpush.bf16.msra.mxu1 %v6131_v3  ;;  %v6083_v27 = vor.u32 %v7009_v44, %v6080_v20  ;;  %v6973_v3 = vld [vmem:[#allocation7 + $0x6c] sm:$0xf]  ;;  %v2028_v58 = vpop.f32.mrf.mxu2  ;;  %v2042_v41 = vpop.f32.mrf.mxu3  ;;  %v5907_v20 = vor.u32 %v6965_v1, %v5904_v2  ;;  %v6163_v63 = vor.u32 %v7029_v45, %v6160_v32  ;;  %v7334_v45 = vld [vmem:[#allocation7 + $0xbac] sm:$0xf0] }
 0x1ae   : > { %v2029_v39 = vadd.f32 %v2028_v58, %v2015_v7  ;;  %v5939_v43 = vor.u32 %v6973_v3, %v5936_v28  ;;  %v6502_v3 = vld [vmem:[#allocation7 + $0x8e0] sm:$0xf]  ;;  %v7246_v28 = vld [vmem:[#allocation7 + $0x8ec] sm:$0xf0]  ;;  %v7061_v37 = vld [vmem:[#allocation7 + $0x32c] sm:$0xf] }
 0x1af   : > { %2948 = vmatpush.bf16.msrb.mxu2 %v6143_v47  ;;  %2962 = vmatpush.bf16.msrb.mxu3 %v6271_v50  ;;  %v6048_v47 = vld [vmem:[#allocation7 + $0x158] sm:$0xf0]  ;;  %v7037_v50 = vld [vmem:[#allocation7 + $0x26c] sm:$0xf] }
 0x1b0   : > { %v7954_v54 = vadd.f32 %v2042_v41, %v2029_v39  ;;  %v6195_v11 = vor.u32 %v7037_v50, %v6192_v55  ;;  %v6486_v39 = vld [vmem:[#allocation7 + $0x8c0] sm:$0xf]  ;;  %v6272_v50 = vld [vmem:[#allocation7 + $0x318] sm:$0xf0] }
 0x1b1   : > { %2970 = vmatpush.bf16.msra.mxu0 %v5987_v34  ;;  %2984 = vmatpush.bf16.msra.mxu1 %v6115_v14  ;;  %v6339_v34 = vor.u32 %v7073_v38, %v6336_v56  ;;  %v7001_v14 = vld [vmem:[#allocation7 + $0x14c] sm:$0xf]  ;;  %v2056_v61 = vpop.f32.mrf.mxu0  ;;  %v2070_v19 = vpop.f32.mrf.mxu1  ;;  %v6288_v38 = vld [vmem:[#allocation7 + $0x338] sm:$0xf0]  ;;  %v5891_v56 = vor.u32 %v6961_v22, %v5888_v21  ;;  %v6758_v55 = vld [vmem:[#allocation7 + $0xae0] sm:$0xf] }
 0x1b2   : > { %2949 = vmatmul.bf16.vlgmr.msrb.gmra.mxu2 %v7852_v12  ;;  %2963 = vmatmul.bf16.vlgmr.msrb.gmra.mxu3 %v7856_v29  ;;  %v7956_v7 = vadd.f32 %v2070_v19, %v2056_v61  ;;  %v6051_v24 = vor.u32 %v7001_v14, %v6048_v47  ;;  %v6291_v46 = vor.u32 %v7061_v37, %v6288_v38  ;;  %v6144_v14 = vld [vmem:[#allocation7 + $0x218] sm:$0xf0]  ;;  %v7057_v47 = vld [vmem:[#allocation7 + $0x30c] sm:$0xf]  ;;  %v6886_v61 = vld [vmem:[#allocation7 + $0xbe0] sm:$0xf] }
 0x1b3   : > { %2997 = vmatpush.bf16.msra.mxu2 %v6259_v59  ;;  %3011 = vmatpush.bf16.msra.mxu3 %v6387_v60  ;;  %v7069_v59 = vld [vmem:[#allocation7 + $0x36c] sm:$0xf]  ;;  %v6320_v60 = vld [vmem:[#allocation7 + $0x378] sm:$0xf0]  ;;  %v7342_v19 = vld [vmem:[#allocation7 + $0xbec] sm:$0xf0] }
 0x1b4   : > { %v6323_v23 = vor.u32 %v7069_v59, %v6320_v60  ;;  %v7310_v60 = vld [vmem:[#allocation7 + $0xaec] sm:$0xf0] }
 0x1b5   : > { %2971 = vmatpush.bf16.msra.mxu0 %v5971_v6  ;;  %2985 = vmatpush.bf16.msra.mxu1 %v6099_v0  ;;  %v6032_v6 = vld [vmem:[#allocation7 + $0x138] sm:$0xf0]  ;;  %v7033_v0 = vld [vmem:[#allocation7 + $0x24c] sm:$0xf]  ;;  %v2096_v44 = vpop.f32.mrf.mxu3 }
 0x1b6   : > { %v6035_v15 = vor.u32 %v6997_v5, %v6032_v6  ;;  %v6179_v26 = vor.u32 %v7033_v0, %v6176_v8  ;;  %v6470_v5 = vld [vmem:[#allocation7 + $0x8a0] sm:$0xf]  ;;  %v7238_v6 = vld [vmem:[#allocation7 + $0x8ac] sm:$0xf0]  ;;  %v6759_v8 = vor.u32 %v7310_v60, %v6758_v55 }
 0x1b7   : > { %2998 = vmatpush.bf16.msra.mxu2 %v6243_v16  ;;  %3012 = vmatpush.bf16.msra.mxu3 %v6371_v18  ;;  %v6304_v16 = vld [vmem:[#allocation7 + $0x358] sm:$0xf0]  ;;  %v2082_v18 = vpop.f32.mrf.mxu2  ;;  %v6471_v22 = vor.u32 %v7238_v6, %v6470_v5  ;;  %v6550_v55 = vld [vmem:[#allocation7 + $0x940] sm:$0xf]  ;;  %v7222_v6 = vld [vmem:[#allocation7 + $0x82c] sm:$0xf0] }
 0x1b8   : > { %v2083_v51 = vadd.f32 %v2082_v18, %v7952_v30  ;;  %v6503_v30 = vor.u32 %v7246_v28, %v6502_v3  ;;  %v7270_v18 = vld [vmem:[#allocation7 + $0x9ac] sm:$0xf0]  ;;  %v6694_v60 = vld [vmem:[#allocation7 + $0xa60] sm:$0xf] }
 0x1b9   : > { %2972 = vmatpush.bf16.msra.mxu0 %v5955_v48  ;;  %2986 = vmatpush.bf16.msra.mxu1 %v6083_v27  ;;  %v6307_v48 = vor.u32 %v7065_v9, %v6304_v16  ;;  %v6016_v27 = vld [vmem:[#allocation7 + $0x118] sm:$0xf0]  ;;  %v6887_v9 = vor.u32 %v7342_v19, %v6886_v61  ;;  %v6598_v16 = vld [vmem:[#allocation7 + $0x9a0] sm:$0xf] }
 0x1ba   : > { %v7959_v49 = vadd.f32 %v2096_v44, %v2083_v51  ;;  %v6019_v58 = vor.u32 %v6993_v25, %v6016_v27  ;;  %v7306_v44 = vld [vmem:[#allocation7 + $0xacc] sm:$0xf0]  ;;  %v6599_v21 = vor.u32 %v7270_v18, %v6598_v16  ;;  %v6454_v25 = vld [vmem:[#allocation7 + $0x880] sm:$0xf] }
 0x1bb   : > { %2999 = vmatpush.bf16.msra.mxu2 %v6227_v53  ;;  %3013 = vmatpush.bf16.msra.mxu3 %v6355_v13  ;;  %v6630_v53 = vld [vmem:[#allocation7 + $0x9e0] sm:$0xf]  ;;  %v7278_v13 = vld [vmem:[#allocation7 + $0x9ec] sm:$0xf0] }
 0x1bc   : > { %v6631_v41 = vor.u32 %v7278_v13, %v6630_v53  ;;  %v6726_v27 = vld [vmem:[#allocation7 + $0xaa0] sm:$0xf]  ;;  %v7302_v53 = vld [vmem:[#allocation7 + $0xaac] sm:$0xf0] }
 0x1bd   : > { %2973 = vmatpush.bf16.msra.mxu0 %v5939_v43  ;;  %2987 = vmatpush.bf16.msra.mxu1 %v6067_v40  ;;  %v7242_v43 = vld [vmem:[#allocation7 + $0x8cc] sm:$0xf0]  ;;  %v6614_v40 = vld [vmem:[#allocation7 + $0x9c0] sm:$0xf]  ;;  %v2098_v2 = vpop.f32.mrf.mxu3 }
 0x1be   : > { %v6854_v13 = vld [vmem:[#allocation7 + $0xba0] sm:$0xf]  ;;  %v7254_v18 = vld [vmem:[#allocation7 + $0x92c] sm:$0xf0] }
 0x1bf   : > { %3000 = vmatpush.bf16.msra.mxu2 %v6211_v62  ;;  %3014 = vmatpush.bf16.msra.mxu3 %v6339_v34  ;;  %v7274_v62 = vld [vmem:[#allocation7 + $0x9cc] sm:$0xf0]  ;;  %v7025_v34 = vld [vmem:[#allocation7 + $0x20c] sm:$0xf]  ;;  %v2084_v59 = vpop.f32.mrf.mxu2  ;;  %v6406_v5 = vld [vmem:[#allocation7 + $0x820] sm:$0xf] }
 0x1c0   : > { %v6615_v1 = vor.u32 %v7274_v62, %v6614_v40  ;;  %v6710_v40 = vld [vmem:[#allocation7 + $0xa80] sm:$0xf]  ;;  %v7330_v62 = vld [vmem:[#allocation7 + $0xb8c] sm:$0xf0] }
 0x1c1   : > { %2974 = vmatpush.bf16.msra.mxu0 %v5923_v35  ;;  %2988 = vmatpush.bf16.msra.mxu1 %v6051_v24  ;;  %v2085_v35 = vadd.f32 %v2084_v59, %v7956_v7  ;;  %v6487_v24 = vor.u32 %v7242_v43, %v6486_v39  ;;  %v6742_v7 = vld [vmem:[#allocation7 + $0xac0] sm:$0xf]  ;;  %v7262_v43 = vld [vmem:[#allocation7 + $0x96c] sm:$0xf0] }
 0x1c2   : > { %v6566_v39 = vld [vmem:[#allocation7 + $0x960] sm:$0xf]  ;;  %v7258_v59 = vld [vmem:[#allocation7 + $0x94c] sm:$0xf0] }
 0x1c3   : > { %3001 = vmatpush.bf16.msra.mxu2 %v6195_v11  ;;  %3015 = vmatpush.bf16.msra.mxu3 %v6323_v23  ;;  %v6147_v11 = vor.u32 %v7025_v34, %v6144_v14  ;;  %v6275_v23 = vor.u32 %v7057_v47, %v6272_v50  ;;  %v7964_v0 = vadd.f32 %v2098_v2, %v2085_v35  ;;  %v6422_v34 = vld [vmem:[#allocation7 + $0x840] sm:$0xf]  ;;  %v7226_v14 = vld [vmem:[#allocation7 + $0x84c] sm:$0xf0] }
 0x1c4   : > { %v7294_v35 = vld [vmem:[#allocation7 + $0xa6c] sm:$0xf0]  ;;  %v6534_v16 = vld [vmem:[#allocation7 + $0x920] sm:$0xf] }
 0x1c5   : > { %2975 = vmatpush.bf16.msra.mxu0 %v5907_v20  ;;  %2989 = vmatpush.bf16.msra.mxu1 %v6035_v15  ;;  %v6870_v20 = vld [vmem:[#allocation7 + $0xbc0] sm:$0xf]  ;;  %v7338_v15 = vld [vmem:[#allocation7 + $0xbcc] sm:$0xf0] }
 0x1c6   : > { %v6871_v51 = vor.u32 %v7338_v15, %v6870_v20  ;;  %v7290_v15 = vld [vmem:[#allocation7 + $0xa4c] sm:$0xf0] }
 0x1c7   : > { %3002 = vmatpush.bf16.msra.mxu2 %v6179_v26  ;;  %3016 = vmatpush.bf16.msra.mxu3 %v6307_v48  ;;  %v6582_v26 = vld [vmem:[#allocation7 + $0x980] sm:$0xf]  ;;  %v7266_v48 = vld [vmem:[#allocation7 + $0x98c] sm:$0xf0] }
 0x1c8   : > { %v6583_v38 = vor.u32 %v7266_v48, %v6582_v26  ;;  %v7218_v26 = vld [vmem:[#allocation7 + $0x80c] sm:$0xf0]  ;;  %v6518_v48 = vld [vmem:[#allocation7 + $0x900] sm:$0xf] }
 0x1c9   : > { %2976 = vmatpush.bf16.msra.mxu0 %v5891_v56  ;;  %2990 = vmatpush.bf16.msra.mxu1 %v6019_v58  ;;  %v2110_v3 = vpop.f32.mrf.mxu0  ;;  %v2124_v28 = vpop.f32.mrf.mxu1  ;;  %v6438_v56 = vld [vmem:[#allocation7 + $0x860] sm:$0xf]  ;;  %v7230_v58 = vld [vmem:[#allocation7 + $0x86c] sm:$0xf0] }
 0x1ca   : > { %v2125_v32 = vadd.f32 %v2124_v28, %v2110_v3 }
 0x1cb   : > { %3003 = vmatpush.bf16.msra.mxu2 %v6163_v63  ;;  %3017 = vmatpush.bf16.msra.mxu3 %v6291_v46  ;;  %v7298_v63 = vld [vmem:[#allocation7 + $0xa8c] sm:$0xf0]  ;;  %v6838_v46 = vld [vmem:[#allocation7 + $0xb80] sm:$0xf] }
 0x1cc   : > { %2977 = vmatmul.bf16.vlgmr.msra.gmra.mxu0 %v7834_v52  ;;  %2991 = vmatmul.bf16.vlgmr.msra.gmra.mxu1 %v7838_v57  ;;  %v7234_v52 = vld [vmem:[#allocation7 + $0x88c] sm:$0xf0]  ;;  %v6743_v57 = vor.u32 %v7306_v44, %v6742_v7  ;;  %v6711_v47 = vor.u32 %v7298_v63, %v6710_v40  ;;  %v6839_v50 = vor.u32 %v7330_v62, %v6838_v46  ;;  %v6678_v7 = vld [vmem:[#allocation7 + $0xa40] sm:$0xf]  ;;  %v7240_v63 = vld [vmem:[#allocation7 + $0x8c4] sm:$0xf] }
 0x1cd   : > { %3822 = vmatpush.bf16.msrb.mxu0 %v6503_v30  ;;  %3836 = vmatpush.bf16.msrb.mxu1 %v6631_v41  ;;  %v6455_v37 = vor.u32 %v7234_v52, %v6454_v25  ;;  %v6727_v30 = vor.u32 %v7302_v53, %v6726_v27  ;;  %v6855_v41 = vor.u32 %v7334_v45, %v6854_v13  ;;  %v7250_v53 = vld [vmem:[#allocation7 + $0x90c] sm:$0xf0]  ;;  %v7244_v13 = vld [vmem:[#allocation7 + $0x8e4] sm:$0xf]  ;;  %v6504_v45 = vld [vmem:[#allocation7 + $0x8f0] sm:$0xf0] }
 0x1ce   : > { %v6407_v52 = vor.u32 %v7222_v6, %v6406_v5  ;;  %v6679_v3 = vor.u32 %v7290_v15, %v6678_v7  ;;  %v6488_v46 = vld [vmem:[#allocation7 + $0x8d0] sm:$0xf0]  ;;  %v7272_v62 = vld [vmem:[#allocation7 + $0x9c4] sm:$0xf] }
 0x1cf   : > { %3004 = vmatpush.bf16.msra.mxu2 %v6147_v11  ;;  %3018 = vmatpush.bf16.msra.mxu3 %v6275_v23  ;;  %v6423_v11 = vor.u32 %v7226_v14, %v6422_v34  ;;  %v6551_v23 = vor.u32 %v7258_v59, %v6550_v55  ;;  %v6616_v14 = vld [vmem:[#allocation7 + $0x9d0] sm:$0xf0]  ;;  %v6774_v59 = vld [vmem:[#allocation7 + $0xb00] sm:$0xf]  ;;  %v7268_v7 = vld [vmem:[#allocation7 + $0x9a4] sm:$0xf] }
 0x1d0   : > { %v6619_v5 = vor.u32 %v7272_v62, %v6616_v14  ;;  %v6744_v15 = vld [vmem:[#allocation7 + $0xad0] sm:$0xf0] }
 0x1d1   : > { %3823 = vmatpush.bf16.msrb.mxu0 %v6487_v24  ;;  %3837 = vmatpush.bf16.msrb.mxu1 %v6615_v1  ;;  %v2112_v61 = vpop.f32.mrf.mxu0  ;;  %v2126_v19 = vpop.f32.mrf.mxu1  ;;  %v6822_v24 = vld [vmem:[#allocation7 + $0xb60] sm:$0xf]  ;;  %v7326_v1 = vld [vmem:[#allocation7 + $0xb6c] sm:$0xf0]  ;;  %v6568_v62 = vld [vmem:[#allocation7 + $0x970] sm:$0xf0] }
 0x1d2   : > { %3005 = vmatmul.bf16.vlgmr.msra.gmra.mxu2 %v7852_v12  ;;  %3019 = vmatmul.bf16.vlgmr.msra.gmra.mxu3 %v7856_v29  ;;  %v6439_v12 = vor.u32 %v7230_v58, %v6438_v56  ;;  %v6567_v29 = vor.u32 %v7262_v43, %v6566_v39  ;;  %v2127_v2 = vadd.f32 %v2126_v19, %v2112_v61  ;;  %v6662_v56 = vld [vmem:[#allocation7 + $0xa20] sm:$0xf]  ;;  %v7308_v61 = vld [vmem:[#allocation7 + $0xae4] sm:$0xf]  ;;  %v6840_v14 = vld [vmem:[#allocation7 + $0xb90] sm:$0xf0] }
 0x1d3   : > { %3850 = vmatpush.bf16.msrb.mxu2 %v6759_v8  ;;  %3864 = vmatpush.bf16.msrb.mxu3 %v6887_v9  ;;  %v6695_v8 = vor.u32 %v7294_v35, %v6694_v60  ;;  %v6823_v9 = vor.u32 %v7326_v1, %v6822_v24  ;;  %v6790_v58 = vld [vmem:[#allocation7 + $0xb20] sm:$0xf]  ;;  %v6519_v39 = vor.u32 %v7250_v53, %v6518_v48  ;;  %v7314_v60 = vld [vmem:[#allocation7 + $0xb0c] sm:$0xf0]  ;;  %v6760_v35 = vld [vmem:[#allocation7 + $0xaf0] sm:$0xf0] }
 0x1d4   : > { %v6507_v43 = vor.u32 %v7244_v13, %v6504_v45  ;;  %v7340_v24 = vld [vmem:[#allocation7 + $0xbe4] sm:$0xf]  ;;  %v6888_v1 = vld [vmem:[#allocation7 + $0xbf0] sm:$0xf0] }
 0x1d5   : > { %3824 = vmatpush.bf16.msrb.mxu0 %v6471_v22  ;;  %3838 = vmatpush.bf16.msrb.mxu1 %v6599_v21  ;;  %v2138_v44 = vpop.f32.mrf.mxu2  ;;  %v2152_v20 = vpop.f32.mrf.mxu3  ;;  %v6806_v22 = vld [vmem:[#allocation7 + $0xb40] sm:$0xf]  ;;  %v7322_v21 = vld [vmem:[#allocation7 + $0xb4c] sm:$0xf0]  ;;  %v7300_v53 = vld [vmem:[#allocation7 + $0xaa4] sm:$0xf] }
 0x1d6   : > { %v2139_v25 = vadd.f32 %v2138_v44, %v2125_v32  ;;  %v6807_v28 = vor.u32 %v7322_v21, %v6806_v22  ;;  %v7286_v32 = vld [vmem:[#allocation7 + $0xa2c] sm:$0xf0]  ;;  %v6600_v44 = vld [vmem:[#allocation7 + $0x9b0] sm:$0xf0]  ;;  %v7336_v22 = vld [vmem:[#allocation7 + $0xbc4] sm:$0xf] }
 0x1d7   : > { %3851 = vmatpush.bf16.msrb.mxu2 %v6743_v57  ;;  %3865 = vmatpush.bf16.msrb.mxu3 %v6871_v51  ;;  %v6535_v57 = vor.u32 %v7254_v18, %v6534_v16  ;;  %v6390_v51 = vld [vmem:[#allocation7 + $0x800] sm:$0xf]  ;;  %v6763_v16 = vor.u32 %v7308_v61, %v6760_v35  ;;  %v6891_v18 = vor.u32 %v7340_v24, %v6888_v1  ;;  %v6872_v21 = vld [vmem:[#allocation7 + $0xbd0] sm:$0xf0]  ;;  %v7256_v61 = vld [vmem:[#allocation7 + $0x944] sm:$0xf] }
 0x1d8   : > { %v7968_v27 = vadd.f32 %v2152_v20, %v2139_v25  ;;  %v7304_v20 = vld [vmem:[#allocation7 + $0xac4] sm:$0xf]  ;;  %v6875_v48 = vor.u32 %v7336_v22, %v6872_v21  ;;  %v6696_v1 = vld [vmem:[#allocation7 + $0xa70] sm:$0xf0] }
 0x1d9   : > { %3825 = vmatpush.bf16.msrb.mxu0 %v6455_v37  ;;  %3839 = vmatpush.bf16.msrb.mxu1 %v6583_v38  ;;  %v7276_v37 = vld [vmem:[#allocation7 + $0x9e4] sm:$0xf]  ;;  %v6632_v38 = vld [vmem:[#allocation7 + $0x9f0] sm:$0xf0] }
 0x1da   : > { %v6635_v40 = vor.u32 %v7276_v37, %v6632_v38  ;;  %v6728_v37 = vld [vmem:[#allocation7 + $0xab0] sm:$0xf0]  ;;  %v7332_v38 = vld [vmem:[#allocation7 + $0xba4] sm:$0xf] }
 0x1db   : > { %3852 = vmatpush.bf16.msrb.mxu2 %v6727_v30  ;;  %3866 = vmatpush.bf16.msrb.mxu3 %v6855_v41  ;;  %v7318_v30 = vld [vmem:[#allocation7 + $0xb2c] sm:$0xf0]  ;;  %v6391_v41 = vor.u32 %v7218_v26, %v6390_v51  ;;  %v6456_v51 = vld [vmem:[#allocation7 + $0x890] sm:$0xf0]  ;;  %v6747_v26 = vor.u32 %v7304_v20, %v6744_v15  ;;  %v7292_v35 = vld [vmem:[#allocation7 + $0xa64] sm:$0xf] }
 0x1dc   : > { %v7252_v15 = vld [vmem:[#allocation7 + $0x924] sm:$0xf]  ;;  %v6536_v22 = vld [vmem:[#allocation7 + $0x930] sm:$0xf0] }
 0x1dd   : > { %3826 = vmatpush.bf16.msrb.mxu0 %v6439_v12  ;;  %3840 = vmatpush.bf16.msrb.mxu1 %v6567_v29  ;;  %v6663_v12 = vor.u32 %v7286_v32, %v6662_v56  ;;  %v6791_v29 = vor.u32 %v7318_v30, %v6790_v58  ;;  %v2140_v34 = vpop.f32.mrf.mxu2  ;;  %v2154_v19 = vpop.f32.mrf.mxu3  ;;  %v6856_v56 = vld [vmem:[#allocation7 + $0xbb0] sm:$0xf0]  ;;  %v7288_v21 = vld [vmem:[#allocation7 + $0xa44] sm:$0xf] }
 0x1de   : > { %v2141_v55 = vadd.f32 %v2140_v34, %v2127_v2  ;;  %v7236_v2 = vld [vmem:[#allocation7 + $0x8a4] sm:$0xf] }
 0x1df   : > { %3853 = vmatpush.bf16.msrb.mxu2 %v6711_v47  ;;  %3867 = vmatpush.bf16.msrb.mxu3 %v6839_v50  ;;  %v6646_v47 = vld [vmem:[#allocation7 + $0xa00] sm:$0xf]  ;;  %v7282_v50 = vld [vmem:[#allocation7 + $0xa0c] sm:$0xf0]  ;;  %v7328_v34 = vld [vmem:[#allocation7 + $0xb84] sm:$0xf] }
 0x1e0   : > { %v6647_v6 = vor.u32 %v7282_v50, %v6646_v47  ;;  %v7224_v50 = vld [vmem:[#allocation7 + $0x844] sm:$0xf] }
 0x1e1   : > { %3827 = vmatpush.bf16.msrb.mxu0 %v6423_v11  ;;  %3841 = vmatpush.bf16.msrb.mxu1 %v6551_v23  ;;  %v7970_v11 = vadd.f32 %v2154_v19, %v2141_v55  ;;  %v6491_v23 = vor.u32 %v7240_v63, %v6488_v46  ;;  %v6859_v63 = vor.u32 %v7332_v38, %v6856_v56  ;;  %v7260_v46 = vld [vmem:[#allocation7 + $0x964] sm:$0xf]  ;;  %v6424_v55 = vld [vmem:[#allocation7 + $0x850] sm:$0xf0] }
 0x1e2   : > { %v6571_v47 = vor.u32 %v7260_v46, %v6568_v62  ;;  %v6552_v19 = vld [vmem:[#allocation7 + $0x950] sm:$0xf0] }
 0x1e3   : > { %3854 = vmatpush.bf16.msrb.mxu2 %v6695_v8  ;;  %3868 = vmatpush.bf16.msrb.mxu3 %v6823_v9  ;;  %v6775_v8 = vor.u32 %v7314_v60, %v6774_v59  ;;  %v6472_v9 = vld [vmem:[#allocation7 + $0x8b0] sm:$0xf0]  ;;  %v6843_v60 = vor.u32 %v7328_v34, %v6840_v14  ;;  %v6494_v34 = vld [vmem:[#allocation7 + $0x8c8] sm:$0xf]  ;;  %v7243_v14 = vld [vmem:[#allocation7 + $0x8d4] sm:$0xf0] }
 0x1e4   : > { %v6475_v25 = vor.u32 %v7236_v2, %v6472_v9  ;;  %v6427_v2 = vor.u32 %v7224_v50, %v6424_v55  ;;  %v6555_v9 = vor.u32 %v7256_v61, %v6552_v19  ;;  %v6520_v56 = vld [vmem:[#allocation7 + $0x910] sm:$0xf0] }
 0x1e5   : > { %3828 = vmatpush.bf16.msrb.mxu0 %v6407_v52  ;;  %3842 = vmatpush.bf16.msrb.mxu1 %v6535_v57  ;;  %v6603_v52 = vor.u32 %v7268_v7, %v6600_v44  ;;  %v7232_v57 = vld [vmem:[#allocation7 + $0x884] sm:$0xf]  ;;  %v6699_v44 = vor.u32 %v7292_v35, %v6696_v1  ;;  %v6648_v61 = vld [vmem:[#allocation7 + $0xa10] sm:$0xf0]  ;;  %v6766_v1 = vld [vmem:[#allocation7 + $0xae8] sm:$0xf] }
 0x1e6   : > { %v6459_v58 = vor.u32 %v7232_v57, %v6456_v51  ;;  %v6680_v57 = vld [vmem:[#allocation7 + $0xa50] sm:$0xf0]  ;;  %v7320_v51 = vld [vmem:[#allocation7 + $0xb44] sm:$0xf] }
 0x1e7   : > { %3855 = vmatpush.bf16.msrb.mxu2 %v6679_v3  ;;  %3869 = vmatpush.bf16.msrb.mxu3 %v6807_v28  ;;  %v7264_v3 = vld [vmem:[#allocation7 + $0x984] sm:$0xf]  ;;  %v6584_v28 = vld [vmem:[#allocation7 + $0x990] sm:$0xf0] }
 0x1e8   : > { %v6587_v30 = vor.u32 %v7264_v3, %v6584_v28  ;;  %v6539_v3 = vor.u32 %v7252_v15, %v6536_v22  ;;  %v7216_v28 = vld [vmem:[#allocation7 + $0x804] sm:$0xf] }
 0x1e9   : > { %3829 = vmatpush.bf16.msrb.mxu0 %v6391_v41  ;;  %3843 = vmatpush.bf16.msrb.mxu1 %v6519_v39  ;;  %v2810_v13 = vpop.f32.mrf.mxu0  ;;  %v2824_v45 = vpop.f32.mrf.mxu1  ;;  %v7228_v41 = vld [vmem:[#allocation7 + $0x864] sm:$0xf]  ;;  %v6440_v39 = vld [vmem:[#allocation7 + $0x870] sm:$0xf0] }
 0x1ea   : > { %v2811_v32 = vadd.f32 %v2810_v13, %v7938_v36  ;;  %v6443_v36 = vor.u32 %v7228_v41, %v6440_v39  ;;  %v7248_v13 = vld [vmem:[#allocation7 + $0x904] sm:$0xf]  ;;  %v7279_v41 = vld [vmem:[#allocation7 + $0x9f4] sm:$0xf0] }
 0x1eb   : > { %3856 = vmatpush.bf16.msrb.mxu2 %v6663_v12  ;;  %3870 = vmatpush.bf16.msrb.mxu3 %v6791_v29  ;;  %v7296_v12 = vld [vmem:[#allocation7 + $0xa84] sm:$0xf]  ;;  %v6712_v29 = vld [vmem:[#allocation7 + $0xa90] sm:$0xf0]  ;;  %v6523_v62 = vor.u32 %v7248_v13, %v6520_v56  ;;  %v6734_v56 = vld [vmem:[#allocation7 + $0xaa8] sm:$0xf] }
 0x1ec   : > { %3830 = vmatmul.bf16.vlgmr.msrb.gmra.mxu0 %v7906_v31  ;;  %3844 = vmatmul.bf16.vlgmr.msrb.gmra.mxu1 %v7909_v17  ;;  %v6715_v59 = vor.u32 %v7296_v12, %v6712_v29  ;;  %v7284_v39 = vld [vmem:[#allocation7 + $0xa24] sm:$0xf] }
 0x1ed   : > { %3878 = vmatpush.bf16.msra.mxu0 %v6507_v43  ;;  %3892 = vmatpush.bf16.msra.mxu1 %v6635_v40  ;;  %v2825_v43 = vadd.f32 %v2824_v45, %v2811_v32  ;;  %v6731_v40 = vor.u32 %v7300_v53, %v6728_v37  ;;  %v6392_v53 = vld [vmem:[#allocation7 + $0x810] sm:$0xf0]  ;;  %v6683_v37 = vor.u32 %v7288_v21, %v6680_v57  ;;  %v6510_v32 = vld [vmem:[#allocation7 + $0x8e8] sm:$0xf]  ;;  %v7312_v35 = vld [vmem:[#allocation7 + $0xb04] sm:$0xf] }
 0x1ee   : > { %v6395_v46 = vor.u32 %v7216_v28, %v6392_v53  ;;  %v6606_v21 = vld [vmem:[#allocation7 + $0x9a8] sm:$0xf]  ;;  %v7307_v57 = vld [vmem:[#allocation7 + $0xad4] sm:$0xf0] }
 0x1ef   : > { %3857 = vmatpush.bf16.msrb.mxu2 %v6647_v6  ;;  %3871 = vmatpush.bf16.msrb.mxu3 %v6775_v8  ;;  %v7235_v28 = vld [vmem:[#allocation7 + $0x894] sm:$0xf0] }
 0x1f1   : > { %3879 = vmatpush.bf16.msra.mxu0 %v6491_v23  ;;  %3893 = vmatpush.bf16.msra.mxu1 %v6619_v5  ;;  %v2812_v24 = vpop.f32.mrf.mxu0  ;;  %v7324_v23 = vld [vmem:[#allocation7 + $0xb64] sm:$0xf]  ;;  %v6824_v5 = vld [vmem:[#allocation7 + $0xb70] sm:$0xf0]  ;;  %v2826_v8 = vpop.f32.mrf.mxu1 }
 0x1f2   : > { %3858 = vmatmul.bf16.vlgmr.msrb.gmra.mxu2 %v7913_v42  ;;  %3872 = vmatmul.bf16.vlgmr.msrb.gmra.mxu3 %v7916_v10  ;;  %v2813_v6 = vadd.f32 %v2812_v24, %v7943_v4  ;;  %v6827_v20 = vor.u32 %v7324_v23, %v6824_v5  ;;  %v6808_v4 = vld [vmem:[#allocation7 + $0xb50] sm:$0xf0]  ;;  %v7311_v5 = vld [vmem:[#allocation7 + $0xaf4] sm:$0xf0] }
 0x1f3   : > { %3906 = vmatpush.bf16.msra.mxu2 %v6763_v16  ;;  %3920 = vmatpush.bf16.msra.mxu3 %v6891_v18  ;;  %v7220_v16 = vld [vmem:[#allocation7 + $0x824] sm:$0xf]  ;;  %v6408_v18 = vld [vmem:[#allocation7 + $0x830] sm:$0xf0]  ;;  %v6811_v38 = vor.u32 %v7320_v51, %v6808_v4  ;;  %v6767_v15 = vor.u32 %v7311_v5, %v6766_v1  ;;  %v6878_v51 = vld [vmem:[#allocation7 + $0xbc8] sm:$0xf] }
 0x1f4   : > { %v2827_v7 = vadd.f32 %v2826_v8, %v2813_v6  ;;  %v6776_v24 = vld [vmem:[#allocation7 + $0xb10] sm:$0xf0]  ;;  %v6894_v6 = vld [vmem:[#allocation7 + $0xbe8] sm:$0xf]  ;;  %v7343_v8 = vld [vmem:[#allocation7 + $0xbf4] sm:$0xf0] }
 0x1f5   : > { %3880 = vmatpush.bf16.msra.mxu0 %v6475_v25  ;;  %3894 = vmatpush.bf16.msra.mxu1 %v6603_v52  ;;  %v2838_v25 = vpop.f32.mrf.mxu2  ;;  %v2852_v52 = vpop.f32.mrf.mxu3  ;;  %v6895_v22 = vor.u32 %v7343_v8, %v6894_v6  ;;  %v7339_v4 = vld [vmem:[#allocation7 + $0xbd4] sm:$0xf0]  ;;  %v6558_v1 = vld [vmem:[#allocation7 + $0x948] sm:$0xf] }
 0x1f6   : > { %v6879_v13 = vor.u32 %v7339_v4, %v6878_v51  ;;  %v6702_v5 = vld [vmem:[#allocation7 + $0xa68] sm:$0xf]  ;;  %v7295_v8 = vld [vmem:[#allocation7 + $0xa74] sm:$0xf0] }
 0x1f7   : > { %3907 = vmatpush.bf16.msra.mxu2 %v6747_v26  ;;  %3921 = vmatpush.bf16.msra.mxu3 %v6875_v48  ;;  %v2839_v26 = vadd.f32 %v2838_v25, %v2825_v43  ;;  %v6411_v48 = vor.u32 %v7220_v16, %v6408_v18  ;;  %v6664_v43 = vld [vmem:[#allocation7 + $0xa30] sm:$0xf0]  ;;  %v7271_v25 = vld [vmem:[#allocation7 + $0x9b4] sm:$0xf0]  ;;  %v6686_v4 = vld [vmem:[#allocation7 + $0xa48] sm:$0xf] }
 0x1f8   : > { %v7255_v51 = vld [vmem:[#allocation7 + $0x934] sm:$0xf0] }
 0x1f9   : > { %3881 = vmatpush.bf16.msra.mxu0 %v6459_v58  ;;  %3895 = vmatpush.bf16.msra.mxu1 %v6587_v30  ;;  %v7978_v45 = vadd.f32 %v2852_v52, %v2839_v26  ;;  %v7247_v58 = vld [vmem:[#allocation7 + $0x8f4] sm:$0xf0]  ;;  %v6638_v30 = vld [vmem:[#allocation7 + $0x9e8] sm:$0xf] }
 0x1fa   : > { %v6511_v12 = vor.u32 %v7247_v58, %v6510_v32  ;;  %v6639_v29 = vor.u32 %v7279_v41, %v6638_v30  ;;  %v6750_v52 = vld [vmem:[#allocation7 + $0xac8] sm:$0xf]  ;;  %v7303_v30 = vld [vmem:[#allocation7 + $0xab4] sm:$0xf0] }
 0x1fb   : > { %3908 = vmatpush.bf16.msra.mxu2 %v6731_v40  ;;  %3922 = vmatpush.bf16.msra.mxu3 %v6859_v63  ;;  %v7316_v40 = vld [vmem:[#allocation7 + $0xb24] sm:$0xf]  ;;  %v6792_v63 = vld [vmem:[#allocation7 + $0xb30] sm:$0xf0]  ;;  %v6751_v53 = vor.u32 %v7307_v57, %v6750_v52  ;;  %v6862_v41 = vld [vmem:[#allocation7 + $0xba8] sm:$0xf] }
 0x1fc   : > { %v6795_v50 = vor.u32 %v7316_v40, %v6792_v63  ;;  %v6542_v57 = vld [vmem:[#allocation7 + $0x928] sm:$0xf] }
 0x1fd   : > { %3882 = vmatpush.bf16.msra.mxu0 %v6443_v36  ;;  %3896 = vmatpush.bf16.msra.mxu1 %v6571_v47  ;;  %v6622_v36 = vld [vmem:[#allocation7 + $0x9c8] sm:$0xf]  ;;  %v6667_v47 = vor.u32 %v7284_v39, %v6664_v43  ;;  %v2840_v55 = vpop.f32.mrf.mxu2  ;;  %v2854_v23 = vpop.f32.mrf.mxu3  ;;  %v7335_v39 = vld [vmem:[#allocation7 + $0xbb4] sm:$0xf0] }
 0x1fe   : > { %v2841_v19 = vadd.f32 %v2840_v55, %v2827_v7  ;;  %v6478_v7 = vld [vmem:[#allocation7 + $0x8a8] sm:$0xf] }
 0x1ff   : > { %3909 = vmatpush.bf16.msra.mxu2 %v6715_v59  ;;  %3923 = vmatpush.bf16.msra.mxu3 %v6843_v60  ;;  %v7275_v59 = vld [vmem:[#allocation7 + $0x9d4] sm:$0xf0]  ;;  %v7280_v60 = vld [vmem:[#allocation7 + $0xa04] sm:$0xf]  ;;  %v6846_v55 = vld [vmem:[#allocation7 + $0xb88] sm:$0xf] }
 0x200   : > { %v6623_v16 = vor.u32 %v7275_v59, %v6622_v36  ;;  %v6651_v18 = vor.u32 %v7280_v60, %v6648_v61  ;;  %v7263_v36 = vld [vmem:[#allocation7 + $0x974] sm:$0xf0]  ;;  %v6430_v61 = vld [vmem:[#allocation7 + $0x848] sm:$0xf] }
 0x201   : > { %3883 = vmatpush.bf16.msra.mxu0 %v6427_v2  ;;  %3897 = vmatpush.bf16.msra.mxu1 %v6555_v9  ;;  %v7980_v2 = vadd.f32 %v2854_v23, %v2841_v19  ;;  %v6495_v9 = vor.u32 %v7243_v14, %v6494_v34  ;;  %v6863_v34 = vor.u32 %v7335_v39, %v6862_v41  ;;  %v6574_v14 = vld [vmem:[#allocation7 + $0x968] sm:$0xf]  ;;  %v7331_v59 = vld [vmem:[#allocation7 + $0xb94] sm:$0xf0] }
 0x202   : > { %v6575_v60 = vor.u32 %v7263_v36, %v6574_v14  ;;  %v7227_v19 = vld [vmem:[#allocation7 + $0x854] sm:$0xf0] }
 0x203   : > { %3910 = vmatpush.bf16.msra.mxu2 %v6699_v44  ;;  %3924 = vmatpush.bf16.msra.mxu3 %v6827_v20  ;;  %v6779_v44 = vor.u32 %v7312_v35, %v6776_v24  ;;  %v7239_v20 = vld [vmem:[#allocation7 + $0x8b4] sm:$0xf0]  ;;  %v6847_v24 = vor.u32 %v7331_v59, %v6846_v55  ;;  %v7241_v55 = vld [vmem:[#allocation7 + $0x8cc] sm:$0xf]  ;;  %v6496_v59 = vld [vmem:[#allocation7 + $0x8d8] sm:$0xf0] }
 0x204   : > { %v6479_v26 = vor.u32 %v7239_v20, %v6478_v7  ;;  %v7259_v23 = vld [vmem:[#allocation7 + $0x954] sm:$0xf0]  ;;  %v6431_v7 = vor.u32 %v7227_v19, %v6430_v61 }
 0x205   : > { %3884 = vmatpush.bf16.msra.mxu0 %v6411_v48  ;;  %3898 = vmatpush.bf16.msra.mxu1 %v6539_v3  ;;  %v6607_v48 = vor.u32 %v7271_v25, %v6606_v21  ;;  %v6462_v3 = vld [vmem:[#allocation7 + $0x888] sm:$0xf]  ;;  %v6559_v20 = vor.u32 %v7259_v23, %v6558_v1  ;;  %v6703_v25 = vor.u32 %v7295_v8, %v6702_v5  ;;  %v7251_v39 = vld [vmem:[#allocation7 + $0x914] sm:$0xf0]  ;;  %v7309_v8 = vld [vmem:[#allocation7 + $0xaec] sm:$0xf] }
 0x206   : > { %v6463_v40 = vor.u32 %v7235_v28, %v6462_v3  ;;  %v7291_v3 = vld [vmem:[#allocation7 + $0xa54] sm:$0xf0]  ;;  %v6814_v28 = vld [vmem:[#allocation7 + $0xb48] sm:$0xf] }
 0x207   : > { %3911 = vmatpush.bf16.msra.mxu2 %v6683_v37  ;;  %3925 = vmatpush.bf16.msra.mxu3 %v6811_v38  ;;  %v6590_v37 = vld [vmem:[#allocation7 + $0x988] sm:$0xf]  ;;  %v7267_v38 = vld [vmem:[#allocation7 + $0x994] sm:$0xf0] }
 0x208   : > { %v6591_v63 = vor.u32 %v7267_v38, %v6590_v37  ;;  %v6543_v37 = vor.u32 %v7255_v51, %v6542_v57  ;;  %v6398_v38 = vld [vmem:[#allocation7 + $0x808] sm:$0xf]  ;;  %v7283_v1 = vld [vmem:[#allocation7 + $0xa14] sm:$0xf0] }
 0x209   : > { %3885 = vmatpush.bf16.msra.mxu0 %v6395_v46  ;;  %3899 = vmatpush.bf16.msra.mxu1 %v6523_v62  ;;  %v2866_v32 = vpop.f32.mrf.mxu0  ;;  %v2880_v58 = vpop.f32.mrf.mxu1  ;;  %v6446_v46 = vld [vmem:[#allocation7 + $0x868] sm:$0xf]  ;;  %v7231_v62 = vld [vmem:[#allocation7 + $0x874] sm:$0xf0] }
 0x20a   : > { %v2867_v43 = vadd.f32 %v2866_v32, %v7948_v33  ;;  %v6447_v33 = vor.u32 %v7231_v62, %v6446_v46  ;;  %v6526_v32 = vld [vmem:[#allocation7 + $0x908] sm:$0xf]  ;;  %v6640_v46 = vld [vmem:[#allocation7 + $0x9f8] sm:$0xf0] }
 0x20b   : > { %3912 = vmatpush.bf16.msra.mxu2 %v6667_v47  ;;  %3926 = vmatpush.bf16.msra.mxu3 %v6795_v50  ;;  %v6718_v47 = vld [vmem:[#allocation7 + $0xa88] sm:$0xf]  ;;  %v7299_v50 = vld [vmem:[#allocation7 + $0xa94] sm:$0xf0]  ;;  %v6527_v36 = vor.u32 %v7251_v39, %v6526_v32  ;;  %v7301_v39 = vld [vmem:[#allocation7 + $0xaac] sm:$0xf] }
 0x20c   : > { %3886 = vmatmul.bf16.vlgmr.msra.gmra.mxu0 %v7906_v31  ;;  %3900 = vmatmul.bf16.vlgmr.msra.gmra.mxu1 %v7909_v17  ;;  %v6719_v35 = vor.u32 %v7299_v50, %v6718_v47  ;;  %v6670_v62 = vld [vmem:[#allocation7 + $0xa28] sm:$0xf] }
 0x20d   : > { %3934 = vmatpush.bf16.msrb.mxu0 %v6511_v12  ;;  %3948 = vmatpush.bf16.msrb.mxu1 %v6639_v29  ;;  %v2881_v12 = vadd.f32 %v2880_v58, %v2867_v43  ;;  %v6735_v29 = vor.u32 %v7303_v30, %v6734_v56  ;;  %v7219_v56 = vld [vmem:[#allocation7 + $0x814] sm:$0xf0]  ;;  %v6687_v30 = vor.u32 %v7291_v3, %v6686_v4  ;;  %v7245_v43 = vld [vmem:[#allocation7 + $0x8ec] sm:$0xf]  ;;  %v6782_v5 = vld [vmem:[#allocation7 + $0xb08] sm:$0xf] }
 0x20e   : > { %v6399_v14 = vor.u32 %v7219_v56, %v6398_v38  ;;  %v7269_v4 = vld [vmem:[#allocation7 + $0x9ac] sm:$0xf]  ;;  %v6752_v3 = vld [vmem:[#allocation7 + $0xad8] sm:$0xf0] }
 0x20f   : > { %3913 = vmatpush.bf16.msra.mxu2 %v6651_v18  ;;  %3927 = vmatpush.bf16.msra.mxu3 %v6779_v44  ;;  %v6464_v38 = vld [vmem:[#allocation7 + $0x898] sm:$0xf0] }
 0x211   : > { %3935 = vmatpush.bf16.msrb.mxu0 %v6495_v9  ;;  %3949 = vmatpush.bf16.msrb.mxu1 %v6623_v16  ;;  %v2868_v6 = vpop.f32.mrf.mxu0  ;;  %v6830_v9 = vld [vmem:[#allocation7 + $0xb68] sm:$0xf]  ;;  %v7327_v16 = vld [vmem:[#allocation7 + $0xb74] sm:$0xf0]  ;;  %v2882_v44 = vpop.f32.mrf.mxu1 }
 0x212   : > { %3914 = vmatmul.bf16.vlgmr.msra.gmra.mxu2 %v7913_v42  ;;  %3928 = vmatmul.bf16.vlgmr.msra.gmra.mxu3 %v7916_v10  ;;  %v2869_v18 = vadd.f32 %v2868_v6, %v7954_v54  ;;  %v6831_v52 = vor.u32 %v7327_v16, %v6830_v9  ;;  %v7323_v54 = vld [vmem:[#allocation7 + $0xb54] sm:$0xf0]  ;;  %v6768_v16 = vld [vmem:[#allocation7 + $0xaf8] sm:$0xf0] }
 0x213   : > { %3962 = vmatpush.bf16.msrb.mxu2 %v6767_v15  ;;  %3976 = vmatpush.bf16.msrb.mxu3 %v6895_v22  ;;  %v6414_v15 = vld [vmem:[#allocation7 + $0x828] sm:$0xf]  ;;  %v7223_v22 = vld [vmem:[#allocation7 + $0x834] sm:$0xf0]  ;;  %v6815_v41 = vor.u32 %v7323_v54, %v6814_v28  ;;  %v6771_v57 = vor.u32 %v7309_v8, %v6768_v16  ;;  %v7337_v28 = vld [vmem:[#allocation7 + $0xbcc] sm:$0xf] }
 0x214   : > { %v2883_v21 = vadd.f32 %v2882_v44, %v2869_v18  ;;  %v7315_v6 = vld [vmem:[#allocation7 + $0xb14] sm:$0xf0]  ;;  %v7341_v18 = vld [vmem:[#allocation7 + $0xbec] sm:$0xf]  ;;  %v6896_v44 = vld [vmem:[#allocation7 + $0xbf8] sm:$0xf0] }
 0x215   : > { %3936 = vmatpush.bf16.msrb.mxu0 %v6479_v26  ;;  %3950 = vmatpush.bf16.msrb.mxu1 %v6607_v48  ;;  %v2894_v26 = vpop.f32.mrf.mxu2  ;;  %v2908_v48 = vpop.f32.mrf.mxu3  ;;  %v6899_v51 = vor.u32 %v7341_v18, %v6896_v44  ;;  %v6880_v54 = vld [vmem:[#allocation7 + $0xbd8] sm:$0xf0]  ;;  %v7257_v8 = vld [vmem:[#allocation7 + $0x94c] sm:$0xf] }
 0x216   : > { %v6883_v32 = vor.u32 %v7337_v28, %v6880_v54  ;;  %v7293_v16 = vld [vmem:[#allocation7 + $0xa6c] sm:$0xf]  ;;  %v6704_v44 = vld [vmem:[#allocation7 + $0xa78] sm:$0xf0] }
 0x217   : > { %3963 = vmatpush.bf16.msrb.mxu2 %v6751_v53  ;;  %3977 = vmatpush.bf16.msrb.mxu3 %v6879_v13  ;;  %v2895_v53 = vadd.f32 %v2894_v26, %v2881_v12  ;;  %v6415_v13 = vor.u32 %v7223_v22, %v6414_v15  ;;  %v7287_v12 = vld [vmem:[#allocation7 + $0xa34] sm:$0xf0]  ;;  %v6608_v26 = vld [vmem:[#allocation7 + $0x9b8] sm:$0xf0]  ;;  %v7289_v54 = vld [vmem:[#allocation7 + $0xa4c] sm:$0xf] }
 0x218   : > { %v6544_v28 = vld [vmem:[#allocation7 + $0x938] sm:$0xf0] }
 0x219   : > { %3937 = vmatpush.bf16.msrb.mxu0 %v6463_v40  ;;  %3951 = vmatpush.bf16.msrb.mxu1 %v6591_v63  ;;  %v7988_v58 = vadd.f32 %v2908_v48, %v2895_v53  ;;  %v6512_v40 = vld [vmem:[#allocation7 + $0x8f8] sm:$0xf0]  ;;  %v7277_v63 = vld [vmem:[#allocation7 + $0x9ec] sm:$0xf] }
 0x21a   : > { %v6515_v47 = vor.u32 %v7245_v43, %v6512_v40  ;;  %v6643_v50 = vor.u32 %v7277_v63, %v6640_v46  ;;  %v7305_v48 = vld [vmem:[#allocation7 + $0xacc] sm:$0xf]  ;;  %v6736_v63 = vld [vmem:[#allocation7 + $0xab8] sm:$0xf0] }
 0x21b   : > { %3964 = vmatpush.bf16.msrb.mxu2 %v6735_v29  ;;  %3978 = vmatpush.bf16.msrb.mxu3 %v6863_v34  ;;  %v6798_v29 = vld [vmem:[#allocation7 + $0xb28] sm:$0xf]  ;;  %v7319_v34 = vld [vmem:[#allocation7 + $0xb34] sm:$0xf0]  ;;  %v6755_v56 = vor.u32 %v7305_v48, %v6752_v3  ;;  %v7333_v46 = vld [vmem:[#allocation7 + $0xbac] sm:$0xf] }
 0x21c   : > { %v6799_v61 = vor.u32 %v7319_v34, %v6798_v29  ;;  %v7253_v3 = vld [vmem:[#allocation7 + $0x92c] sm:$0xf] }
 0x21d   : > { %3938 = vmatpush.bf16.msrb.mxu0 %v6447_v33  ;;  %3952 = vmatpush.bf16.msrb.mxu1 %v6575_v60  ;;  %v7273_v33 = vld [vmem:[#allocation7 + $0x9cc] sm:$0xf]  ;;  %v6671_v60 = vor.u32 %v7287_v12, %v6670_v62  ;;  %v2896_v19 = vpop.f32.mrf.mxu2  ;;  %v2910_v9 = vpop.f32.mrf.mxu3  ;;  %v6864_v62 = vld [vmem:[#allocation7 + $0xbb8] sm:$0xf0] }
 0x21e   : > { %v2897_v23 = vadd.f32 %v2896_v19, %v2883_v21  ;;  %v7237_v21 = vld [vmem:[#allocation7 + $0x8ac] sm:$0xf] }
 0x21f   : > { %3965 = vmatpush.bf16.msrb.mxu2 %v6719_v35  ;;  %3979 = vmatpush.bf16.msrb.mxu3 %v6847_v24  ;;  %v6624_v35 = vld [vmem:[#allocation7 + $0x9d8] sm:$0xf0]  ;;  %v6654_v24 = vld [vmem:[#allocation7 + $0xa08] sm:$0xf]  ;;  %v7329_v19 = vld [vmem:[#allocation7 + $0xb8c] sm:$0xf] }
 0x220   : > { %v6627_v15 = vor.u32 %v7273_v33, %v6624_v35  ;;  %v6655_v22 = vor.u32 %v7283_v1, %v6654_v24  ;;  %v6576_v33 = vld [vmem:[#allocation7 + $0x978] sm:$0xf0]  ;;  %v7225_v1 = vld [vmem:[#allocation7 + $0x84c] sm:$0xf] }
 0x221   : > { %3939 = vmatpush.bf16.msrb.mxu0 %v6431_v7  ;;  %3953 = vmatpush.bf16.msrb.mxu1 %v6559_v20  ;;  %v7990_v7 = vadd.f32 %v2910_v9, %v2897_v23  ;;  %v6499_v20 = vor.u32 %v7241_v55, %v6496_v59  ;;  %v6867_v55 = vor.u32 %v7333_v46, %v6864_v62  ;;  %v7261_v59 = vld [vmem:[#allocation7 + $0x96c] sm:$0xf]  ;;  %v6848_v35 = vld [vmem:[#allocation7 + $0xb98] sm:$0xf0] }
 0x222   : > { %v6579_v24 = vor.u32 %v7261_v59, %v6576_v33  ;;  %v6432_v23 = vld [vmem:[#allocation7 + $0x858] sm:$0xf0]  ;;  %v7249_v46 = vld [vmem:[#allocation7 + $0x90c] sm:$0xf] }
 0x223   : > { %3966 = vmatpush.bf16.msrb.mxu2 %v6703_v25  ;;  %3980 = vmatpush.bf16.msrb.mxu3 %v6831_v52  ;;  %v6783_v25 = vor.u32 %v7315_v6, %v6782_v5  ;;  %v6480_v52 = vld [vmem:[#allocation7 + $0x8b8] sm:$0xf0]  ;;  %v6851_v6 = vor.u32 %v7329_v19, %v6848_v35  ;;  %v7281_v59 = vld [vmem:[#allocation7 + $0xa0c] sm:$0xf] }
 0x224   : > { %v6483_v53 = vor.u32 %v7237_v21, %v6480_v52  ;;  %v6560_v9 = vld [vmem:[#allocation7 + $0x958] sm:$0xf0]  ;;  %v6435_v21 = vor.u32 %v7225_v1, %v6432_v23 }
 0x225   : > { %3940 = vmatpush.bf16.msrb.mxu0 %v6415_v13  ;;  %3954 = vmatpush.bf16.msrb.mxu1 %v6543_v37  ;;  %v6611_v13 = vor.u32 %v7269_v4, %v6608_v26  ;;  %v7233_v37 = vld [vmem:[#allocation7 + $0x88c] sm:$0xf]  ;;  %v6563_v52 = vor.u32 %v7257_v8, %v6560_v9  ;;  %v6707_v26 = vor.u32 %v7293_v16, %v6704_v44  ;;  %v6528_v62 = vld [vmem:[#allocation7 + $0x918] sm:$0xf0] }
 0x226   : > { %v6467_v29 = vor.u32 %v7233_v37, %v6464_v38  ;;  %v6688_v37 = vld [vmem:[#allocation7 + $0xa58] sm:$0xf0]  ;;  %v7321_v38 = vld [vmem:[#allocation7 + $0xb4c] sm:$0xf] }
 0x227   : > { %3967 = vmatpush.bf16.msrb.mxu2 %v6687_v30  ;;  %3981 = vmatpush.bf16.msrb.mxu3 %v6815_v41  ;;  %v7265_v30 = vld [vmem:[#allocation7 + $0x98c] sm:$0xf]  ;;  %v6592_v41 = vld [vmem:[#allocation7 + $0x998] sm:$0xf0] }
 0x228   : > { %v6595_v34 = vor.u32 %v7265_v30, %v6592_v41  ;;  %v6547_v30 = vor.u32 %v7253_v3, %v6544_v28  ;;  %v7217_v41 = vld [vmem:[#allocation7 + $0x80c] sm:$0xf]  ;;  %v6784_v19 = vld [vmem:[#allocation7 + $0xb18] sm:$0xf0] }
 0x229   : > { %3941 = vmatpush.bf16.msrb.mxu0 %v6399_v14  ;;  %3955 = vmatpush.bf16.msrb.mxu1 %v6527_v36  ;;  %v2922_v43 = vpop.f32.mrf.mxu0  ;;  %v2936_v40 = vpop.f32.mrf.mxu1  ;;  %v7229_v14 = vld [vmem:[#allocation7 + $0x86c] sm:$0xf]  ;;  %v6448_v36 = vld [vmem:[#allocation7 + $0x878] sm:$0xf0] }
 0x22a   : > { %v2923_v12 = vadd.f32 %v2922_v43, %v7959_v49  ;;  %v6451_v49 = vor.u32 %v7229_v14, %v6448_v36  ;;  %v6800_v14 = vld [vmem:[#allocation7 + $0xb38] sm:$0xf0] }
 0x22b   : > { %3968 = vmatpush.bf16.msrb.mxu2 %v6671_v60  ;;  %3982 = vmatpush.bf16.msrb.mxu3 %v6799_v61  ;;  %v7297_v60 = vld [vmem:[#allocation7 + $0xa8c] sm:$0xf]  ;;  %v6720_v61 = vld [vmem:[#allocation7 + $0xa98] sm:$0xf0] }
 0x22c   : > { %3942 = vmatmul.bf16.vlgmr.msrb.gmra.mxu0 %v7906_v31  ;;  %3956 = vmatmul.bf16.vlgmr.msrb.gmra.mxu1 %v7909_v17  ;;  %v6723_v5 = vor.u32 %v7297_v60, %v6720_v61  ;;  %v6656_v60 = vld [vmem:[#allocation7 + $0xa18] sm:$0xf0]  ;;  %v7313_v61 = vld [vmem:[#allocation7 + $0xb0c] sm:$0xf] }
 0x22d   : > { %3990 = vmatpush.bf16.msra.mxu0 %v6515_v47  ;;  %4004 = vmatpush.bf16.msra.mxu1 %v6643_v50  ;;  %v2937_v47 = vadd.f32 %v2936_v40, %v2923_v12  ;;  %v6739_v50 = vor.u32 %v7301_v39, %v6736_v63  ;;  %v6400_v39 = vld [vmem:[#allocation7 + $0x818] sm:$0xf0]  ;;  %v6691_v40 = vor.u32 %v7289_v54, %v6688_v37  ;;  %v7285_v12 = vld [vmem:[#allocation7 + $0xa2c] sm:$0xf] }
 0x22e   : > { %v6403_v36 = vor.u32 %v7217_v41, %v6400_v39  ;;  %v6659_v1 = vor.u32 %v7281_v59, %v6656_v60  ;;  %v6787_v23 = vor.u32 %v7313_v61, %v6784_v19 }
 0x22f   : > { %3969 = vmatpush.bf16.msrb.mxu2 %v6655_v22  ;;  %3983 = vmatpush.bf16.msrb.mxu3 %v6783_v25 }
 0x231   : > { %3991 = vmatpush.bf16.msra.mxu0 %v6499_v20  ;;  %4005 = vmatpush.bf16.msra.mxu1 %v6627_v15  ;;  %v2924_v18 = vpop.f32.mrf.mxu0  ;;  %v7325_v20 = vld [vmem:[#allocation7 + $0xb6c] sm:$0xf]  ;;  %v6832_v15 = vld [vmem:[#allocation7 + $0xb78] sm:$0xf0]  ;;  %v2938_v25 = vpop.f32.mrf.mxu1 }
 0x232   : > { %3970 = vmatmul.bf16.vlgmr.msrb.gmra.mxu2 %v7913_v42  ;;  %3984 = vmatmul.bf16.vlgmr.msrb.gmra.mxu3 %v7916_v10  ;;  %v2925_v22 = vadd.f32 %v2924_v18, %v7964_v0  ;;  %v6835_v48 = vor.u32 %v7325_v20, %v6832_v15  ;;  %v6816_v0 = vld [vmem:[#allocation7 + $0xb58] sm:$0xf0] }
 0x233   : > { %4018 = vmatpush.bf16.msra.mxu2 %v6771_v57  ;;  %4032 = vmatpush.bf16.msra.mxu3 %v6899_v51  ;;  %v7221_v57 = vld [vmem:[#allocation7 + $0x82c] sm:$0xf]  ;;  %v6416_v51 = vld [vmem:[#allocation7 + $0x838] sm:$0xf0]  ;;  %v6819_v63 = vor.u32 %v7321_v38, %v6816_v0  ;;  %v8012_v38 = vld [vmem:[#allocation8] sm:$0xf] }
 0x234   : > { %v2939_v4 = vadd.f32 %v2938_v25, %v2925_v22  ;;  %v4056_v39 = vperm.slane %v8012_v38, 0 }
 0x235   : > { %3992 = vmatpush.bf16.msra.mxu0 %v6483_v53  ;;  %4006 = vmatpush.bf16.msra.mxu1 %v6611_v13  ;;  %v2950_v53 = vpop.f32.mrf.mxu2  ;;  %v2964_v13 = vpop.f32.mrf.mxu3 }
 0x237   : > { %4019 = vmatpush.bf16.msra.mxu2 %v6755_v56  ;;  %4033 = vmatpush.bf16.msra.mxu3 %v6883_v32  ;;  %v2951_v56 = vadd.f32 %v2950_v53, %v2937_v47  ;;  %v6419_v32 = vor.u32 %v7221_v57, %v6416_v51  ;;  %v6531_v47 = vor.u32 %v7249_v46, %v6528_v62 }
 0x239   : > { %3993 = vmatpush.bf16.msra.mxu0 %v6467_v29  ;;  %4007 = vmatpush.bf16.msra.mxu1 %v6595_v34  ;;  %v7998_v43 = vadd.f32 %v2964_v13, %v2951_v56  ;;  %v6672_v29 = vld [vmem:[#allocation7 + $0xa38] sm:$0xf0]  ;;  %v7317_v34 = vld [vmem:[#allocation7 + $0xb2c] sm:$0xf] }
 0x23b   : > { %4020 = vmatpush.bf16.msra.mxu2 %v6739_v50  ;;  %4034 = vmatpush.bf16.msra.mxu3 %v6867_v55  ;;  %v6675_v50 = vor.u32 %v7285_v12, %v6672_v29  ;;  %v6803_v55 = vor.u32 %v7317_v34, %v6800_v14 }
 0x23d   : > { %3994 = vmatpush.bf16.msra.mxu0 %v6451_v49  ;;  %4008 = vmatpush.bf16.msra.mxu1 %v6579_v24  ;;  %v2952_v33 = vpop.f32.mrf.mxu2  ;;  %v2966_v49 = vpop.f32.mrf.mxu3 }
 0x23e   : > { %v2953_v35 = vadd.f32 %v2952_v33, %v2939_v4 }
 0x23f   : > { %4021 = vmatpush.bf16.msra.mxu2 %v6723_v5  ;;  %4035 = vmatpush.bf16.msra.mxu3 %v6851_v6 }
 0x240   : > { %v8000_v24 = vadd.f32 %v2966_v49, %v2953_v35 }
 0x241   : > { %3995 = vmatpush.bf16.msra.mxu0 %v6435_v21  ;;  %4009 = vmatpush.bf16.msra.mxu1 %v6563_v52 }
 0x243   : > { %4022 = vmatpush.bf16.msra.mxu2 %v6707_v26  ;;  %4036 = vmatpush.bf16.msra.mxu3 %v6835_v48 }
 0x245   : > { %3996 = vmatpush.bf16.msra.mxu0 %v6419_v32  ;;  %4010 = vmatpush.bf16.msra.mxu1 %v6547_v30 }
 0x247   : > { %4023 = vmatpush.bf16.msra.mxu2 %v6691_v40  ;;  %4037 = vmatpush.bf16.msra.mxu3 %v6819_v63  ;;  %v4057_v63 = vperm.slane %v8012_v38, 1 }
 0x249   : > { %3997 = vmatpush.bf16.msra.mxu0 %v6403_v36  ;;  %4011 = vmatpush.bf16.msra.mxu1 %v6531_v47  ;;  %v2978_v5 = vpop.f32.mrf.mxu0  ;;  %v2992_v6 = vpop.f32.mrf.mxu1 }
 0x24a   : > { %v2979_v8 = vadd.f32 %v2978_v5, %v7968_v27 }
 0x24b   : > { %4024 = vmatpush.bf16.msra.mxu2 %v6675_v50  ;;  %4038 = vmatpush.bf16.msra.mxu3 %v6803_v55 }
 0x24c   : > { %3998 = vmatmul.bf16.vlgmr.msra.gmra.mxu0 %v7906_v31  ;;  %4012 = vmatmul.bf16.vlgmr.msra.gmra.mxu1 %v7909_v17  ;;  %v2993_v9 = vadd.f32 %v2992_v6, %v2979_v8 }
 0x24f   : > { %4025 = vmatpush.bf16.msra.mxu2 %v6659_v1  ;;  %4039 = vmatpush.bf16.msra.mxu3 %v6787_v23 }
 0x251   : > { %v2980_v16 = vpop.f32.mrf.mxu0  ;;  %v2994_v44 = vpop.f32.mrf.mxu1 }
 0x252   : > { %4026 = vmatmul.bf16.vlgmr.msra.gmra.mxu2 %v7913_v42  ;;  %4040 = vmatmul.bf16.vlgmr.msra.gmra.mxu3 %v7916_v10  ;;  %v2981_v18 = vadd.f32 %v2980_v16, %v7970_v11 }
 0x254   : > { %v2995_v20 = vadd.f32 %v2994_v44, %v2981_v18 }
 0x255   : > { %v3006_v15 = vpop.f32.mrf.mxu2  ;;  %v3020_v31 = vpop.f32.mrf.mxu3 }
 0x256   : > { %v3007_v22 = vadd.f32 %v3006_v15, %v2993_v9 }
 0x258   : > { %v8008_v17 = vadd.f32 %v3020_v31, %v3007_v22 }
 0x25d   : > { %v3008_v25 = vpop.f32.mrf.mxu2  ;;  %v3022_v42 = vpop.f32.mrf.mxu3 }
 0x25e   : > { %v3009_v21 = vadd.f32 %v3008_v25, %v2995_v20 }
 0x260   : > { %v8010_v52 = vadd.f32 %v3022_v42, %v3009_v21 }
 0x269   : > { %v3831_v10 = vpop.f32.mrf.mxu0  ;;  %v3845_v57 = vpop.f32.mrf.mxu1 }
 0x26a   : > { %v3846_v3 = vadd.f32 %v3845_v57, %v3831_v10 }
 0x271   : > { %v3833_v4 = vpop.f32.mrf.mxu0  ;;  %v3847_v26 = vpop.f32.mrf.mxu1 }
 0x272   : > { %v3848_v30 = vadd.f32 %v3847_v26, %v3833_v4 }
 0x275   : > { %v3859_v51 = vpop.f32.mrf.mxu2  ;;  %v3873_v27 = vpop.f32.mrf.mxu3 }
 0x276   : > { %v3860_v53 = vadd.f32 %v3859_v51, %v3846_v3 }
 0x278   : > { %v3874_v13 = vadd.f32 %v3873_v27, %v3860_v53 }
 0x27a   : > { %v4046_v41 = vadd.f32 %v3874_v13, %v7978_v45 }
 0x27c   : > { %v4064_v34 = vadd.f32 %v4056_v39, %v4046_v41 }
 0x27d   : > { %v3861_v48 = vpop.f32.mrf.mxu2  ;;  %v3875_v11 = vpop.f32.mrf.mxu3 }
 0x27e   : > { %v3862_v46 = vadd.f32 %v3861_v48, %v3848_v30  ;;  %v4072_v33 = vmax.f32 %v4064_v34, 0.0  ;;  %v4059_v30 = vperm.slane %v8012_v38, 3 }
 0x280   : > { %v3876_v47 = vadd.f32 %v3875_v11, %v3862_v46 }
 0x282   : > { %v4050_v19 = vadd.f32 %v3876_v47, %v7980_v2 }
 0x284   : > { %v4068_v5 = vadd.f32 %v4056_v39, %v4050_v19 }
 0x286   : > { %v4076_v9 = vmax.f32 %v4068_v5, 0.0 }
 0x289   : > { %v3887_v28 = vpop.f32.mrf.mxu0  ;;  %v3901_v54 = vpop.f32.mrf.mxu1 }
 0x28a   : > { %v3902_v37 = vadd.f32 %v3901_v54, %v3887_v28  ;;  %v4058_v28 = vperm.slane %v8012_v38, 2 }
 0x291   : > { %v3889_v62 = vpop.f32.mrf.mxu0  ;;  %v3903_v12 = vpop.f32.mrf.mxu1 }
 0x292   : > { %v3904_v14 = vadd.f32 %v3903_v12, %v3889_v62 }
 0x295   : > { %v3915_v0 = vpop.f32.mrf.mxu2  ;;  %v3929_v56 = vpop.f32.mrf.mxu3 }
 0x296   : > { %v3916_v32 = vadd.f32 %v3915_v0, %v3902_v37 }
 0x298   : > { %v3930_v40 = vadd.f32 %v3929_v56, %v3916_v32 }
 0x29a   : > { %v4047_v29 = vadd.f32 %v3930_v40, %v7988_v58 }
 0x29c   : > { %v4065_v36 = vadd.f32 %v4057_v63, %v4047_v29 }
 0x29d   : > { %v3917_v50 = vpop.f32.mrf.mxu2  ;;  %v3931_v45 = vpop.f32.mrf.mxu3 }
 0x29e   : > { %v4073_v55 = vmax.f32 %v4065_v36, 0.0  ;;  %v3918_v59 = vadd.f32 %v3917_v50, %v3904_v14 }
 0x2a0   : > { %v4088_v60 = vrot.slane %v4073_v55, 6  ;;  %v3932_v61 = vadd.f32 %v3931_v45, %v3918_v59 }
 0x2a2   : > { %v4095_v35 = vsel %vm4094_vm7, %v4072_v33, %v4088_v60  ;;  %v4101_v58 = vsel %vm4100_vm11, %v4072_v33, %v4088_v60  ;;  %v4107_v49 = vsel %vm4096_vm9, %v4072_v33, %v4088_v60  ;;  %v8023_v1 = vsel %vm4102_vm15, %v4088_v60, %v4072_v33 }
 0x2a3   : > { %v4051_v23 = vadd.f32 %v3932_v61, %v7990_v7 }
 0x2a5   : > { %v4069_v6 = vadd.f32 %v4057_v63, %v4051_v23 }
 0x2a7   : > { %v4077_v8 = vmax.f32 %v4069_v6, 0.0 }
 0x2a9   : > { %v4091_v16 = vrot.slane %v4077_v8, 6  ;;  %v3943_v15 = vpop.f32.mrf.mxu0  ;;  %v3957_v31 = vpop.f32.mrf.mxu1 }
 0x2aa   : > { %v3958_v42 = vadd.f32 %v3957_v31, %v3943_v15 }
 0x2ab   : > { %v8027_v18 = vsel %vm4094_vm7, %v4076_v9, %v4091_v16  ;;  %v8030_v2 = vsel %vm4100_vm11, %v4076_v9, %v4091_v16  ;;  %v8033_v44 = vsel %vm4096_vm9, %v4076_v9, %v4091_v16  ;;  %v8036_v20 = vsel %vm4102_vm15, %v4091_v16, %v4076_v9 }
 0x2b1   : > { %v3945_v25 = vpop.f32.mrf.mxu0  ;;  %v3959_v21 = vpop.f32.mrf.mxu1 }
 0x2b2   : > { %v3960_v27 = vadd.f32 %v3959_v21, %v3945_v25 }
 0x2b5   : > { %v3971_v7 = vpop.f32.mrf.mxu2  ;;  %v3985_v22 = vpop.f32.mrf.mxu3 }
 0x2b6   : > { %v3972_v10 = vadd.f32 %v3971_v7, %v3958_v42 }
 0x2b8   : > { %v3986_v48 = vadd.f32 %v3985_v22, %v3972_v10 }
 0x2ba   : > { %v4048_v3 = vadd.f32 %v3986_v48, %v7998_v43 }
 0x2bc   : > { %v4066_v56 = vadd.f32 %v4058_v28, %v4048_v3 }
 0x2bd   : > { %v3973_v57 = vpop.f32.mrf.mxu2  ;;  %v3987_v51 = vpop.f32.mrf.mxu3 }
 0x2be   : > { %v3974_v11 = vadd.f32 %v3973_v57, %v3960_v27  ;;  %v4074_v46 = vmax.f32 %v4066_v56, 0.0 }
 0x2c0   : > { %v3988_v53 = vadd.f32 %v3987_v51, %v3974_v11  ;;  %v4089_v47 = vrot.slane %v4074_v46, 4 }
 0x2c2   : > { %v4052_v41 = vadd.f32 %v3988_v53, %v8000_v24 }
 0x2c4   : > { %v4070_v12 = vadd.f32 %v4058_v28, %v4052_v41 }
 0x2c6   : > { %v4078_v59 = vmax.f32 %v4070_v12, 0.0 }
 0x2c8   : > { %v4092_v15 = vrot.slane %v4078_v59, 4 }
 0x2c9   : > { %v3999_v4 = vpop.f32.mrf.mxu0  ;;  %v4013_v26 = vpop.f32.mrf.mxu1 }
 0x2ca   : > { %v4014_v54 = vadd.f32 %v4013_v26, %v3999_v4 }
 0x2d1   : > { %v4001_v39 = vpop.f32.mrf.mxu0  ;;  %v4015_v40 = vpop.f32.mrf.mxu1 }
 0x2d2   : > { %v4016_v62 = vadd.f32 %v4015_v40, %v4001_v39 }
 0x2d5   : > { %v4027_v13 = vpop.f32.mrf.mxu2  ;;  %v4041_v37 = vpop.f32.mrf.mxu3 }
 0x2d6   : > { %v4028_v0 = vadd.f32 %v4027_v13, %v4014_v54 }
 0x2d8   : > { %v4042_v32 = vadd.f32 %v4041_v37, %v4028_v0 }
 0x2da   : > { %v4049_v63 = vadd.f32 %v4042_v32, %v8008_v17 }
 0x2dc   : > { %v4067_v43 = vadd.f32 %v4059_v30, %v4049_v63 }
 0x2dd   : > { %v4029_v29 = vpop.f32.mrf.mxu2  ;;  %v4043_v36 = vpop.f32.mrf.mxu3 }
 0x2de   : > { %v4075_v34 = vmax.f32 %v4067_v43, 0.0  ;;  %v4030_v14 = vadd.f32 %v4029_v29, %v4016_v62 }
 0x2e0   : > { %v4090_v50 = vrot.slane %v4075_v34, 2  ;;  %v4044_v55 = vadd.f32 %v4043_v36, %v4030_v14 }
 0x2e2   : > { %v4097_v38 = vsel %vm4096_vm9, %v4089_v47, %v4090_v50  ;;  %v4103_v24 = vsel %vm4102_vm15, %v4090_v50, %v4089_v47  ;;  %v4108_v45 = vsel %vm4094_vm7, %v4089_v47, %v4090_v50  ;;  %v4112_v17 = vsel %vm4100_vm11, %v4089_v47, %v4090_v50 }
 0x2e3   : > { %v4053_v33 = vadd.f32 %v4044_v55, %v8010_v52  ;;  %v4099_v60 = vsel %vm933_vm8, %v4095_v35, %v4097_v38  ;;  %v4105_v61 = vsel %vm4104_vm0, %v4101_v58, %v4103_v24  ;;  %v4109_v19 = vsel %vm933_vm8, %v4108_v45, %v4107_v49 }
 0x2e4   : > { %v6900_v23 = vrot.slane %v4099_v60, 9  ;;  %v4106_v5 = vrot.slane %v4105_v61, 2  ;;  %v4110_v6 = vrot.slane %v4109_v19, 4  ;;  %v4113_v8 = vsel %vm4104_vm0, %v4112_v17, %v8023_v1 }
 0x2e5   : > { %v4071_v9 = vadd.f32 %v4059_v30, %v4053_v33  ;;  %v4114_v16 = vrot.slane %v4113_v8, 6 }
 0x2e6   : > { %v8053_v31 = vmax.f32 %v4099_v60, %v6900_v23  ;;  %v6901_v7 = vrot.slane %v4106_v5, 9  ;;  %v6902_v22 = vrot.slane %v4110_v6, 9 }
 0x2e7   : > { %v4079_v52 = vmax.f32 %v4071_v9, 0.0  ;;  %v6903_v25 = vrot.slane %v4114_v16, 9 }
 0x2e8   : > { %4186 = vrot.lane.b32.xlu2 %v8053_v31, %s7545_s25  ;;  %v8057_v35 = vmax.f32 %v4106_v5, %v6901_v7  ;;  %v8059_v58 = vmax.f32 %v4110_v6, %v6902_v22  ;;  %v4178_v21 = vrot.slane %v8053_v31, 2  ;;  %v4210_v42 = vrot.slane %v8053_v31, 4 }
 0x2e9   : > { %v4093_v49 = vrot.slane %v4079_v52, 2  ;;  %v8061_v1 = vmax.f32 %v4114_v16, %v6903_v25  ;;  %v4226_v5 = vrot.slane %v8053_v31, 6 }
 0x2ea   : > { %4188 = vrot.lane.b32.xlu0 %v8057_v35, %s7545_s25  ;;  %v4246_v10 = vrot.slane %v8057_v35, 7  ;;  %v4180_v57 = vrot.slane %v8059_v58, 2  ;;  %v4179_v51 = vrot.slane %v8057_v35, 2  ;;  %v4211_v27 = vrot.slane %v8057_v35, 4 }
 0x2eb   : > { %v4116_v4 = vsel %vm4096_vm9, %v4092_v15, %v4093_v49  ;;  %v4119_v26 = vsel %vm4102_vm15, %v4093_v49, %v4092_v15  ;;  %v4123_v48 = vsel %vm4094_vm7, %v4092_v15, %v4093_v49  ;;  %v4127_v11 = vsel %vm4100_vm11, %v4092_v15, %v4093_v49 }
 0x2ec   : > { %v4120_v3 = vsel %vm4104_vm0, %v8030_v2, %v4119_v26  ;;  %v4128_v28 = vsel %vm4104_vm0, %v4127_v11, %v8036_v20  ;;  %v4117_v54 = vsel %vm933_vm8, %v8027_v18, %v4116_v4  ;;  %v4124_v53 = vsel %vm933_vm8, %v4123_v48, %v8033_v44 }
 0x2ed   : > { %v4121_v13 = vrot.slane %v4120_v3, 2  ;;  %v4129_v37 = vrot.slane %v4128_v28, 6  ;;  %v6904_v0 = vrot.slane %v4117_v54, 9  ;;  %v4125_v56 = vrot.slane %v4124_v53, 4 }
 0x2ee   : > { %v4248_v32 = vsel %vm4247_vm3, %v4246_v10, %v8053_v31  ;;  %v4257_v30 = vrot.slane %v8061_v1, 7  ;;  %v4181_v2 = vrot.slane %v8061_v1, 2  ;;  %v4306_v41 = vrot.slane %v4179_v51, 7 }
 0x2ef   : > { %v6905_v39 = vrot.slane %v4121_v13, 9  ;;  %v6907_v20 = vrot.slane %v4129_v37, 9  ;;  %v8087_v40 = vmax.f32 %v4117_v54, %v6904_v0  ;;  %v6906_v18 = vrot.slane %v4125_v56, 9 }
 0x2f0   : > { %4190 = vrot.lane.b32.xlu2 %v8059_v58, %s7545_s25  ;;  %v4250_v44 = vsel %vm4249_vm4, %v4246_v10, %v4248_v32  ;;  %v4258_v63 = vsel %vm4247_vm3, %v4257_v30, %v8059_v58  ;;  %v4313_v46 = vrot.slane %v4181_v2, 7  ;;  %v4307_v62 = vsel %vm4247_vm3, %v4306_v41, %v4178_v21 }
 0x2f1   : > { %v8095_v43 = vmax.f32 %v4121_v13, %v6905_v39  ;;  %v8097_v12 = vmax.f32 %v4129_v37, %v6907_v20  ;;  %v8099_v29 = vmax.f32 %v4125_v56, %v6906_v18  ;;  %v4252_v34 = vsel %vm4251_vm1, %v4246_v10, %v4250_v44 }
 0x2f2   : > { %4192 = vrot.lane.b32.xlu0 %v8061_v1, %s7545_s25  ;;  %v8105_v14 = vsel %vm4253_vm5, %v4246_v10, %v4252_v34  ;;  %v4259_v36 = vsel %vm4249_vm4, %v4257_v30, %v4258_v63  ;;  %v4314_v47 = vsel %vm4247_vm3, %v4313_v46, %v4180_v57  ;;  %v4308_v50 = vsel %vm4249_vm4, %v4306_v41, %v4307_v62 }
 0x2f3   : > { %4196 = vrot.lane.b32.xlu1 %v8095_v43, %s7545_s25  ;;  %v4260_v55 = vsel %vm4251_vm1, %v4257_v30, %v4259_v36  ;;  %v4315_v59 = vsel %vm4249_vm4, %v4313_v46, %v4314_v47  ;;  %v4309_v38 = vsel %vm4251_vm1, %v4306_v41, %v4308_v50  ;;  %v4264_v24 = vrot.slane %v8095_v43, 7 }
 0x2f4   : > { %v8117_v45 = vsel %vm4253_vm5, %v4257_v30, %v4260_v55  ;;  %v4316_v17 = vsel %vm4251_vm1, %v4313_v46, %v4315_v59  ;;  %v8121_v33 = vsel %vm4253_vm5, %v4306_v41, %v4309_v38  ;;  %v4271_v60 = vrot.slane %v8097_v12, 7 }
 0x2f5   : > { %v8125_v61 = vsel %vm4253_vm5, %v4313_v46, %v4316_v17  ;;  %v4265_v19 = vsel %vm4247_vm3, %v4264_v24, %v8087_v40  ;;  %v4183_v23 = vrot.slane %v8095_v43, 2  ;;  %v4182_v9 = vrot.slane %v8087_v40, 2 }
 0x2f6   : > { %v4266_v6 = vsel %vm4249_vm4, %v4264_v24, %v4265_v19  ;;  %v4272_v8 = vsel %vm4247_vm3, %v4271_v60, %v8099_v29  ;;  %v4362_v16 = vrot.slane %v4211_v27, 7  ;;  %v4185_v52 = vrot.slane %v8097_v12, 2 }
 0x2f7   : > { %v4267_v15 = vsel %vm4251_vm1, %v4264_v24, %v4266_v6  ;;  %v4273_v7 = vsel %vm4249_vm4, %v4271_v60, %v4272_v8  ;;  %v4320_v22 = vrot.slane %v4183_v23, 7  ;;  %v4184_v10 = vrot.slane %v8099_v29, 2 }
 0x2f8   : > { %v8139_v25 = vsel %vm4253_vm5, %v4264_v24, %v4267_v15  ;;  %v4274_v49 = vsel %vm4251_vm1, %v4271_v60, %v4273_v7  ;;  %v4363_v21 = vsel %vm4247_vm3, %v4362_v16, %v4210_v42  ;;  %v4327_v4 = vrot.slane %v4185_v52, 7 }
 0x2f9   : > { %v8147_v57 = vsel %vm4253_vm5, %v4271_v60, %v4274_v49  ;;  %v4321_v51 = vsel %vm4247_vm3, %v4320_v22, %v4182_v9  ;;  %v4364_v27 = vsel %vm4249_vm4, %v4362_v16, %v4363_v21  ;;  %v4212_v31 = vrot.slane %v8059_v58, 4 }
 0x2fa   : > { %4194 = vrot.lane.b32.xlu0 %v8087_v40, %s7545_s25  ;;  %v4322_v26 = vsel %vm4249_vm4, %v4320_v22, %v4321_v51  ;;  %v4365_v48 = vsel %vm4251_vm1, %v4362_v16, %v4364_v27  ;;  %v4213_v42 = vrot.slane %v8061_v1, 4  ;;  %v4328_v28 = vsel %vm4247_vm3, %v4327_v4, %v4184_v10 }
 0x2fb   : > { %4200 = vrot.lane.b32.xlu1 %v8097_v12, %s7545_s25  ;;  %v4323_v11 = vsel %vm4251_vm1, %v4320_v22, %v4322_v26  ;;  %v8161_v3 = vsel %vm4253_vm5, %v4362_v16, %v4365_v48  ;;  %v4215_v54 = vrot.slane %v8095_v43, 4  ;;  %v4329_v13 = vsel %vm4249_vm4, %v4327_v4, %v4328_v28 }
 0x2fc   : > { %v8166_v53 = vsel %vm4253_vm5, %v4320_v22, %v4323_v11  ;;  %v4369_v37 = vrot.slane %v4213_v42, 7  ;;  %v4214_v0 = vrot.slane %v8087_v40, 4  ;;  %v4330_v56 = vsel %vm4251_vm1, %v4327_v4, %v4329_v13 }
 0x2fd   : > { %v4376_v32 = vrot.slane %v4215_v54, 7  ;;  %v4217_v30 = vrot.slane %v8097_v12, 4  ;;  %v4227_v2 = vrot.slane %v8057_v35, 6  ;;  %v8174_v41 = vsel %vm4253_vm5, %v4327_v4, %v4330_v56 }
 0x2fe   : > { %v4370_v39 = vsel %vm4247_vm3, %v4369_v37, %v4212_v31  ;;  %v4216_v20 = vrot.slane %v8099_v29, 4  ;;  %v4229_v18 = vrot.slane %v8061_v1, 6  ;;  %v4228_v35 = vrot.slane %v8059_v58, 6 }
 0x2ff   : > { %v4371_v44 = vsel %vm4249_vm4, %v4369_v37, %v4370_v39  ;;  %v4377_v63 = vsel %vm4247_vm3, %v4376_v32, %v4214_v0  ;;  %v4383_v46 = vrot.slane %v4217_v30, 7  ;;  %v4418_v62 = vrot.slane %v4227_v2, 7 }
 0x300   : > { %v4372_v34 = vsel %vm4251_vm1, %v4369_v37, %v4371_v44  ;;  %v4378_v36 = vsel %vm4249_vm4, %v4376_v32, %v4377_v63  ;;  %v4425_v47 = vrot.slane %v4229_v18, 7  ;;  %v4230_v15 = vrot.slane %v8087_v40, 6 }
 0x301   : > { %v8185_v50 = vsel %vm4253_vm5, %v4369_v37, %v4372_v34  ;;  %v4379_v55 = vsel %vm4251_vm1, %v4376_v32, %v4378_v36  ;;  %v4384_v1 = vsel %vm4247_vm3, %v4383_v46, %v4216_v20  ;;  %v4419_v59 = vsel %vm4247_vm3, %v4418_v62, %v4226_v5 }
 0x302   : > { %v8191_v38 = vsel %vm4253_vm5, %v4376_v32, %v4379_v55  ;;  %v4385_v24 = vsel %vm4249_vm4, %v4383_v46, %v4384_v1  ;;  %v4420_v17 = vsel %vm4249_vm4, %v4418_v62, %v4419_v59  ;;  %v4426_v60 = vsel %vm4247_vm3, %v4425_v47, %v4228_v35 }
 0x303   : > { %4198 = vrot.lane.b32.xlu1 %v8099_v29, %s7545_s25  ;;  %v4386_v58 = vsel %vm4251_vm1, %v4383_v46, %v4385_v24  ;;  %v4421_v19 = vsel %vm4251_vm1, %v4418_v62, %v4420_v17  ;;  %v4427_v23 = vsel %vm4249_vm4, %v4425_v47, %v4426_v60  ;;  %v4231_v5 = vrot.slane %v8095_v43, 6 }
 0x304   : > { %v8203_v6 = vsel %vm4253_vm5, %v4383_v46, %v4386_v58  ;;  %v8206_v8 = vsel %vm4253_vm5, %v4418_v62, %v4421_v19  ;;  %v4428_v9 = vsel %vm4251_vm1, %v4425_v47, %v4427_v23  ;;  %v4233_v22 = vrot.slane %v8097_v12, 6 }
 0x305   : > { %v8210_v16 = vsel %vm4253_vm5, %v4425_v47, %v4428_v9  ;;  %v4432_v7 = vrot.slane %v4231_v5, 7  ;;  %v4232_v43 = vrot.slane %v8099_v29, 6  ;;  %v7546_v20 = vmov 1934713408  }
 0x306   : > { %v4439_v49 = vrot.slane %v4233_v22, 7  ;;  %v4508_v18 = vunpack.c.l.s4 %v7546_v20  ;;  %vm5040_vm8 = vcmask 785408  }
 0x307   : > { %v4433_v52 = vsel %vm4247_vm3, %v4432_v7, %v4230_v15 }
 0x308   : > { %v4434_v21 = vsel %vm4249_vm4, %v4432_v7, %v4433_v52  ;;  %v4440_v51 = vsel %vm4247_vm3, %v4439_v49, %v4232_v43  ;;  %v8252_v1 = vunpack.c.0.s8 %v4508_v18 }
 0x309   : > { %v4435_v10 = vsel %vm4251_vm1, %v4432_v7, %v4434_v21  ;;  %v4441_v4 = vsel %vm4249_vm4, %v4439_v49, %v4440_v51 }
 0x30a   : > { %v8220_v27 = vsel %vm4253_vm5, %v4432_v7, %v4435_v10  ;;  %v4442_v40 = vsel %vm4251_vm1, %v4439_v49, %v4441_v4 }
 0x30b   : > { %v8225_v12 = vsel %vm4253_vm5, %v4439_v49, %v4442_v40 }
 0x342   : > { %v8227_v26 = vpop.permute.xlu2 %4186 }
 0x343   : > { %v4234_v11 = vrot.slane %v8227_v26, 6  ;;  %v4202_v37 = vrot.slane %v8227_v26, 2 }
 0x34a   : > { %v8240_v63 = vpop.permute.xlu2 %4190 }
 0x34b   : > { %v4204_v59 = vrot.slane %v8240_v63, 2 }
 0x35c   : > { %v4189_v29 = vpop.permute.xlu0 %4188 }
 0x35d   : > { %v4203_v48 = vrot.slane %v4189_v29, 2  ;;  %v4235_v31 = vrot.slane %v4189_v29, 6  ;;  %v4278_v42 = vrot.slane %v4189_v29, 7  ;;  %v4219_v52 = vrot.slane %v4189_v29, 4 }
 0x35f   : > { %v4279_v28 = vsel %vm4247_vm3, %v4278_v42, %v8227_v26  ;;  %v4334_v54 = vrot.slane %v4203_v48, 7  ;;  %v4446_v13 = vrot.slane %v4235_v31, 7  ;;  %v4390_v31 = vrot.slane %v4219_v52, 7 }
 0x360   : > { %v4280_v0 = vsel %vm4249_vm4, %v4278_v42, %v4279_v28  ;;  %v4218_v28 = vrot.slane %v8227_v26, 4 }
 0x361   : > { %v4447_v56 = vsel %vm4247_vm3, %v4446_v13, %v4234_v11  ;;  %v4281_v32 = vsel %vm4251_vm1, %v4278_v42, %v4280_v0  ;;  %v4335_v30 = vsel %vm4247_vm3, %v4334_v54, %v4202_v37 }
 0x362   : > { %v4448_v2 = vsel %vm4249_vm4, %v4446_v13, %v4447_v56  ;;  %v4282_v39 = vsel %vm4253_vm5, %v4278_v42, %v4281_v32  ;;  %v4336_v34 = vsel %vm4249_vm4, %v4334_v54, %v4335_v30  ;;  %v4391_v32 = vsel %vm4247_vm3, %v4390_v31, %v4218_v28 }
 0x363   : > { %v4449_v44 = vsel %vm4251_vm1, %v4446_v13, %v4448_v2  ;;  %v4504_v55 = vrot.slane %v4282_v39, 4  ;;  %v4337_v60 = vsel %vm4251_vm1, %v4334_v54, %v4336_v34 }
 0x364   : > { %v8242_v46 = vpop.permute.xlu0 %4192  ;;  %v8245_v62 = vsel %vm4253_vm5, %v4446_v13, %v4449_v44  ;;  %v4338_v22 = vsel %vm4253_vm5, %v4334_v54, %v4337_v60 }
 0x365   : > { %v4205_v36 = vrot.slane %v8242_v46, 2  ;;  %v4285_v35 = vrot.slane %v8242_v46, 7  ;;  %v8250_v47 = vpop.permute.xlu1 %4196  ;;  %v4506_v23 = vsel %vm935_vm12, %v4504_v55, %v8105_v14  ;;  %v4513_v40 = vrot.slane %v4338_v22, 4 }
 0x366   : > { %v8264_v9 = vperm.slane %v4506_v23, %v8252_v1  ;;  %v4292_v15 = vrot.slane %v8250_v47, 7  ;;  %v4207_v37 = vrot.slane %v8250_v47, 2 }
 0x367   : > { %v4286_v24 = vsel %vm4247_vm3, %v4285_v35, %v8240_v63  ;;  %v4341_v17 = vrot.slane %v4205_v36, 7  ;;  %v4514_v13 = vsel %vm935_vm12, %v4513_v40, %v8121_v33 }
 0x368   : > { %v4287_v58 = vsel %vm4249_vm4, %v4285_v35, %v4286_v24  ;;  %4665 = vrot.lane.b32.xlu0 %v8264_v9, %s7547_s26  ;;  %v4511_v14 = vrot.slane %v8264_v9, 4  ;;  %v8310_v18 = vperm.slane %v4514_v13, %v8252_v1  ;;  %v4348_v36 = vrot.slane %v4207_v37, 7 }
 0x369   : > { %v4342_v19 = vsel %vm4247_vm3, %v4341_v17, %v4204_v59  ;;  %v4288_v7 = vsel %vm4251_vm1, %v4285_v35, %v4287_v58  ;;  %v4392_v59 = vsel %vm4249_vm4, %v4390_v31, %v4391_v32  ;;  %v4221_v58 = vrot.slane %v8242_v46, 4 }
 0x36a   : > { %v4343_v5 = vsel %vm4249_vm4, %v4341_v17, %v4342_v19  ;;  %v8280_v51 = vsel %vm935_vm12, 0.0, %v4511_v14  ;;  %v4289_v4 = vsel %vm4253_vm5, %v4285_v35, %v4288_v7  ;;  %v4393_v52 = vsel %vm4251_vm1, %v4390_v31, %v4392_v59 }
 0x36b   : > { %v4344_v43 = vsel %vm4251_vm1, %v4341_v17, %v4343_v5  ;;  %4673 = vrot.lane.b32.xlu2 %v8280_v51, %s7547_s26  ;;  %v4537_v11 = vrot.slane %v4289_v4, 4  ;;  %v4519_v5 = vrot.slane %v8310_v18, 4  ;;  %v4397_v4 = vrot.slane %v4221_v58, 7 }
 0x36c   : > { %v8273_v49 = vpop.permute.xlu0 %4194  ;;  %v4345_v48 = vsel %vm4253_vm5, %v4341_v17, %v4344_v43  ;;  %v4529_v32 = vrot.slane %v8245_v62, 4 }
 0x36d   : > { %v8275_v21 = vpop.permute.xlu1 %4200  ;;  %v4293_v10 = vsel %vm4247_vm3, %v4292_v15, %v8273_v49  ;;  %v4545_v54 = vrot.slane %v4345_v48, 4  ;;  %v4538_v0 = vsel %vm935_vm12, %v4537_v11, %v8117_v45  ;;  %v4206_v33 = vrot.slane %v8273_v49, 2 }
 0x36e   : > { %v4294_v29 = vsel %vm4249_vm4, %v4292_v15, %v4293_v10  ;;  %v4209_v30 = vrot.slane %v8275_v21, 2  ;;  %v8298_v2 = vperm.slane %v4538_v0, %v8252_v1  ;;  %v4299_v39 = vrot.slane %v8275_v21, 7 }
 0x36f   : > { %v4295_v42 = vsel %vm4251_vm1, %v4292_v15, %v4294_v29  ;;  %v4546_v26 = vsel %vm935_vm12, %v4545_v54, %v8125_v61  ;;  %v4349_v19 = vsel %vm4247_vm3, %v4348_v36, %v4206_v33  ;;  %v8343_v29 = vsel %vm935_vm12, 0.0, %v4519_v5 }
 0x370   : > { %v4296_v56 = vsel %vm4253_vm5, %v4292_v15, %v4295_v42  ;;  %v8307_v45 = vperm.slane %v4546_v26, %v8252_v1  ;;  %4681 = vrot.lane.b32.xlu1 %v8298_v2, %s7547_s26  ;;  %v4543_v44 = vrot.slane %v8298_v2, 4  ;;  %v4355_v24 = vrot.slane %v4209_v30, 7 }
 0x371   : > { %v4569_v61 = vrot.slane %v4296_v56, 4  ;;  %v4350_v14 = vsel %vm4249_vm4, %v4348_v36, %v4349_v19  ;;  %v4394_v42 = vsel %vm4253_vm5, %v4390_v31, %v4393_v52  ;;  %v4220_v11 = vrot.slane %v8240_v63, 4 }
 0x372   : > { %v4551_v55 = vrot.slane %v8307_v45, 4  ;;  %v8321_v17 = vsel %vm935_vm12, 0.0, %v4543_v44  ;;  %v4351_v54 = vsel %vm4251_vm1, %v4348_v36, %v4350_v14  ;;  %v4521_v56 = vrot.slane %v4394_v42, 4 }
 0x373   : > { %4689 = vrot.lane.b32.xlu0 %v8321_v17, %s7547_s26  ;;  %v4570_v22 = vsel %vm935_vm12, %v4569_v61, %v8139_v25  ;;  %v4398_v37 = vsel %vm4247_vm3, %v4397_v4, %v4220_v11  ;;  %v8376_v44 = vsel %vm935_vm12, %v4529_v32, %v8206_v8  ;;  %v4236_v11 = vrot.slane %v8240_v63, 6 }
 0x374   : > { %v8332_v7 = vsel %vm935_vm12, 0.0, %v4551_v55  ;;  %v8346_v48 = vperm.slane %v4570_v22, %v8252_v1  ;;  %v4399_v30 = vsel %vm4249_vm4, %v4397_v4, %v4398_v37  ;;  %v4522_v33 = vsel %vm935_vm12, %v4521_v56, %v8161_v3 }
 0x375   : > { %v8304_v20 = vpop.permute.xlu1 %4198  ;;  %4691 = vrot.lane.b32.xlu2 %v8332_v7, %s7547_s26  ;;  %v4222_v55 = vrot.slane %v8273_v49, 4  ;;  %v8386_v3 = vperm.slane %v4522_v33, %v8252_v1  ;;  %v4237_v22 = vrot.slane %v8242_v46, 6  ;;  %v4238_v63 = vrot.slane %v8273_v49, 6 }
 0x376   : > { %v4208_v34 = vrot.slane %v8304_v20, 2  ;;  %v4300_v35 = vsel %vm4247_vm3, %v4299_v39, %v8304_v20  ;;  %v4575_v0 = vrot.slane %v8346_v48, 4  ;;  %v4224_v8 = vrot.slane %v8304_v20, 4 }
 0x377   : > { %v4301_v60 = vsel %vm4249_vm4, %v4299_v39, %v4300_v35  ;;  %v4400_v35 = vsel %vm4251_vm1, %v4397_v4, %v4399_v30  ;;  %v4241_v33 = vrot.slane %v8275_v21, 6 }
 0x378   : > { %v4302_v23 = vsel %vm4251_vm1, %v4299_v39, %v4301_v60  ;;  %v4356_v15 = vsel %vm4247_vm3, %v4355_v24, %v4208_v34  ;;  %4675 = vrot.lane.b32.xlu1 %v8343_v29, %s7547_s26  ;;  %v8370_v26 = vsel %vm935_vm12, 0.0, %v4575_v0  ;;  %v4223_v34 = vrot.slane %v8250_v47, 4 }
 0x379   : > { %v4303_v43 = vsel %vm4253_vm5, %v4299_v39, %v4302_v23  ;;  %v4357_v40 = vsel %vm4249_vm4, %v4355_v24, %v4356_v15  ;;  %v4401_v23 = vsel %vm4253_vm5, %v4397_v4, %v4400_v35 }
 0x37a   : > { %v4601_v10 = vrot.slane %v4303_v43, 4  ;;  %v4358_v13 = vsel %vm4251_vm1, %v4355_v24, %v4357_v40  ;;  %v4453_v40 = vrot.slane %v4237_v22, 7 }
 0x37b   : > { %v4359_v31 = vsel %vm4253_vm5, %v4355_v24, %v4358_v13  ;;  %v4404_v24 = vrot.slane %v4223_v34, 7  ;;  %v4239_v13 = vrot.slane %v8250_v47, 6 }
 0x37c   : > { %v4602_v25 = vsel %vm935_vm12, %v4601_v10, %v8147_v57  ;;  %v4352_v57 = vsel %vm4253_vm5, %v4348_v36, %v4351_v54  ;;  %v4609_v61 = vrot.slane %v4359_v31, 4  ;;  %v4225_v36 = vrot.slane %v8275_v21, 4 }
 0x37d   : > { %v8355_v28 = vperm.slane %v4602_v25, %v8252_v1  ;;  %4697 = vrot.lane.b32.xlu2 %v8346_v48, %s7547_s26  ;;  %v4577_v39 = vrot.slane %v4352_v57, 4  ;;  %v4405_v5 = vsel %vm4247_vm3, %v4404_v24, %v4222_v55  ;;  %v4454_v0 = vsel %vm4247_vm3, %v4453_v40, %v4236_v11 }
 0x37e   : > { %v4610_v58 = vsel %vm935_vm12, %v4609_v61, %v8174_v41  ;;  %v4411_v19 = vrot.slane %v4225_v36, 7  ;;  %v4553_v41 = vrot.slane %v4401_v23, 4  ;;  %v4406_v14 = vsel %vm4249_vm4, %v4404_v24, %v4405_v5 }
 0x37f   : > { %4713 = vrot.lane.b32.xlu0 %v8355_v28, %s7547_s26  ;;  %v4607_v62 = vrot.slane %v8355_v28, 4  ;;  %v4578_v59 = vsel %vm935_vm12, %v4577_v39, %v8166_v53  ;;  %v4527_v53 = vrot.slane %v8386_v3, 4  ;;  %v8409_v43 = vperm.slane %v4610_v58, %v8252_v1 }
 0x380   : > { %4705 = vrot.lane.b32.xlu1 %v8370_v26, %s7547_s26  ;;  %v8403_v15 = vperm.slane %v4578_v59, %v8252_v1  ;;  %v4412_v52 = vsel %vm4247_vm3, %v4411_v19, %v4224_v8  ;;  %v4554_v25 = vsel %vm935_vm12, %v4553_v41, %v8185_v50  ;;  %v4407_v42 = vsel %vm4251_vm1, %v4404_v24, %v4406_v14 }
 0x381   : > { %v8394_v60 = vsel %vm935_vm12, 0.0, %v4607_v62  ;;  %v4413_v10 = vsel %vm4249_vm4, %v4411_v19, %v4412_v52  ;;  %v8416_v4 = vsel %vm935_vm12, 0.0, %v4527_v53  ;;  %v4615_v46 = vrot.slane %v8409_v43, 4 }
 0x382   : > { %v4414_v54 = vsel %vm4251_vm1, %v4411_v19, %v4413_v10  ;;  %v4583_v37 = vrot.slane %v8403_v15, 4  ;;  %v8435_v50 = vperm.slane %v4554_v25, %v8252_v1  ;;  %v4408_v57 = vsel %vm4253_vm5, %v4404_v24, %v4407_v42 }
 0x383   : > { %v8432_v56 = vsel %vm935_vm12, 0.0, %v4615_v46  ;;  %v4415_v31 = vsel %vm4253_vm5, %v4411_v19, %v4414_v54  ;;  %v4455_v47 = vsel %vm4249_vm4, %v4453_v40, %v4454_v0  ;;  %v4460_v32 = vrot.slane %v4239_v13, 7 }
 0x384   : > { %v8444_v30 = vsel %vm935_vm12, 0.0, %v4583_v37  ;;  %v4585_v39 = vrot.slane %v4408_v57, 4  ;;  %v4559_v34 = vrot.slane %v8435_v50, 4  ;;  %v4617_v49 = vrot.slane %v4415_v31, 4 }
 0x385   : > { %4721 = vrot.lane.b32.xlu2 %v8394_v60, %s7547_s26  ;;  %v4461_v62 = vsel %vm4247_vm3, %v4460_v32, %v4238_v63  ;;  %v4456_v61 = vsel %vm4251_vm1, %v4453_v40, %v4455_v47  ;;  %v4240_v36 = vrot.slane %v8304_v20, 6  ;;  %v4467_v55 = vrot.slane %v4241_v33, 7 }
 0x386   : > { %v4586_v35 = vsel %vm935_vm12, %v4585_v39, %v8191_v38  ;;  %v4462_v21 = vsel %vm4249_vm4, %v4460_v32, %v4461_v62  ;;  %v8459_v8 = vsel %vm935_vm12, 0.0, %v4559_v34  ;;  %v4618_v59 = vsel %vm935_vm12, %v4617_v49, %v8203_v6 }
 0x387   : > { %4683 = vrot.lane.b32.xlu0 %v8307_v45, %s7547_s26  ;;  %v4457_v20 = vsel %vm4253_vm5, %v4453_v40, %v4456_v61  ;;  %v4468_v24 = vsel %vm4247_vm3, %v4467_v55, %v4240_v36  ;;  %v8468_v58 = vperm.slane %v4586_v35, %v8252_v1  ;;  %v4463_v38 = vsel %vm4251_vm1, %v4460_v32, %v4462_v21 }
 0x388   : > { %4699 = vrot.lane.b32.xlu1 %v8403_v15, %s7547_s26  ;;  %v8472_v19 = vperm.slane %v4618_v59, %v8252_v1  ;;  %v4561_v23 = vrot.slane %v4457_v20, 4  ;;  %v4469_v6 = vsel %vm4249_vm4, %v4467_v55, %v4468_v24  ;;  %v4464_v5 = vsel %vm4253_vm5, %v4460_v32, %v4463_v38 }
 0x389   : > { %v4470_v22 = vsel %vm4251_vm1, %v4467_v55, %v4469_v6  ;;  %v4591_v41 = vrot.slane %v8468_v58, 4  ;;  %v4593_v14 = vrot.slane %v4464_v5, 4 }
 0x38a   : > { %v4623_v53 = vrot.slane %v8472_v19, 4  ;;  %v4562_v52 = vsel %vm935_vm12, %v4561_v23, %v8210_v16  ;;  %v4471_v46 = vsel %vm4253_vm5, %v4467_v55, %v4470_v22  ;;  %v8501_v16 = vperm.slane %v8376_v44, %v8252_v1 }
 0x38b   : > { %v8491_v40 = vperm.slane %v4562_v52, %v8252_v1  ;;  %v8497_v25 = vsel %vm935_vm12, 0.0, %v4591_v41  ;;  %v4594_v42 = vsel %vm935_vm12, %v4593_v14, %v8220_v27  ;;  %v4625_v11 = vrot.slane %v4471_v46, 4 }
 0x38c   : > { %v8488_v10 = vsel %vm935_vm12, 0.0, %v4623_v53  ;;  %v8509_v13 = vperm.slane %v4594_v42, %v8252_v1  ;;  %v4535_v37 = vrot.slane %v8501_v16, 4 }
 0x38d   : > { %4667 = vrot.lane.b32.xlu2 %v8310_v18, %s7547_s26  ;;  %v4567_v54 = vrot.slane %v8491_v40, 4  ;;  %v4626_v44 = vsel %vm935_vm12, %v4625_v11, %v8225_v12 }
 0x38e   : > { %v4599_v27 = vrot.slane %v8509_v13, 4  ;;  %v8523_v57 = vsel %vm935_vm12, 0.0, %v4535_v37  ;;  %v8526_v63 = vperm.slane %v4626_v44, %v8252_v1 }
 0x38f   : > { %4677 = vrot.lane.b32.xlu0 %v8416_v4, %s7547_s26  ;;  %v8517_v0 = vsel %vm935_vm12, 0.0, %v4567_v54 }
 0x390   : > { %4723 = vrot.lane.b32.xlu1 %v8432_v56, %s7547_s26  ;;  %v8531_v31 = vsel %vm935_vm12, 0.0, %v4599_v27  ;;  %v4631_v12 = vrot.slane %v8526_v63, 4 }
 0x392   : > { %v8539_v47 = vsel %vm935_vm12, 0.0, %v4631_v12 }
 0x395   : > { %4715 = vrot.lane.b32.xlu2 %v8409_v43, %s7547_s26 }
 0x397   : > { %4707 = vrot.lane.b32.xlu0 %v8444_v30, %s7547_s26 }
 0x398   : > { %4693 = vrot.lane.b32.xlu1 %v8459_v8, %s7547_s26 }
 0x39d   : > { %4685 = vrot.lane.b32.xlu2 %v8435_v50, %s7547_s26 }
 0x39f   : > { %4701 = vrot.lane.b32.xlu0 %v8468_v58, %s7547_s26 }
 0x3a0   : > { %4669 = vrot.lane.b32.xlu1 %v8386_v3, %s7547_s26 }
 0x3a5   : > { %4709 = vrot.lane.b32.xlu2 %v8497_v25, %s7547_s26 }
 0x3a7   : > { %4725 = vrot.lane.b32.xlu0 %v8488_v10, %s7547_s26 }
 0x3a8   : > { %4717 = vrot.lane.b32.xlu1 %v8472_v19, %s7547_s26 }
 0x3ad   : > { %4679 = vrot.lane.b32.xlu2 %v8523_v57, %s7547_s26 }
 0x3af   : > { %4695 = vrot.lane.b32.xlu0 %v8517_v0, %s7547_s26 }
 0x3b0   : > { %4711 = vrot.lane.b32.xlu1 %v8531_v31, %s7547_s26 }
 0x3b5   : > { %4727 = vrot.lane.b32.xlu2 %v8539_v47, %s7547_s26 }
 0x3b7   : > { %4671 = vrot.lane.b32.xlu0 %v8501_v16, %s7547_s26 }
 0x3b8   : > { %4687 = vrot.lane.b32.xlu1 %v8491_v40, %s7547_s26 }
 0x3bd   : > { %4703 = vrot.lane.b32.xlu2 %v8509_v13, %s7547_s26 }
 0x3bf   : > { %4719 = vrot.lane.b32.xlu0 %v8526_v63, %s7547_s26 }
 0x3c5   : > { %v4674_v32 = vpop.permute.xlu2 %4673 }
 0x3c6   : > { %v4765_v33 = vmax.f32 %v8280_v51, %v4674_v32 }
 0x3c8   : > { %v4793_v49 = vrot.slane %v4765_v33, 4 }
 0x3cf   : > { %v4692_v39 = vpop.permute.xlu2 %4691 }
 0x3d7   : > { %v4698_v35 = vpop.permute.xlu2 %4697 }
 0x3da   : > { %v4666_v34 = vpop.permute.xlu0 %4665 }
 0x3db   : > { %v4761_v62 = vmax.f32 %v8264_v9, %v4666_v34 }
 0x3dd   : > { %v4794_v61 = vsel %vm935_vm12, %v4793_v49, %v4761_v62  ;;  %v4774_v49 = vmax.f32 %v8332_v7, %v4692_v39 }
 0x3de   : > { %v4798_v36 = vperm.slane %v4794_v61, %v8252_v1 }
 0x3df   : > { %v4722_v20 = vpop.permute.xlu2 %4721 }
 0x3e0   : > { %4925 = vst [vmem:[#allocation1] ss:$4 sm:$0xff] %v4798_v36  ;;  %v4789_v51 = vmax.f32 %v8394_v60, %v4722_v20  ;;  %v4777_v60 = vmax.f32 %v8346_v48, %v4698_v35  ;;  %v4799_v27 = vrot.slane %v4798_v36, 4 }
 0x3e2   : > { %v4682_v55 = vpop.permute.xlu1 %4681  ;;  %v4817_v53 = vrot.slane %v4789_v51, 4  ;;  %v4800_v62 = vsel %vm935_vm12, 0.0, %v4799_v27 }
 0x3e3   : > { %v4769_v24 = vmax.f32 %v8298_v2, %v4682_v55 }
 0x3e5   : > { %v4690_v21 = vpop.permute.xlu0 %4689 }
 0x3e6   : > { %v4773_v59 = vmax.f32 %v8321_v17, %v4690_v21 }
 0x3e7   : > { %v4668_v14 = vpop.permute.xlu2 %4667 }
 0x3e8   : > { %v4801_v38 = vrot.slane %v4773_v59, 4 }
 0x3ea   : > { %v4802_v23 = vsel %vm935_vm12, %v4801_v38, %v4769_v24  ;;  %v4676_v6 = vpop.permute.xlu1 %4675  ;;  %v4833_v24 = vrot.slane %v4774_v49, 4  ;;  %v4762_v38 = vmax.f32 %v8310_v18, %v4668_v14 }
 0x3eb   : > { %v4806_v9 = vperm.slane %v4802_v23, %v8252_v1 }
 0x3ed   : > { %4927 = vst [vmem:[#allocation1 + $0x1] ss:$4 sm:$0xff] %v4806_v9  ;;  %v4807_v12 = vrot.slane %v4806_v9, 4 }
 0x3ef   : > { %v4716_v32 = vpop.permute.xlu2 %4715  ;;  %v4808_v35 = vsel %vm935_vm12, 0.0, %v4807_v12 }
 0x3f0   : > { %v4786_v7 = vmax.f32 %v8409_v43, %v4716_v32 }
 0x3f1   : > { %v4714_v5 = vpop.permute.xlu0 %4713 }
 0x3f2   : > { %v4785_v22 = vmax.f32 %v8355_v28, %v4714_v5  ;;  %v4706_v41 = vpop.permute.xlu1 %4705 }
 0x3f3   : > { %v4781_v2 = vmax.f32 %v8370_v26, %v4706_v41  ;;  %v4766_v26 = vmax.f32 %v8343_v29, %v4676_v6 }
 0x3f4   : > { %v4818_v52 = vsel %vm935_vm12, %v4817_v53, %v4785_v22 }
 0x3f5   : > { %v4822_v17 = vperm.slane %v4818_v52, %v8252_v1  ;;  %v4809_v46 = vrot.slane %v4781_v2, 4  ;;  %v4825_v21 = vrot.slane %v4766_v26, 4 }
 0x3f7   : > { %4931 = vst [vmem:[#allocation1 + $0x3] ss:$4 sm:$0xff] %v4822_v17  ;;  %v4810_v11 = vsel %vm935_vm12, %v4809_v46, %v4777_v60  ;;  %v4823_v33 = vrot.slane %v4822_v17, 4  ;;  %v4686_v9 = vpop.permute.xlu2 %4685 }
 0x3f8   : > { %v4814_v54 = vperm.slane %v4810_v11, %v8252_v1 }
 0x3f9   : > { %v4684_v42 = vpop.permute.xlu0 %4683  ;;  %v4824_v55 = vsel %vm935_vm12, 0.0, %v4823_v33 }
 0x3fa   : > { %4929 = vst [vmem:[#allocation1 + $0x2] ss:$4 sm:$0xff] %v4814_v54  ;;  %v4700_v37 = vpop.permute.xlu1 %4699  ;;  %v4815_v28 = vrot.slane %v4814_v54, 4  ;;  %v4770_v29 = vmax.f32 %v8307_v45, %v4684_v42  ;;  %v4826_v45 = vsel %vm935_vm12, %v4825_v21, %v4762_v38 }
 0x3fc   : > { %v4816_v48 = vsel %vm935_vm12, 0.0, %v4815_v28  ;;  %v4834_v51 = vsel %vm935_vm12, %v4833_v24, %v4770_v29 }
 0x3fd   : > { %v4838_v22 = vperm.slane %v4834_v51, %v8252_v1 }
 0x3ff   : > { %v4710_v41 = vpop.permute.xlu2 %4709  ;;  %v4839_v14 = vrot.slane %v4838_v22, 4 }
 0x400   : > { %v4783_v32 = vmax.f32 %v8497_v25, %v4710_v41 }
 0x401   : > { %v8565_v44 = vpop.permute.xlu0 %4677  ;;  %v8569_v34 = vld.sshfl [vmem:[#allocation1] sm:$0xff pattern:$0x73625140]  ;;  %v4840_v12 = vsel %vm935_vm12, 0.0, %v4839_v14 }
 0x402   : > { %4942 = vst [vmem:[#allocation1 + $0x2] ss:$4 sm:$0xff] %v4816_v48  ;;  %v4724_v61 = vpop.permute.xlu1 %4723  ;;  %v4767_v33 = vmax.f32 %v8416_v4, %v8565_v44  ;;  %v4873_v25 = vrot.slane %v4783_v32, 4 }
 0x403   : > { %4938 = vst [vmem:[#allocation1] ss:$4 sm:$0xff] %v4800_v62  ;;  %v4790_v36 = vmax.f32 %v8432_v56, %v4724_v61  ;;  %v4778_v56 = vmax.f32 %v8403_v15, %v4700_v37  ;;  %v4771_v61 = vmax.f32 %v8435_v50, %v4686_v9 }
 0x404   : > { %4940 = vst [vmem:[#allocation1 + $0x1] ss:$4 sm:$0xff] %v4808_v35  ;;  %v4857_v29 = vrot.slane %v4767_v33, 4 }
 0x405   : > { %4944 = vst [vmem:[#allocation1 + $0x3] ss:$4 sm:$0xff] %v4824_v55  ;;  %v4849_v59 = vrot.slane %v4790_v36, 4 }
 0x407   : > { %v4850_v23 = vsel %vm935_vm12, %v4849_v59, %v4786_v7  ;;  %v4680_v36 = vpop.permute.xlu2 %4679 }
 0x408   : > { %v4854_v43 = vperm.slane %v4850_v23, %v8252_v1 }
 0x409   : > { %v4708_v20 = vpop.permute.xlu0 %4707 }
 0x40a   : > { %v4782_v39 = vmax.f32 %v8444_v30, %v4708_v20  ;;  %v4694_v53 = vpop.permute.xlu1 %4693  ;;  %v4830_v30 = vperm.slane %v4826_v45, %v8252_v1  ;;  %v4855_v42 = vrot.slane %v4854_v43, 4 }
 0x40b   : > { %v4775_v11 = vmax.f32 %v8459_v8, %v4694_v53  ;;  %v4768_v53 = vmax.f32 %v8523_v57, %v4680_v36 }
 0x40c   : > { %v4841_v6 = vrot.slane %v4782_v39, 4  ;;  %v4945_v18 = vld.sshfl [vmem:[#allocation1] sm:$0xff pattern:$0x73625140]  ;;  %v4831_v60 = vrot.slane %v4830_v30, 4  ;;  %v4856_v8 = vsel %vm935_vm12, 0.0, %v4855_v42 }
 0x40d   : > { %4955 = vst [vmem:[#allocation1 + $0x1] ss:$4 sm:$0xff] %v4838_v22  ;;  %4946 = vrot.lane.b32.xlu1 %v4945_v18, %s7548_s27  ;;  %v4865_v26 = vrot.slane %v4775_v11, 4 }
 0x40e   : > { %v4842_v5 = vsel %vm935_vm12, %v4841_v6, %v4778_v56  ;;  %4953 = vst [vmem:[#allocation1] ss:$4 sm:$0xff] %v4830_v30  ;;  %v4832_v27 = vsel %vm935_vm12, 0.0, %v4831_v60  ;;  %v4889_v60 = vrot.slane %v4768_v53, 4 }
 0x40f   : > { %v4846_v52 = vperm.slane %v4842_v5, %v8252_v1  ;;  %4959 = vst [vmem:[#allocation1 + $0x3] ss:$4 sm:$0xff] %v4854_v43  ;;  %v4866_v4 = vsel %vm935_vm12, %v4865_v26, %v4771_v61  ;;  %v4728_v39 = vpop.permute.xlu2 %4727 }
 0x411   : > { %v4702_v15 = vpop.permute.xlu0 %4701  ;;  %4957 = vst [vmem:[#allocation1 + $0x2] ss:$4 sm:$0xff] %v4846_v52  ;;  %v4847_v2 = vrot.slane %v4846_v52, 4  ;;  %v4792_v52 = vmax.f32 %v8539_v47, %v4728_v39 }
 0x412   : > { %v4670_v17 = vpop.permute.xlu1 %4669 }
 0x413   : > { %v4848_v54 = vsel %vm935_vm12, 0.0, %v4847_v2  ;;  %v4763_v35 = vmax.f32 %v8386_v3, %v4670_v17  ;;  %v4913_v14 = vrot.slane %v4792_v52, 4 }
 0x415   : > { %v4858_v59 = vsel %vm935_vm12, %v4857_v29, %v4763_v35 }
 0x416   : > { %v4862_v24 = vperm.slane %v4858_v59, %v8252_v1 }
 0x417   : > { %v4704_v41 = vpop.permute.xlu2 %4703 }
 0x418   : > { %v4960_v37 = vld.sshfl [vmem:[#allocation1] sm:$0xff pattern:$0x73625140]  ;;  %v4863_v51 = vrot.slane %v4862_v24, 4  ;;  %v4780_v47 = vmax.f32 %v8509_v13, %v4704_v41 }
 0x419   : > { %v4726_v46 = vpop.permute.xlu0 %4725  ;;  %4972 = vst [vmem:[#allocation1 + $0x2] ss:$4 sm:$0xff] %v4848_v54  ;;  %4961 = vrot.lane.b32.xlu0 %v4960_v37, %s7545_s25 }
 0x41a   : > { %v4791_v28 = vmax.f32 %v8488_v10, %v4726_v46  ;;  %4968 = vst [vmem:[#allocation1] ss:$4 sm:$0xff] %v4832_v27  ;;  %v4718_v48 = vpop.permute.xlu1 %4717  ;;  %v4779_v10 = vmax.f32 %v8468_v58, %v4702_v15  ;;  %v4870_v58 = vperm.slane %v4866_v4, %v8252_v1  ;;  %v4864_v22 = vsel %vm935_vm12, 0.0, %v4863_v51 }
 0x41b   : > { %4970 = vst [vmem:[#allocation1 + $0x1] ss:$4 sm:$0xff] %v4840_v12  ;;  %v4787_v62 = vmax.f32 %v8472_v19, %v4718_v48 }
 0x41c   : > { %4974 = vst [vmem:[#allocation1 + $0x3] ss:$4 sm:$0xff] %v4856_v8  ;;  %v4881_v49 = vrot.slane %v4791_v28, 4  ;;  %v4874_v44 = vsel %vm935_vm12, %v4873_v25, %v4779_v10  ;;  %v4871_v56 = vrot.slane %v4870_v58, 4 }
 0x41d   : > { %v4878_v19 = vperm.slane %v4874_v44, %v8252_v1 }
 0x41e   : > { %v4882_v21 = vsel %vm935_vm12, %v4881_v49, %v4787_v62  ;;  %v4872_v18 = vsel %vm935_vm12, 0.0, %v4871_v56 }
 0x41f   : > { %v4886_v50 = vperm.slane %v4882_v21, %v8252_v1  ;;  %v4879_v23 = vrot.slane %v4878_v19, 4 }
 0x421   : > { %v4696_v55 = vpop.permute.xlu0 %4695  ;;  %v4887_v38 = vrot.slane %v4886_v50, 4  ;;  %v4880_v17 = vsel %vm935_vm12, 0.0, %v4879_v23 }
 0x422   : > { %v4712_v3 = vpop.permute.xlu1 %4711  ;;  %v4776_v5 = vmax.f32 %v8517_v0, %v4696_v55 }
 0x423   : > { %v4975_v20 = vld.sshfl [vmem:[#allocation1] sm:$0xff pattern:$0x73625140]  ;;  %v4888_v45 = vsel %vm935_vm12, 0.0, %v4887_v38  ;;  %v4784_v43 = vmax.f32 %v8531_v31, %v4712_v3 }
 0x424   : > { %4985 = vst [vmem:[#allocation1 + $0x1] ss:$4 sm:$0xff] %v4870_v58  ;;  %v4897_v57 = vrot.slane %v4776_v5, 4 }
 0x425   : > { %4987 = vst [vmem:[#allocation1 + $0x2] ss:$4 sm:$0xff] %v4878_v19  ;;  %v4905_v31 = vrot.slane %v4784_v43, 4 }
 0x426   : > { %4983 = vst [vmem:[#allocation1] ss:$4 sm:$0xff] %v4862_v24 }
 0x427   : > { %4989 = vst [vmem:[#allocation1 + $0x3] ss:$4 sm:$0xff] %v4886_v50  ;;  %v4906_v11 = vsel %vm935_vm12, %v4905_v31, %v4780_v47 }
 0x428   : > { %v4910_v28 = vperm.slane %v4906_v11, %v8252_v1 }
 0x429   : > { %v4672_v7 = vpop.permute.xlu0 %4671 }
 0x42a   : > { %v4688_v6 = vpop.permute.xlu1 %4687  ;;  %v4764_v0 = vmax.f32 %v8501_v16, %v4672_v7  ;;  %v4911_v12 = vrot.slane %v4910_v28, 4 }
 0x42b   : > { %v4772_v15 = vmax.f32 %v8491_v40, %v4688_v6 }
 0x42c   : > { %v4890_v42 = vsel %vm935_vm12, %v4889_v60, %v4764_v0 }
 0x42d   : > { %v4898_v46 = vsel %vm935_vm12, %v4897_v57, %v4772_v15  ;;  %v4894_v54 = vperm.slane %v4890_v42, %v8252_v1 }
 0x42e   : > { %v8613_v9 = vld.sshfl [vmem:[#allocation1] sm:$0xff pattern:$0x73625140]  ;;  %v4902_v16 = vperm.slane %v4898_v46, %v8252_v1 }
 0x42f   : > { %5002 = vst [vmem:[#allocation1 + $0x3] ss:$4 sm:$0xff] %v4888_v45  ;;  %v4895_v13 = vrot.slane %v4894_v54, 4 }
 0x430   : > { %4996 = vst [vmem:[#allocation1] ss:$4 sm:$0xff] %v4864_v22  ;;  %v4903_v27 = vrot.slane %v4902_v16, 4 }
 0x431   : > { %v4720_v30 = vpop.permute.xlu0 %4719  ;;  %4998 = vst [vmem:[#allocation1 + $0x1] ss:$4 sm:$0xff] %v4872_v18  ;;  %v4896_v33 = vsel %vm935_vm12, 0.0, %v4895_v13 }
 0x432   : > { %5000 = vst [vmem:[#allocation1 + $0x2] ss:$4 sm:$0xff] %v4880_v17  ;;  %v4788_v2 = vmax.f32 %v8526_v63, %v4720_v30  ;;  %v4904_v26 = vsel %vm935_vm12, 0.0, %v4903_v27 }
 0x434   : > { %v4914_v40 = vsel %vm935_vm12, %v4913_v14, %v4788_v2 }
 0x435   : > { %v4918_v63 = vperm.slane %v4914_v40, %v8252_v1  ;;  %v4912_v1 = vsel %vm935_vm12, 0.0, %v4911_v12 }
 0x437   : > { %v4919_v32 = vrot.slane %v4918_v63, 4 }
 0x439   : > { %v5003_v37 = vld.sshfl [vmem:[#allocation1] sm:$0xff pattern:$0x73625140]  ;;  %v4920_v48 = vsel %vm935_vm12, 0.0, %v4919_v32 }
 0x43a   : > { %5004 = vrot.lane.b32.xlu2 %v5003_v37, %s7548_s27  ;;  %5011 = vst [vmem:[#allocation1] ss:$4 sm:$0xff] %v4894_v54 }
 0x43b   : > { %5013 = vst [vmem:[#allocation1 + $0x1] ss:$4 sm:$0xff] %v4902_v16 }
 0x43c   : > { %5015 = vst [vmem:[#allocation1 + $0x2] ss:$4 sm:$0xff] %v4910_v28 }
 0x43d   : > { %5017 = vst [vmem:[#allocation1 + $0x3] ss:$4 sm:$0xff] %v4918_v63 }
 0x442   : > { %4976 = vrot.lane.b32.xlu2 %v4975_v20, %s7547_s26 }
 0x444   : > { %v5018_v8 = vld.sshfl [vmem:[#allocation1] sm:$0xff pattern:$0x73625140] }
 0x445   : > { %5019 = vrot.lane.b32.xlu1 %v5018_v8, %s7545_s25  ;;  %5026 = vst [vmem:[#allocation1] ss:$4 sm:$0xff] %v4896_v33 }
 0x446   : > { %5028 = vst [vmem:[#allocation1 + $0x1] ss:$4 sm:$0xff] %v4904_v26 }
 0x447   : > { %5030 = vst [vmem:[#allocation1 + $0x2] ss:$4 sm:$0xff] %v4912_v1 }
 0x448   : > { %5032 = vst [vmem:[#allocation1 + $0x3] ss:$4 sm:$0xff] %v4920_v48 }
 0x44f   : > { %v5033_v10 = vld.sshfl [vmem:[#allocation1] sm:$0xff pattern:$0x73625140] }
 0x450   : > { %5034 = vrot.lane.b32.xlu0 %v5033_v10, %s7547_s26 }
 0x47f   : > { %v4947_v62 = vpop.permute.xlu1 %4946 }
 0x480   : > { %v5038_v35 = vsel %vm5037_vm6, %v8569_v34, %v4947_v62 }
 0x48b   : > { %v4962_v61 = vpop.permute.xlu0 %4961 }
 0x48c   : > { %v5039_v25 = vsel %vm471_vm10, %v5038_v35, %v4962_v61 }
 0x494   : > { %v5005_v49 = vpop.permute.xlu2 %5004 }
 0x495   : > { %v5042_v4 = vsel %vm5037_vm6, %v8613_v9, %v5005_v49 }
 0x49c   : > { %v4977_v36 = vpop.permute.xlu2 %4976 }
 0x49d   : > { %v5041_v55 = vsel %vm5040_vm8, %v5039_v25, %v4977_v36 }
 0x49e   : > { %5045 = vst [vmem:[%s287_s6] sm:$0xff] %v5041_v55 }
 0x4b7   : > { %v5020_v29 = vpop.permute.xlu1 %5019 }
 0x4b8   : > { %v5043_v44 = vsel %vm471_vm10, %v5042_v4, %v5020_v29 }
 0x4c2   : > { %v5035_v21 = vpop.permute.xlu0 %5034 }
 0x4c3   : > { %v5044_v59 = vsel %vm5040_vm8, %v5043_v44, %v5035_v21 }
 0x4c4   : > { %5046 = vst [vmem:[%s287_s6 + $0x8] sm:$0xff] %v5044_v59 }
 0x4c5 PF: > { %s18_s18 = sadd.s32 1, %s7537_s18  }
 0x4c6   : > { %p15_p7 = scmp.ge.s32.totalorder %s18_s18, 4  }
 0x4c8   :  { %17 = sbr.rel (!%p15_p7) target bundleno = 3 (0x3), region = 115 }
 0x4cd   :  { %5068 = vsyncpa [#allocation4], 1 }
 0x4ce   :  { %5070 = vsyncpa [#allocation4 + $0x1], 1 }
 0x4cf   :  { %5071 = vsyncpa [#allocation6], 1 }
 0x4d0   :  { %5072 = vsyncpa [#allocation9], 1 }

</bundles_post_ra>
